<compile_context>
chip_gen: v7x
topology: tpu7x:2x2x1
jax: 0.10.0
libtpu: 0.0.40
codegen_flags: <defaults>
</compile_context>

<pallas_src>
import math
from functools import partial

import jax
import jax.numpy as jnp
from jax.experimental import pallas as pl
from jax.experimental.pallas import tpu as pltpu

NEG_INF = -1e9  # large finite negative instead of -inf (NaN-safe softmax)


# ----------------------------------------------------------------------------
# per-generation budgets
# ----------------------------------------------------------------------------

def _vmem_limit_bytes():
    try:
        cap = int(pltpu.get_tpu_info().vmem_capacity_bytes)
        return max(32 * 1024 * 1024, (cap * 3) // 4)
    except Exception:
        return 48 * 1024 * 1024


VMEM_LIMIT = _vmem_limit_bytes()
_BIG_VMEM = VMEM_LIMIT >= 80 * 1024 * 1024   # v5e/v6e (128 MiB) vs v7x (64 MiB)
MM_TM_CAP = 512 if _BIG_VMEM else 256
MM_TN_CAP = 512 if _BIG_VMEM else 256
MM_TK_CAP = 512
FFN_TF_CAP = 512 if _BIG_VMEM else 256


def _compiler_params(sem):
    return pltpu.CompilerParams(dimension_semantics=sem,
                                vmem_limit_bytes=VMEM_LIMIT)


# ----------------------------------------------------------------------------
# tile helpers
# ----------------------------------------------------------------------------

def _pick_tile(dim, cap, align):
    """Largest tile <= cap that divides dim and is `align`-aligned, else full dim."""
    if dim <= cap:
        return dim
    t = (cap // align) * align
    while t >= align:
        if dim % t == 0:
            return t
        t -= align
    return dim


def _largest_divisor_leq(n, cap):
    d = max(1, min(n, cap))
    while n % d != 0:
        d -= 1
    return d


def _bf16(x):
    return x if x.dtype == jnp.bfloat16 else x.astype(jnp.bfloat16)


# ----------------------------------------------------------------------------
# Tiled matmul kernel: optional fused LayerNorm prologue (cached in VMEM),
# bias / relu / residual epilogue.   y = act(LN(x) @ W + b) + residual
# ----------------------------------------------------------------------------

def _matmul_kernel(x_ref, w_ref, *rest, activation, has_bias, has_residual,
                   has_ln, eps):
    idx = 0
    ln_g = ln_b = b_ref = r_ref = None
    if has_ln:
        ln_g, ln_b = rest[idx], rest[idx + 1]
        idx += 2
    if has_bias:
        b_ref = rest[idx]
        idx += 1
    if has_residual:
        r_ref = rest[idx]
        idx += 1
    o_ref = rest[idx]
    acc_ref = rest[idx + 1]
    xn_ref = rest[idx + 2] if has_ln else None

    j = pl.program_id(1)
    k = pl.program_id(2)

    @pl.when(k == 0)
    def _():
        acc_ref[...] = jnp.zeros_like(acc_ref)

    if has_ln:
        # LN fused into prologue (tk == K, enforced by wrapper); compute ONCE
        # per M-tile (j == 0, k == 0) and cache the bf16 result in VMEM.
        @pl.when((j == 0) & (k == 0))
        def _():
            xf = x_ref[...].astype(jnp.float32)
            mu = jnp.mean(xf, axis=-1, keepdims=True)
            var = jnp.mean(jnp.square(xf - mu), axis=-1, keepdims=True)
            xn = (xf - mu) * jax.lax.rsqrt(var + eps)
            xn = xn * ln_g[...].astype(jnp.float32) + ln_b[...].astype(jnp.float32)
            xn_ref[...] = xn.astype(jnp.bfloat16)
        x = xn_ref[...]
    else:
        x = _bf16(x_ref[...])

    acc_ref[...] += jnp.dot(x, _bf16(w_ref[...]),
                            preferred_element_type=jnp.float32)

    @pl.when(k == pl.num_programs(2) - 1)
    def _():
        y = acc_ref[...]
        if has_bias:
            y = y + b_ref[...].astype(jnp.float32)
        if activation == "relu":
            y = jnp.maximum(y, 0.0)
        if has_residual:
            y = y + r_ref[...].astype(jnp.float32)
        o_ref[...] = y.astype(o_ref.dtype)


def matmul(x, w, b=None, *, activation=None, residual=None, ln=None,
           ln_eps=1e-5, out_dtype=jnp.bfloat16,
           tm_cap=MM_TM_CAP, tn_cap=MM_TN_CAP, tk_cap=MM_TK_CAP):
    """x: (M, K), w: (K, N) bf16, b: (1, N), residual: (M, N), ln: (g, b) (1, K)."""
    M, K = x.shape
    N = w.shape[1]
    tm = _pick_tile(M, tm_cap, 8)
    tn = _pick_tile(N, tn_cap, 128)
    tk = K if ln is not None else _pick_tile(K, tk_cap, 128)

    in_specs = [pl.BlockSpec((tm, tk), lambda i, j, k: (i, k)),
                pl.BlockSpec((tk, tn), lambda i, j, k: (k, j))]
    args = [x, w]
    if ln is not None:
        in_specs += [pl.BlockSpec((1, tk), lambda i, j, k: (0, k)),
                     pl.BlockSpec((1, tk), lambda i, j, k: (0, k))]
        args += [ln[0], ln[1]]
    if b is not None:
        in_specs.append(pl.BlockSpec((1, tn), lambda i, j, k: (0, j)))
        args.append(b)
    if residual is not None:
        in_specs.append(pl.BlockSpec((tm, tn), lambda i, j, k: (i, j)))
        args.append(residual)

    scratch = [pltpu.VMEM((tm, tn), jnp.float32)]
    if ln is not None:
        scratch.append(pltpu.VMEM((tm, K), jnp.bfloat16))

    # LN cache is reused across j -> j must stay sequential on one core.
    sem = ("parallel", "arbitrary", "arbitrary") if ln is not None \
        else ("parallel", "parallel", "arbitrary")

    bytes_acc = int(M * K * x.dtype.itemsize + K * N * w.dtype.itemsize
                    + M * N * jnp.dtype(out_dtype).itemsize
                    + (M * N * 4 if residual is not None else 0))
    kernel = partial(_matmul_kernel, activation=activation,
                     has_bias=b is not None, has_residual=residual is not None,
                     has_ln=ln is not None, eps=ln_eps)
    return pl.pallas_call(
        kernel,
        out_shape=jax.ShapeDtypeStruct((M, N), out_dtype),
        grid=(M // tm, N // tn, K // tk),
        in_specs=in_specs,
        out_specs=pl.BlockSpec((tm, tn), lambda i, j, k: (i, j)),
        scratch_shapes=scratch,
        compiler_params=_compiler_params(sem),
        cost_estimate=pl.CostEstimate(flops=2 * M * K * N,
                                      transcendentals=M if ln is not None else 0,
                                      bytes_accessed=bytes_acc),
    )(*args)


# ----------------------------------------------------------------------------
# Fused FFN kernel:  out = LNfinal?( x + (relu(LN(x) @ W1 + b1) @ W2 + b2) )
# Grid: (M tiles, d_ff tiles).  (M, d_ff) intermediate never hits HBM,
# residual is x itself (no duplicated input stream), LN(x) cached in VMEM.
# ----------------------------------------------------------------------------

def _ffn_kernel(x_ref, w1_ref, b1_ref, w2_ref, b2_ref, g_ref, bt_ref, *rest,
                eps, has_final_ln):
    idx = 0
    fg_ref = fb_ref = None
    if has_final_ln:
        fg_ref, fb_ref = rest[0], rest[1]
        idx = 2
    o_ref, acc_ref, xn_ref = rest[idx], rest[idx + 1], rest[idx + 2]

    f = pl.program_id(1)

    @pl.when(f == 0)
    def _():
        acc_ref[...] = jnp.zeros_like(acc_ref)
        x = x_ref[...].astype(jnp.float32)
        mu = jnp.mean(x, axis=-1, keepdims=True)
        var = jnp.mean(jnp.square(x - mu), axis=-1, keepdims=True)
        xn = (x - mu) * jax.lax.rsqrt(var + eps)
        xn = xn * g_ref[...].astype(jnp.float32) + bt_ref[...].astype(jnp.float32)
        xn_ref[...] = xn.astype(jnp.bfloat16)

    h = jnp.dot(xn_ref[...], _bf16(w1_ref[...]),
                preferred_element_type=jnp.float32)
    h = jnp.maximum(h + b1_ref[...].astype(jnp.float32), 0.0)
    acc_ref[...] += jnp.dot(h.astype(jnp.bfloat16), _bf16(w2_ref[...]),
                            preferred_element_type=jnp.float32)

    @pl.when(f == pl.num_programs(1) - 1)
    def _():
        y = acc_ref[...] + b2_ref[...].astype(jnp.float32) \
            + x_ref[...].astype(jnp.float32)            # residual == x
        if has_final_ln:
            mu = jnp.mean(y, axis=-1, keepdims=True)
            var = jnp.mean(jnp.square(y - mu), axis=-1, keepdims=True)
            y = (y - mu) * jax.lax.rsqrt(var + eps)
            y = y * fg_ref[...].astype(jnp.float32) + fb_ref[...].astype(jnp.float32)
        o_ref[...] = y.astype(o_ref.dtype)


def ffn(x, w1, b1, w2, b2, g, bt, *, eps=1e-5, final_ln=None,
        out_dtype=jnp.bfloat16, tm_cap=MM_TM_CAP, tf_cap=FFN_TF_CAP):
    M, D = x.shape
    d_ff = w1.shape[1]
    tm = _pick_tile(M, tm_cap, 8)
    tf = _pick_tile(d_ff, tf_cap, 128)

    in_specs = [
        pl.BlockSpec((tm, D), lambda i, f: (i, 0)),
        pl.BlockSpec((D, tf), lambda i, f: (0, f)),
        pl.BlockSpec((1, tf), lambda i, f: (0, f)),
        pl.BlockSpec((tf, D), lambda i, f: (f, 0)),
        pl.BlockSpec((1, D), lambda i, f: (0, 0)),
        pl.BlockSpec((1, D), lambda i, f: (0, 0)),
        pl.BlockSpec((1, D), lambda i, f: (0, 0)),
    ]
    args = [x, w1, b1, w2, b2, g, bt]
    if final_ln is not None:
        in_specs += [pl.BlockSpec((1, D), lambda i, f: (0, 0)),
                     pl.BlockSpec((1, D), lambda i, f: (0, 0))]
        args += [final_ln[0], final_ln[1]]

    bytes_acc = int(M * D * (x.dtype.itemsize + jnp.dtype(out_dtype).itemsize)
                    + 2 * D * d_ff * w1.dtype.itemsize)
    return pl.pallas_call(
        partial(_ffn_kernel, eps=eps, has_final_ln=final_ln is not None),
        out_shape=jax.ShapeDtypeStruct((M, D), out_dtype),
        grid=(M // tm, d_ff // tf),
        in_specs=in_specs,
        out_specs=pl.BlockSpec((tm, D), lambda i, f: (i, 0)),
        scratch_shapes=[pltpu.VMEM((tm, D), jnp.float32),
                        pltpu.VMEM((tm, D), jnp.bfloat16)],
        compiler_params=_compiler_params(("parallel", "arbitrary")),
        cost_estimate=pl.CostEstimate(flops=4 * M * D * d_ff,
                                      transcendentals=2 * M,
                                      bytes_accessed=bytes_acc),
    )(*args)


# ----------------------------------------------------------------------------
# Flash-style attention: grid over (head-batches, Sk tiles), online softmax
# with f32 VMEM accumulators, normalization applied AFTER the PV matmul.
# Causal mask generated in-kernel (no dense mask DMA for self-attention).
# ----------------------------------------------------------------------------

def _attn_kernel(q_ref, k_ref, v_ref, *rest, scale, causal, has_mask, tks):
    idx = 0
    m_in = None
    if has_mask:
        m_in = rest[0]
        idx = 1
    o_ref, m_sc, l_sc, acc_sc = rest[idx], rest[idx + 1], rest[idx + 2], rest[idx + 3]

    kv = pl.program_id(1)
    Sq = q_ref.shape[1]

    @pl.when(kv == 0)
    def _():
        m_sc[...] = jnp.full_like(m_sc, -1e30)
        l_sc[...] = jnp.zeros_like(l_sc)
        acc_sc[...] = jnp.zeros_like(acc_sc)

    s = jnp.einsum("bqd,bkd->bqk", _bf16(q_ref[...]), _bf16(k_ref[...]),
                   preferred_element_type=jnp.float32) * scale
    if causal:
        row = jax.lax.broadcasted_iota(jnp.int32, (Sq, tks), 0)
        col = jax.lax.broadcasted_iota(jnp.int32, (Sq, tks), 1) + kv * tks
        s = s + jnp.where(col <= row, 0.0, NEG_INF)[None, :, :]
    if has_mask:
        s = s + m_in[...].astype(jnp.float32)[None, :, :]

    m_prev = m_sc[...]
    m_new = jnp.maximum(m_prev, jnp.max(s, axis=-1, keepdims=True))
    alpha = jnp.exp(m_prev - m_new)
    p = jnp.exp(s - m_new)
    l_sc[...] = alpha * l_sc[...] + jnp.sum(p, axis=-1, keepdims=True)
    acc_sc[...] = alpha * acc_sc[...] + jnp.einsum(
        "bqk,bkd->bqd", p.astype(jnp.bfloat16), _bf16(v_ref[...]),
        preferred_element_type=jnp.float32)
    m_sc[...] = m_new

    @pl.when(kv == pl.num_programs(1) - 1)
    def _():
        # normalize once on the (hb, Sq, dk) accumulator (not the (.., Sk) probs)
        o_ref[...] = (acc_sc[...] * pl.reciprocal(l_sc[...], approx=True)
                      ).astype(o_ref.dtype)


def _attn_head_block(BH, Sq, tks, dk):
    budget = 6 * 1024 * 1024                                # f32 working set/step
    per_head = (Sq * tks + 3 * Sq * dk + 2 * tks * dk) * 4
    cap = max(1, budget // max(per_head, 1))
    cap = min(cap, 8)
    if BH >= 2:
        cap = max(1, min(cap, BH // 2))   # >=2 grid steps -> both v7x TCs busy
    return _largest_divisor_leq(BH, cap)


def attention(q, k, v, mask, scale, *, causal):
    """q: (BH, Sq, dk), k/v: (BH, Sk, dk), mask: (Sq, Sk) additive or None."""
    BH, Sq, dk = q.shape
    Sk = k.shape[1]
    tks = _pick_tile(Sk, 512, 128)
    hb = _attn_head_block(BH, Sq, tks, dk)
    has_mask = mask is not None

    in_specs = [pl.BlockSpec((hb, Sq, dk), lambda i, kv: (i, 0, 0)),
                pl.BlockSpec((hb, tks, dk), lambda i, kv: (i, kv, 0)),
                pl.BlockSpec((hb, tks, dk), lambda i, kv: (i, kv, 0))]
    args = [q, k, v]
    if has_mask:
        in_specs.append(pl.BlockSpec((Sq, tks), lambda i, kv: (0, kv)))
        args.append(mask)

    bytes_acc = int((BH * Sq * dk + 2 * BH * Sk * dk) * q.dtype.itemsize
                    + BH * Sq * dk * 2 + (Sq * Sk * 4 if has_mask else 0))
    return pl.pallas_call(
        partial(_attn_kernel, scale=scale, causal=causal,
                has_mask=has_mask, tks=tks),
        out_shape=jax.ShapeDtypeStruct((BH, Sq, dk), jnp.bfloat16),
        grid=(BH // hb, Sk // tks),
        in_specs=in_specs,
        out_specs=pl.BlockSpec((hb, Sq, dk), lambda i, kv: (i, 0, 0)),
        scratch_shapes=[pltpu.VMEM((hb, Sq, 1), jnp.float32),
                        pltpu.VMEM((hb, Sq, 1), jnp.float32),
                        pltpu.VMEM((hb, Sq, dk), jnp.float32)],
        compiler_params=_compiler_params(("parallel", "arbitrary")),
        cost_estimate=pl.CostEstimate(flops=4 * BH * Sq * Sk * dk,
                                      transcendentals=BH * Sq * Sk,
                                      bytes_accessed=bytes_acc),
    )(*args)


# ----------------------------------------------------------------------------
# Standalone LayerNorm (only used if num_layers == 0; otherwise fused into FFN)
# ----------------------------------------------------------------------------

def _ln_kernel(x_ref, g_ref, b_ref, o_ref, *, eps):
    x = x_ref[...].astype(jnp.float32)
    mu = jnp.mean(x, axis=-1, keepdims=True)
    var = jnp.mean(jnp.square(x - mu), axis=-1, keepdims=True)
    y = (x - mu) * jax.lax.rsqrt(var + eps)
    o_ref[...] = (y * g_ref[...] + b_ref[...]).astype(o_ref.dtype)


def layer_norm(x, gamma, beta, eps=1e-5):
    M, D = x.shape
    tm = _pick_tile(M, 512, 8)
    return pl.pallas_call(
        partial(_ln_kernel, eps=eps),
        out_shape=jax.ShapeDtypeStruct((M, D), jnp.float32),
        grid=(M // tm,),
        in_specs=[pl.BlockSpec((tm, D), lambda i: (i, 0)),
                  pl.BlockSpec((1, D), lambda i: (0, 0)),
                  pl.BlockSpec((1, D), lambda i: (0, 0))],
        out_specs=pl.BlockSpec((tm, D), lambda i: (i, 0)),
        compiler_params=_compiler_params(("parallel",)),
    )(x, gamma, beta)


# ----------------------------------------------------------------------------
# Model glue (internal layout: (B, S, D); flattening is a free view)
# ----------------------------------------------------------------------------

def self_attention_block(y, p, n_heads, eps):
    B, S, D = y.shape
    dk = D // n_heads
    y2 = y.reshape(B * S, D)
    qkv = matmul(y2, p["wqkv"], p["bqkv"], ln=(p["ln_g"], p["ln_b"]), ln_eps=eps)
    qkv = qkv.reshape(B, S, 3, n_heads, dk).transpose(2, 0, 3, 1, 4)  # (3,B,H,S,dk)
    q = qkv[0].reshape(B * n_heads, S, dk)
    k = qkv[1].reshape(B * n_heads, S, dk)
    v = qkv[2].reshape(B * n_heads, S, dk)
    oh = attention(q, k, v, None, 1.0 / math.sqrt(dk), causal=True)
    o = oh.reshape(B, n_heads, S, dk).transpose(0, 2, 1, 3).reshape(B * S, D)
    return matmul(o, p["wo"], p["bo"], residual=y2).reshape(B, S, D)


def cross_attention_block(y, mem2, mask, p, n_heads, eps):
    B, S, D = y.shape
    Sm = mem2.shape[0] // B
    dk = D // n_heads
    y2 = y.reshape(B * S, D)
    q = matmul(y2, p["wq"], p["bq"], ln=(p["ln_g"], p["ln_b"]), ln_eps=eps)
    kv = matmul(mem2, p["wkv"], p["bkv"])                 # fused K/V projection
    qh = q.reshape(B, S, n_heads, dk).transpose(0, 2, 1, 3).reshape(B * n_heads, S, dk)
    kv = kv.reshape(B, Sm, 2, n_heads, dk).transpose(2, 0, 3, 1, 4)
    kh = kv[0].reshape(B * n_heads, Sm, dk)
    vh = kv[1].reshape(B * n_heads, Sm, dk)
    oh = attention(qh, kh, vh, mask, 1.0 / math.sqrt(dk), causal=False)
    o = oh.reshape(B, n_heads, S, dk).transpose(0, 2, 1, 3).reshape(B * S, D)
    return matmul(o, p["wo"], p["bo"], residual=y2).reshape(B, S, D)


def ffn_block(y, p, eps, final_ln=None):
    B, S, D = y.shape
    y2 = y.reshape(B * S, D)
    out = ffn(y2, p["w1"], p["b1"], p["w2"], p["b2"], p["ln_g"], p["ln_b"],
              eps=eps, final_ln=final_ln,
              out_dtype=jnp.float32 if final_ln is not None else jnp.bfloat16)
    return out.reshape(B, S, D)


def decoder_layer(y, mem2, attention_mask, p, n_heads, eps=1e-5, final_ln=None):
    y = self_attention_block(y, p["self_attn"], n_heads, eps)
    y = cross_attention_block(y, mem2, attention_mask, p["src_attn"], n_heads, eps)
    y = ffn_block(y, p["ffn"], eps, final_ln=final_ln)
    return y


def positional_encoding_table(S, D):
    position = jnp.arange(S, dtype=jnp.float32)[:, None]
    div_term = jnp.exp(jnp.arange(0, D, 2, dtype=jnp.float32)
                       * (-math.log(10000.0) / D))
    pe = jnp.zeros((S, D), jnp.float32)
    pe = pe.at[:, 0::2].set(jnp.sin(position * div_term))
    pe = pe.at[:, 1::2].set(jnp.cos(position * div_term))
    return pe


def transformer_forward(word_embed, encoder_output, attention_mask, params,
                        num_layers, n_heads):
    S, B, D = word_embed.shape
    Sm = encoder_output.shape[0]
    pe = positional_encoding_table(S, D)
    # PositionalEncoding (dropout = identity); switch to (B,S,D) once; bf16 stream.
    y = jnp.transpose(word_embed + pe[:, None, :], (1, 0, 2)).astype(jnp.bfloat16)
    mem2 = jnp.transpose(encoder_output, (1, 0, 2)).astype(jnp.bfloat16)
    mem2 = mem2.reshape(B * Sm, D)
    if num_layers == 0:
        out = layer_norm(y.reshape(B * S, D), params["norm_g"], params["norm_b"])
        return jnp.transpose(out.reshape(B, S, D), (1, 0, 2))
    for i in range(num_layers):
        fl = (params["norm_g"], params["norm_b"]) if i == num_layers - 1 else None
        y = decoder_layer(y, mem2, attention_mask, params["layers"][i],
                          n_heads, final_ln=fl)
    return jnp.transpose(y, (1, 0, 2))     # back to (S, B, D), f32


# ----------------------------------------------------------------------------
# Deterministic parameter init (weights bf16, biases / LN params f32)
# ----------------------------------------------------------------------------

def init_params(key, num_layers, D, d_ff):
    def dense(k, din, dout):
        w = (jax.random.normal(k, (din, dout), jnp.float32) * 0.02).astype(jnp.bfloat16)
        b = jnp.zeros((1, dout), jnp.float32)
        return w, b

    def ln_pair():
        return jnp.ones((1, D), jnp.float32), jnp.zeros((1, D), jnp.float32)

    layers = []
    keys = jax.random.split(key, num_layers)
    for i in range(num_layers):
        lk = jax.random.split(keys[i], 9)
        # self-attention: fused QKV weight (D, 3D)
        wq, _ = dense(lk[0], D, D)
        wk, _ = dense(lk[1], D, D)
        wv, _ = dense(lk[2], D, D)
        wo_s, bo_s = dense(lk[3], D, D)
        g1, b1n = ln_pair()
        self_attn = {"wqkv": jnp.concatenate([wq, wk, wv], axis=1),
                     "bqkv": jnp.zeros((1, 3 * D), jnp.float32),
                     "wo": wo_s, "bo": bo_s, "ln_g": g1, "ln_b": b1n}
        # cross-attention: separate Q, fused KV (D, 2D)
        wq2, bq2 = dense(lk[4], D, D)
        wk2, _ = dense(lk[5], D, D)
        wv2, _ = dense(lk[6], D, D)
        wo_c, bo_c = dense(lk[7], D, D)
        g2, b2n = ln_pair()
        src_attn = {"wq": wq2, "bq": bq2,
                    "wkv": jnp.concatenate([wk2, wv2], axis=1),
                    "bkv": jnp.zeros((1, 2 * D), jnp.float32),
                    "wo": wo_c, "bo": bo_c, "ln_g": g2, "ln_b": b2n}
        # feed-forward
        fk = jax.random.split(lk[8], 2)
        w1, b1 = dense(fk[0], D, d_ff)
        w2, b2 = dense(fk[1], d_ff, D)
        g3, b3n = ln_pair()
        ffn_p = {"w1": w1, "b1": b1, "w2": w2, "b2": b2, "ln_g": g3, "ln_b": b3n}
        layers.append({"self_attn": self_attn, "src_attn": src_attn, "ffn": ffn_p})
    return {
        "layers": layers,
        "norm_g": jnp.ones((1, D), jnp.float32),
        "norm_b": jnp.zeros((1, D), jnp.float32),
    }


# ----------------------------------------------------------------------------
# Demo
# ----------------------------------------------------------------------------

if __name__ == "__main__":
    S, B, D = 8, 2, 32          # seq, batch, n_features
    S_ENC = 8                   # encoder sequence length
    NUM_LAYERS, N_HEADS, D_FF = 2, 4, 64

    root = jax.random.PRNGKey(0)
    k_we, k_eo, k_par = jax.random.split(root, 3)

    word_embed = jax.random.normal(k_we, (S, B, D), jnp.float32)
    encoder_output = jax.random.normal(k_eo, (S_ENC, B, D), jnp.float32)
    # additive cross-attention mask (0 = attend everywhere)
    # TODO(synk): per-batch key-padding masks are not representable with a single
    #             (S, S_ENC) additive mask, matching the reference signature.
    attention_mask = jnp.zeros((S, S_ENC), jnp.float32)

    params = init_params(k_par, NUM_LAYERS, D, D_FF)

    fwd = jax.jit(transformer_forward, static_argnums=(4, 5))
    out = fwd(word_embed, encoder_output, attention_mask,
              params, NUM_LAYERS, N_HEADS)
    out = jax.block_until_ready(out)
    assert out.shape == (S, B, D)
    assert bool(jnp.all(jnp.isfinite(out.astype(jnp.float32))))
    print("KERNEL_OK")
</pallas_src>

<mosaic_0001>
module attributes {stable_mosaic.version = 11 : i64} {
  func.func @_matmul_kernel(%arg0: i32, %arg1: i32, %arg2: i32, %arg3: memref<16x32xbf16, #tpu.memory_space<vmem>>, %arg4: memref<32x96xbf16, #tpu.memory_space<vmem>>, %arg5: memref<1x32xf32, #tpu.memory_space<vmem>>, %arg6: memref<1x32xf32, #tpu.memory_space<vmem>>, %arg7: memref<1x96xf32, #tpu.memory_space<vmem>>, %arg8: memref<16x96xbf16, #tpu.memory_space<vmem>>, %arg9: memref<16x96xf32, #tpu.memory_space<vmem>>, %arg10: memref<16x32xbf16, #tpu.memory_space<vmem>>) attributes {dimension_semantics = [#tpu.dimension_semantics<parallel>, #tpu.dimension_semantics<arbitrary>, #tpu.dimension_semantics<arbitrary>], iteration_bounds = array<i64: 1, 1, 1>, scalar_prefetch = 0 : i64, scratch_operands = 2 : i64, tpu.core_type = #tpu.core_type<tc>, window_params = [{transform_indices = @transform_0, window_bounds = array<i64: 16, 32>}, {transform_indices = @transform_1, window_bounds = array<i64: 32, 96>}, {transform_indices = @transform_2, window_bounds = array<i64: 1, 32>}, {transform_indices = @transform_3, window_bounds = array<i64: 1, 32>}, {transform_indices = @transform_4, window_bounds = array<i64: 1, 96>}, {transform_indices = @transform_5, window_bounds = array<i64: 16, 96>}]} {
    %c0_i32 = arith.constant 0 : i32
    %0 = arith.cmpi eq, %arg2, %c0_i32 : i32
    %1 = arith.extui %0 : i1 to i32
    %c0_i32_0 = arith.constant 0 : i32
    %2 = arith.cmpi ne, %1, %c0_i32_0 : i32
    scf.if %2 {
      %cst_13 = arith.constant 0.000000e+00 : f32
      %17 = vector.broadcast %cst_13 : f32 to vector<16x96xf32>
      %c0_14 = arith.constant 0 : index
      %c0_15 = arith.constant 0 : index
      %18 = vector.load %arg9[%c0_14, %c0_15] : memref<16x96xf32, #tpu.memory_space<vmem>>, vector<16x96xf32>
      tpu.vector_store %arg9[%c0_14, %c0_15], %17 {strides = array<i32>} : memref<16x96xf32, #tpu.memory_space<vmem>>, vector<16x96xf32>,
    } else {
    }
    %c0_i32_1 = arith.constant 0 : i32
    %3 = arith.cmpi eq, %arg1, %c0_i32_1 : i32
    %c0_i32_2 = arith.constant 0 : i32
    %4 = arith.cmpi eq, %arg2, %c0_i32_2 : i32
    %5 = arith.andi %3, %4 : i1
    %6 = arith.extui %5 : i1 to i32
    %c0_i32_3 = arith.constant 0 : i32
    %7 = arith.cmpi ne, %6, %c0_i32_3 : i32
    scf.if %7 {
      %c0_13 = arith.constant 0 : index
      %c0_14 = arith.constant 0 : index
      %17 = vector.load %arg3[%c0_13, %c0_14] : memref<16x32xbf16, #tpu.memory_space<vmem>>, vector<16x32xbf16>
      %18 = arith.extf %17 : vector<16x32xbf16> to vector<16x32xf32>
      %cst_15 = arith.constant dense<0.000000e+00> : vector<16xf32>
      %19 = vector.multi_reduction <add>, %18, %cst_15 [1] : vector<16x32xf32> to vector<16xf32>
      %20 = vector.shape_cast %19 : vector<16xf32> to vector<16x1xf32>
      %cst_16 = arith.constant 3.200000e+01 : f32
      %21 = vector.broadcast %cst_16 : f32 to vector<16x1xf32>
      %22 = arith.divf %20, %21 : vector<16x1xf32>
      %23 = vector.broadcast %22 : vector<16x1xf32> to vector<16x32xf32>
      %24 = arith.subf %18, %23 : vector<16x32xf32>
      %25 = arith.mulf %24, %24 : vector<16x32xf32>
      %cst_17 = arith.constant dense<0.000000e+00> : vector<16xf32>
      %26 = vector.multi_reduction <add>, %25, %cst_17 [1] : vector<16x32xf32> to vector<16xf32>
      %27 = vector.shape_cast %26 : vector<16xf32> to vector<16x1xf32>
      %cst_18 = arith.constant 3.200000e+01 : f32
      %28 = vector.broadcast %cst_18 : f32 to vector<16x1xf32>
      %29 = arith.divf %27, %28 : vector<16x1xf32>
      %30 = vector.broadcast %22 : vector<16x1xf32> to vector<16x32xf32>
      %31 = arith.subf %18, %30 : vector<16x32xf32>
      %cst_19 = arith.constant 9.99999974E-6 : f32
      %32 = vector.broadcast %cst_19 : f32 to vector<16x1xf32>
      %33 = arith.addf %29, %32 : vector<16x1xf32>
      %34 = math.rsqrt %33 : vector<16x1xf32>
      %35 = vector.broadcast %34 : vector<16x1xf32> to vector<16x32xf32>
      %36 = arith.mulf %31, %35 : vector<16x32xf32>
      %c0_20 = arith.constant 0 : index
      %c0_21 = arith.constant 0 : index
      %37 = vector.load %arg5[%c0_20, %c0_21] : memref<1x32xf32, #tpu.memory_space<vmem>>, vector<1x32xf32>
      %38 = vector.broadcast %37 : vector<1x32xf32> to vector<16x32xf32>
      %39 = arith.mulf %36, %38 : vector<16x32xf32>
      %c0_22 = arith.constant 0 : index
      %c0_23 = arith.constant 0 : index
      %40 = vector.load %arg6[%c0_22, %c0_23] : memref<1x32xf32, #tpu.memory_space<vmem>>, vector<1x32xf32>
      %41 = vector.broadcast %40 : vector<1x32xf32> to vector<16x32xf32>
      %42 = arith.addf %39, %41 : vector<16x32xf32>
      %43 = arith.truncf %42 : vector<16x32xf32> to vector<16x32xbf16>
      %c0_24 = arith.constant 0 : index
      %c0_25 = arith.constant 0 : index
      %44 = vector.load %arg10[%c0_24, %c0_25] : memref<16x32xbf16, #tpu.memory_space<vmem>>, vector<16x32xbf16>
      tpu.vector_store %arg10[%c0_24, %c0_25], %43 {strides = array<i32>} : memref<16x32xbf16, #tpu.memory_space<vmem>>, vector<16x32xbf16>,
    } else {
    }
    %c0 = arith.constant 0 : index
    %c0_4 = arith.constant 0 : index
    %8 = vector.load %arg10[%c0, %c0_4] : memref<16x32xbf16, #tpu.memory_space<vmem>>, vector<16x32xbf16>
    %c0_5 = arith.constant 0 : index
    %c0_6 = arith.constant 0 : index
    %9 = vector.load %arg9[%c0_5, %c0_6] : memref<16x96xf32, #tpu.memory_space<vmem>>, vector<16x96xf32>
    %c0_7 = arith.constant 0 : index
    %c0_8 = arith.constant 0 : index
    %10 = vector.load %arg4[%c0_7, %c0_8] : memref<32x96xbf16, #tpu.memory_space<vmem>>, vector<32x96xbf16>
    %cst = arith.constant dense<0.000000e+00> : vector<16x96xf32>
    %11 = tpu.matmul %8, %10, %cst {dimension_numbers = #tpu.dot_dimension_numbers<[1], [0], [0], [1], [0, 0, 1, 1], [], []>} : vector<16x32xbf16>, vector<32x96xbf16>, vector<16x96xf32> -> vector<16x96xf32>
    %12 = arith.addf %9, %11 : vector<16x96xf32>
    %c0_9 = arith.constant 0 : index
    %c0_10 = arith.constant 0 : index
    %13 = vector.load %arg9[%c0_9, %c0_10] : memref<16x96xf32, #tpu.memory_space<vmem>>, vector<16x96xf32>
    tpu.vector_store %arg9[%c0_9, %c0_10], %12 {strides = array<i32>} : memref<16x96xf32, #tpu.memory_space<vmem>>, vector<16x96xf32>,
    %c0_i32_11 = arith.constant 0 : i32
    %14 = arith.cmpi eq, %arg2, %c0_i32_11 : i32
    %15 = arith.extui %14 : i1 to i32
    %c0_i32_12 = arith.constant 0 : i32
    %16 = arith.cmpi ne, %15, %c0_i32_12 : i32
    scf.if %16 {
      %c0_13 = arith.constant 0 : index
      %c0_14 = arith.constant 0 : index
      %17 = vector.load %arg9[%c0_13, %c0_14] : memref<16x96xf32, #tpu.memory_space<vmem>>, vector<16x96xf32>
      %c0_15 = arith.constant 0 : index
      %c0_16 = arith.constant 0 : index
      %18 = vector.load %arg7[%c0_15, %c0_16] : memref<1x96xf32, #tpu.memory_space<vmem>>, vector<1x96xf32>
      %19 = vector.broadcast %18 : vector<1x96xf32> to vector<16x96xf32>
      %20 = arith.addf %17, %19 : vector<16x96xf32>
      %21 = arith.truncf %20 : vector<16x96xf32> to vector<16x96xbf16>
      %c0_17 = arith.constant 0 : index
      %c0_18 = arith.constant 0 : index
      %22 = vector.load %arg8[%c0_17, %c0_18] : memref<16x96xbf16, #tpu.memory_space<vmem>>, vector<16x96xbf16>
      tpu.vector_store %arg8[%c0_17, %c0_18], %21 {strides = array<i32>} : memref<16x96xbf16, #tpu.memory_space<vmem>>, vector<16x96xbf16>,
    } else {
    }
    return
  }
  func.func @transform_0(%arg0: i32, %arg1: i32, %arg2: i32) -> (i32, i32) {
    %c0_i32 = arith.constant 0 : i32
    return %arg0, %arg2 : i32, i32
  }
  func.func @transform_1(%arg0: i32, %arg1: i32, %arg2: i32) -> (i32, i32) {
    %c0_i32 = arith.constant 0 : i32
    return %arg2, %arg1 : i32, i32
  }
  func.func @transform_2(%arg0: i32, %arg1: i32, %arg2: i32) -> (i32, i32) {
    %c0_i32 = arith.constant 0 : i32
    %c0_i32_0 = arith.constant 0 : i32
    return %c0_i32, %arg2 : i32, i32
  }
  func.func @transform_3(%arg0: i32, %arg1: i32, %arg2: i32) -> (i32, i32) {
    %c0_i32 = arith.constant 0 : i32
    %c0_i32_0 = arith.constant 0 : i32
    return %c0_i32, %arg2 : i32, i32
  }
  func.func @transform_4(%arg0: i32, %arg1: i32, %arg2: i32) -> (i32, i32) {
    %c0_i32 = arith.constant 0 : i32
    %c0_i32_0 = arith.constant 0 : i32
    return %c0_i32, %arg1 : i32, i32
  }
  func.func @transform_5(%arg0: i32, %arg1: i32, %arg2: i32) -> (i32, i32) {
    %c0_i32 = arith.constant 0 : i32
    return %arg0, %arg1 : i32, i32
  }
}

module attributes {stable_mosaic.version = 11 : i64} {
  func.func @_attn_kernel(%arg0: i32, %arg1: i32, %arg2: memref<4x8x8xbf16, #tpu.memory_space<vmem>>, %arg3: memref<4x8x8xbf16, #tpu.memory_space<vmem>>, %arg4: memref<4x8x8xbf16, #tpu.memory_space<vmem>>, %arg5: memref<4x8x8xbf16, #tpu.memory_space<vmem>>, %arg6: memref<4x8x1xf32, #tpu.memory_space<vmem>>, %arg7: memref<4x8x1xf32, #tpu.memory_space<vmem>>, %arg8: memref<4x8x8xf32, #tpu.memory_space<vmem>>) attributes {dimension_semantics = [#tpu.dimension_semantics<parallel>, #tpu.dimension_semantics<arbitrary>], iteration_bounds = array<i64: 2, 1>, scalar_prefetch = 0 : i64, scratch_operands = 3 : i64, tpu.core_type = #tpu.core_type<tc>, window_params = [{transform_indices = @transform_0, window_bounds = array<i64: 4, 8, 8>}, {transform_indices = @transform_1, window_bounds = array<i64: 4, 8, 8>}, {transform_indices = @transform_2, window_bounds = array<i64: 4, 8, 8>}, {transform_indices = @transform_3, window_bounds = array<i64: 4, 8, 8>}]} {
    %c0_i32 = arith.constant 0 : i32
    %0 = arith.cmpi eq, %arg1, %c0_i32 : i32
    %1 = arith.extui %0 : i1 to i32
    %c0_i32_0 = arith.constant 0 : i32
    %2 = arith.cmpi ne, %1, %c0_i32_0 : i32
    scf.if %2 {
      %cst_35 = arith.constant -1.000000e+30 : f32
      %47 = vector.broadcast %cst_35 : f32 to vector<4x8x1xf32>
      %c0_36 = arith.constant 0 : index
      %c0_37 = arith.constant 0 : index
      %c0_38 = arith.constant 0 : index
      %48 = vector.load %arg6[%c0_36, %c0_37, %c0_38] : memref<4x8x1xf32, #tpu.memory_space<vmem>>, vector<4x8x1xf32>
      tpu.vector_store %arg6[%c0_36, %c0_37, %c0_38], %47 {strides = array<i32>} : memref<4x8x1xf32, #tpu.memory_space<vmem>>, vector<4x8x1xf32>,
      %cst_39 = arith.constant 0.000000e+00 : f32
      %49 = vector.broadcast %cst_39 : f32 to vector<4x8x1xf32>
      %c0_40 = arith.constant 0 : index
      %c0_41 = arith.constant 0 : index
      %c0_42 = arith.constant 0 : index
      %50 = vector.load %arg7[%c0_40, %c0_41, %c0_42] : memref<4x8x1xf32, #tpu.memory_space<vmem>>, vector<4x8x1xf32>
      tpu.vector_store %arg7[%c0_40, %c0_41, %c0_42], %49 {strides = array<i32>} : memref<4x8x1xf32, #tpu.memory_space<vmem>>, vector<4x8x1xf32>,
      %cst_43 = arith.constant 0.000000e+00 : f32
      %51 = vector.broadcast %cst_43 : f32 to vector<4x8x8xf32>
      %c0_44 = arith.constant 0 : index
      %c0_45 = arith.constant 0 : index
      %c0_46 = arith.constant 0 : index
      %52 = vector.load %arg8[%c0_44, %c0_45, %c0_46] : memref<4x8x8xf32, #tpu.memory_space<vmem>>, vector<4x8x8xf32>
      tpu.vector_store %arg8[%c0_44, %c0_45, %c0_46], %51 {strides = array<i32>} : memref<4x8x8xf32, #tpu.memory_space<vmem>>, vector<4x8x8xf32>,
    } else {
    }
    %c0 = arith.constant 0 : index
    %c0_1 = arith.constant 0 : index
    %c0_2 = arith.constant 0 : index
    %3 = vector.load %arg2[%c0, %c0_1, %c0_2] : memref<4x8x8xbf16, #tpu.memory_space<vmem>>, vector<4x8x8xbf16>
    %c0_3 = arith.constant 0 : index
    %c0_4 = arith.constant 0 : index
    %c0_5 = arith.constant 0 : index
    %4 = vector.load %arg3[%c0_3, %c0_4, %c0_5] : memref<4x8x8xbf16, #tpu.memory_space<vmem>>, vector<4x8x8xbf16>
    "tpu.trace_start"() <{level = 10 : i32, message = "bqd,bkd->bqk"}> : () -> ()
    %cst = arith.constant dense<0.000000e+00> : vector<4x8x8xf32>
    %5 = tpu.matmul %3, %4, %cst {dimension_numbers = #tpu.dot_dimension_numbers<[2], [2], [1], [1], [0, 0, 0, 1, 1, 1], [0], [0]>} : vector<4x8x8xbf16>, vector<4x8x8xbf16>, vector<4x8x8xf32> -> vector<4x8x8xf32>
    "tpu.trace_stop"() : () -> ()
    %cst_6 = arith.constant 0.353553385 : f32
    %6 = vector.broadcast %cst_6 : f32 to vector<4x8x8xf32>
    %7 = arith.mulf %5, %6 : vector<4x8x8xf32>
    %8 = tpu.iota {dimensions = array<i32: 0>} : vector<8x8xi32>
    %9 = tpu.iota {dimensions = array<i32: 1>} : vector<8x8xi32>
    %c8_i32 = arith.constant 8 : i32
    %10 = arith.muli %arg1, %c8_i32 : i32
    %11 = vector.broadcast %10 : i32 to vector<8x8xi32>
    %12 = arith.addi %9, %11 : vector<8x8xi32>
    %13 = arith.cmpi sle, %12, %8 : vector<8x8xi32>
    %cst_7 = arith.constant 0.000000e+00 : f32
    %cst_8 = arith.constant -1.000000e+09 : f32
    %14 = vector.broadcast %cst_7 : f32 to vector<8x8xf32>
    %15 = vector.broadcast %cst_8 : f32 to vector<8x8xf32>
    %16 = arith.select %13, %14, %15 : vector<8x8xi1>, vector<8x8xf32>
    %17 = vector.shape_cast %16 : vector<8x8xf32> to vector<1x8x8xf32>
    %18 = vector.broadcast %17 : vector<1x8x8xf32> to vector<4x8x8xf32>
    %19 = arith.addf %7, %18 : vector<4x8x8xf32>
    %c0_9 = arith.constant 0 : index
    %c0_10 = arith.constant 0 : index
    %c0_11 = arith.constant 0 : index
    %20 = vector.load %arg6[%c0_9, %c0_10, %c0_11] : memref<4x8x1xf32, #tpu.memory_space<vmem>>, vector<4x8x1xf32>
    %cst_12 = arith.constant dense<0xFF800000> : vector<4x8xf32>
    %21 = vector.multi_reduction <maximumf>, %19, %cst_12 [2] : vector<4x8x8xf32> to vector<4x8xf32>
    %22 = vector.shape_cast %21 : vector<4x8xf32> to vector<4x8x1xf32>
    %23 = arith.maximumf %20, %22 : vector<4x8x1xf32>
    %24 = arith.subf %20, %23 : vector<4x8x1xf32>
    %25 = math.exp %24 : vector<4x8x1xf32>
    %26 = vector.broadcast %23 : vector<4x8x1xf32> to vector<4x8x8xf32>
    %27 = arith.subf %19, %26 : vector<4x8x8xf32>
    %28 = math.exp %27 : vector<4x8x8xf32>
    %c0_13 = arith.constant 0 : index
    %c0_14 = arith.constant 0 : index
    %c0_15 = arith.constant 0 : index
    %29 = vector.load %arg7[%c0_13, %c0_14, %c0_15] : memref<4x8x1xf32, #tpu.memory_space<vmem>>, vector<4x8x1xf32>
    %30 = arith.mulf %25, %29 : vector<4x8x1xf32>
    %cst_16 = arith.constant dense<0.000000e+00> : vector<4x8xf32>
    %31 = vector.multi_reduction <add>, %28, %cst_16 [2] : vector<4x8x8xf32> to vector<4x8xf32>
    %32 = vector.shape_cast %31 : vector<4x8xf32> to vector<4x8x1xf32>
    %33 = arith.addf %30, %32 : vector<4x8x1xf32>
    %c0_17 = arith.constant 0 : index
    %c0_18 = arith.constant 0 : index
    %c0_19 = arith.constant 0 : index
    %34 = vector.load %arg7[%c0_17, %c0_18, %c0_19] : memref<4x8x1xf32, #tpu.memory_space<vmem>>, vector<4x8x1xf32>
    tpu.vector_store %arg7[%c0_17, %c0_18, %c0_19], %33 {strides = array<i32>} : memref<4x8x1xf32, #tpu.memory_space<vmem>>, vector<4x8x1xf32>,
    %c0_20 = arith.constant 0 : index
    %c0_21 = arith.constant 0 : index
    %c0_22 = arith.constant 0 : index
    %35 = vector.load %arg8[%c0_20, %c0_21, %c0_22] : memref<4x8x8xf32, #tpu.memory_space<vmem>>, vector<4x8x8xf32>
    %36 = vector.broadcast %25 : vector<4x8x1xf32> to vector<4x8x8xf32>
    %37 = arith.mulf %36, %35 : vector<4x8x8xf32>
    %38 = arith.truncf %28 : vector<4x8x8xf32> to vector<4x8x8xbf16>
    %c0_23 = arith.constant 0 : index
    %c0_24 = arith.constant 0 : index
    %c0_25 = arith.constant 0 : index
    %39 = vector.load %arg4[%c0_23, %c0_24, %c0_25] : memref<4x8x8xbf16, #tpu.memory_space<vmem>>, vector<4x8x8xbf16>
    "tpu.trace_start"() <{level = 10 : i32, message = "bqk,bkd->bqd"}> : () -> ()
    %cst_26 = arith.constant dense<0.000000e+00> : vector<4x8x8xf32>
    %40 = tpu.matmul %38, %39, %cst_26 {dimension_numbers = #tpu.dot_dimension_numbers<[2], [1], [1], [2], [0, 0, 0, 1, 1, 2], [0], [0]>} : vector<4x8x8xbf16>, vector<4x8x8xbf16>, vector<4x8x8xf32> -> vector<4x8x8xf32>
    "tpu.trace_stop"() : () -> ()
    %41 = arith.addf %37, %40 : vector<4x8x8xf32>
    %c0_27 = arith.constant 0 : index
    %c0_28 = arith.constant 0 : index
    %c0_29 = arith.constant 0 : index
    %42 = vector.load %arg8[%c0_27, %c0_28, %c0_29] : memref<4x8x8xf32, #tpu.memory_space<vmem>>, vector<4x8x8xf32>
    tpu.vector_store %arg8[%c0_27, %c0_28, %c0_29], %41 {strides = array<i32>} : memref<4x8x8xf32, #tpu.memory_space<vmem>>, vector<4x8x8xf32>,
    %c0_30 = arith.constant 0 : index
    %c0_31 = arith.constant 0 : index
    %c0_32 = arith.constant 0 : index
    %43 = vector.load %arg6[%c0_30, %c0_31, %c0_32] : memref<4x8x1xf32, #tpu.memory_space<vmem>>, vector<4x8x1xf32>
    tpu.vector_store %arg6[%c0_30, %c0_31, %c0_32], %23 {strides = array<i32>} : memref<4x8x1xf32, #tpu.memory_space<vmem>>, vector<4x8x1xf32>,
    %c0_i32_33 = arith.constant 0 : i32
    %44 = arith.cmpi eq, %arg1, %c0_i32_33 : i32
    %45 = arith.extui %44 : i1 to i32
    %c0_i32_34 = arith.constant 0 : i32
    %46 = arith.cmpi ne, %45, %c0_i32_34 : i32
    scf.if %46 {
      %c0_35 = arith.constant 0 : index
      %c0_36 = arith.constant 0 : index
      %c0_37 = arith.constant 0 : index
      %47 = vector.load %arg8[%c0_35, %c0_36, %c0_37] : memref<4x8x8xf32, #tpu.memory_space<vmem>>, vector<4x8x8xf32>
      %c0_38 = arith.constant 0 : index
      %c0_39 = arith.constant 0 : index
      %c0_40 = arith.constant 0 : index
      %48 = vector.load %arg7[%c0_38, %c0_39, %c0_40] : memref<4x8x1xf32, #tpu.memory_space<vmem>>, vector<4x8x1xf32>
      %49 = tpu.reciprocal %48 {approx = true} : vector<4x8x1xf32> -> vector<4x8x1xf32>
      %50 = vector.broadcast %49 : vector<4x8x1xf32> to vector<4x8x8xf32>
      %51 = arith.mulf %47, %50 : vector<4x8x8xf32>
      %52 = arith.truncf %51 : vector<4x8x8xf32> to vector<4x8x8xbf16>
      %c0_41 = arith.constant 0 : index
      %c0_42 = arith.constant 0 : index
      %c0_43 = arith.constant 0 : index
      %53 = vector.load %arg5[%c0_41, %c0_42, %c0_43] : memref<4x8x8xbf16, #tpu.memory_space<vmem>>, vector<4x8x8xbf16>
      tpu.vector_store %arg5[%c0_41, %c0_42, %c0_43], %52 {strides = array<i32>} : memref<4x8x8xbf16, #tpu.memory_space<vmem>>, vector<4x8x8xbf16>,
    } else {
    }
    return
  }
  func.func @transform_0(%arg0: i32, %arg1: i32) -> (i32, i32, i32) {
    %c0_i32 = arith.constant 0 : i32
    %c0_i32_0 = arith.constant 0 : i32
    %c0_i32_1 = arith.constant 0 : i32
    return %arg0, %c0_i32, %c0_i32_0 : i32, i32, i32
  }
  func.func @transform_1(%arg0: i32, %arg1: i32) -> (i32, i32, i32) {
    %c0_i32 = arith.constant 0 : i32
    %c0_i32_0 = arith.constant 0 : i32
    return %arg0, %arg1, %c0_i32 : i32, i32, i32
  }
  func.func @transform_2(%arg0: i32, %arg1: i32) -> (i32, i32, i32) {
    %c0_i32 = arith.constant 0 : i32
    %c0_i32_0 = arith.constant 0 : i32
    return %arg0, %arg1, %c0_i32 : i32, i32, i32
  }
  func.func @transform_3(%arg0: i32, %arg1: i32) -> (i32, i32, i32) {
    %c0_i32 = arith.constant 0 : i32
    %c0_i32_0 = arith.constant 0 : i32
    %c0_i32_1 = arith.constant 0 : i32
    return %arg0, %c0_i32, %c0_i32_0 : i32, i32, i32
  }
}

module attributes {stable_mosaic.version = 11 : i64} {
  func.func @_matmul_kernel(%arg0: i32, %arg1: i32, %arg2: i32, %arg3: memref<16x32xbf16, #tpu.memory_space<vmem>>, %arg4: memref<32x32xbf16, #tpu.memory_space<vmem>>, %arg5: memref<1x32xf32, #tpu.memory_space<vmem>>, %arg6: memref<16x32xbf16, #tpu.memory_space<vmem>>, %arg7: memref<16x32xbf16, #tpu.memory_space<vmem>>, %arg8: memref<16x32xf32, #tpu.memory_space<vmem>>) attributes {dimension_semantics = [#tpu.dimension_semantics<parallel>, #tpu.dimension_semantics<parallel>, #tpu.dimension_semantics<arbitrary>], iteration_bounds = array<i64: 1, 1, 1>, scalar_prefetch = 0 : i64, scratch_operands = 1 : i64, tpu.core_type = #tpu.core_type<tc>, window_params = [{transform_indices = @transform_0, window_bounds = array<i64: 16, 32>}, {transform_indices = @transform_1, window_bounds = array<i64: 32, 32>}, {transform_indices = @transform_2, window_bounds = array<i64: 1, 32>}, {transform_indices = @transform_3, window_bounds = array<i64: 16, 32>}, {transform_indices = @transform_4, window_bounds = array<i64: 16, 32>}]} {
    %c0_i32 = arith.constant 0 : i32
    %0 = arith.cmpi eq, %arg2, %c0_i32 : i32
    %1 = arith.extui %0 : i1 to i32
    %c0_i32_0 = arith.constant 0 : i32
    %2 = arith.cmpi ne, %1, %c0_i32_0 : i32
    scf.if %2 {
      %cst_10 = arith.constant 0.000000e+00 : f32
      %12 = vector.broadcast %cst_10 : f32 to vector<16x32xf32>
      %c0_11 = arith.constant 0 : index
      %c0_12 = arith.constant 0 : index
      %13 = vector.load %arg8[%c0_11, %c0_12] : memref<16x32xf32, #tpu.memory_space<vmem>>, vector<16x32xf32>
      tpu.vector_store %arg8[%c0_11, %c0_12], %12 {strides = array<i32>} : memref<16x32xf32, #tpu.memory_space<vmem>>, vector<16x32xf32>,
    } else {
    }
    %c0 = arith.constant 0 : index
    %c0_1 = arith.constant 0 : index
    %3 = vector.load %arg3[%c0, %c0_1] : memref<16x32xbf16, #tpu.memory_space<vmem>>, vector<16x32xbf16>
    %c0_2 = arith.constant 0 : index
    %c0_3 = arith.constant 0 : index
    %4 = vector.load %arg8[%c0_2, %c0_3] : memref<16x32xf32, #tpu.memory_space<vmem>>, vector<16x32xf32>
    %c0_4 = arith.constant 0 : index
    %c0_5 = arith.constant 0 : index
    %5 = vector.load %arg4[%c0_4, %c0_5] : memref<32x32xbf16, #tpu.memory_space<vmem>>, vector<32x32xbf16>
    %cst = arith.constant dense<0.000000e+00> : vector<16x32xf32>
    %6 = tpu.matmul %3, %5, %cst {dimension_numbers = #tpu.dot_dimension_numbers<[1], [0], [0], [1], [0, 0, 1, 1], [], []>} : vector<16x32xbf16>, vector<32x32xbf16>, vector<16x32xf32> -> vector<16x32xf32>
    %7 = arith.addf %4, %6 : vector<16x32xf32>
    %c0_6 = arith.constant 0 : index
    %c0_7 = arith.constant 0 : index
    %8 = vector.load %arg8[%c0_6, %c0_7] : memref<16x32xf32, #tpu.memory_space<vmem>>, vector<16x32xf32>
    tpu.vector_store %arg8[%c0_6, %c0_7], %7 {strides = array<i32>} : memref<16x32xf32, #tpu.memory_space<vmem>>, vector<16x32xf32>,
    %c0_i32_8 = arith.constant 0 : i32
    %9 = arith.cmpi eq, %arg2, %c0_i32_8 : i32
    %10 = arith.extui %9 : i1 to i32
    %c0_i32_9 = arith.constant 0 : i32
    %11 = arith.cmpi ne, %10, %c0_i32_9 : i32
    scf.if %11 {
      %c0_10 = arith.constant 0 : index
      %c0_11 = arith.constant 0 : index
      %12 = vector.load %arg8[%c0_10, %c0_11] : memref<16x32xf32, #tpu.memory_space<vmem>>, vector<16x32xf32>
      %c0_12 = arith.constant 0 : index
      %c0_13 = arith.constant 0 : index
      %13 = vector.load %arg5[%c0_12, %c0_13] : memref<1x32xf32, #tpu.memory_space<vmem>>, vector<1x32xf32>
      %14 = vector.broadcast %13 : vector<1x32xf32> to vector<16x32xf32>
      %15 = arith.addf %12, %14 : vector<16x32xf32>
      %c0_14 = arith.constant 0 : index
      %c0_15 = arith.constant 0 : index
      %16 = vector.load %arg6[%c0_14, %c0_15] : memref<16x32xbf16, #tpu.memory_space<vmem>>, vector<16x32xbf16>
      %17 = arith.extf %16 : vector<16x32xbf16> to vector<16x32xf32>
      %18 = arith.addf %15, %17 : vector<16x32xf32>
      %19 = arith.truncf %18 : vector<16x32xf32> to vector<16x32xbf16>
      %c0_16 = arith.constant 0 : index
      %c0_17 = arith.constant 0 : index
      %20 = vector.load %arg7[%c0_16, %c0_17] : memref<16x32xbf16, #tpu.memory_space<vmem>>, vector<16x32xbf16>
      tpu.vector_store %arg7[%c0_16, %c0_17], %19 {strides = array<i32>} : memref<16x32xbf16, #tpu.memory_space<vmem>>, vector<16x32xbf16>,
    } else {
    }
    return
  }
  func.func @transform_0(%arg0: i32, %arg1: i32, %arg2: i32) -> (i32, i32) {
    %c0_i32 = arith.constant 0 : i32
    return %arg0, %arg2 : i32, i32
  }
  func.func @transform_1(%arg0: i32, %arg1: i32, %arg2: i32) -> (i32, i32) {
    %c0_i32 = arith.constant 0 : i32
    return %arg2, %arg1 : i32, i32
  }
  func.func @transform_2(%arg0: i32, %arg1: i32, %arg2: i32) -> (i32, i32) {
    %c0_i32 = arith.constant 0 : i32
    %c0_i32_0 = arith.constant 0 : i32
    return %c0_i32, %arg1 : i32, i32
  }
  func.func @transform_3(%arg0: i32, %arg1: i32, %arg2: i32) -> (i32, i32) {
    %c0_i32 = arith.constant 0 : i32
    return %arg0, %arg1 : i32, i32
  }
  func.func @transform_4(%arg0: i32, %arg1: i32, %arg2: i32) -> (i32, i32) {
    %c0_i32 = arith.constant 0 : i32
    return %arg0, %arg1 : i32, i32
  }
}

module attributes {stable_mosaic.version = 11 : i64} {
  func.func @_matmul_kernel(%arg0: i32, %arg1: i32, %arg2: i32, %arg3: memref<16x32xbf16, #tpu.memory_space<vmem>>, %arg4: memref<32x32xbf16, #tpu.memory_space<vmem>>, %arg5: memref<1x32xf32, #tpu.memory_space<vmem>>, %arg6: memref<1x32xf32, #tpu.memory_space<vmem>>, %arg7: memref<1x32xf32, #tpu.memory_space<vmem>>, %arg8: memref<16x32xbf16, #tpu.memory_space<vmem>>, %arg9: memref<16x32xf32, #tpu.memory_space<vmem>>, %arg10: memref<16x32xbf16, #tpu.memory_space<vmem>>) attributes {dimension_semantics = [#tpu.dimension_semantics<parallel>, #tpu.dimension_semantics<arbitrary>, #tpu.dimension_semantics<arbitrary>], iteration_bounds = array<i64: 1, 1, 1>, scalar_prefetch = 0 : i64, scratch_operands = 2 : i64, tpu.core_type = #tpu.core_type<tc>, window_params = [{transform_indices = @transform_0, window_bounds = array<i64: 16, 32>}, {transform_indices = @transform_1, window_bounds = array<i64: 32, 32>}, {transform_indices = @transform_2, window_bounds = array<i64: 1, 32>}, {transform_indices = @transform_3, window_bounds = array<i64: 1, 32>}, {transform_indices = @transform_4, window_bounds = array<i64: 1, 32>}, {transform_indices = @transform_5, window_bounds = array<i64: 16, 32>}]} {
    %c0_i32 = arith.constant 0 : i32
    %0 = arith.cmpi eq, %arg2, %c0_i32 : i32
    %1 = arith.extui %0 : i1 to i32
    %c0_i32_0 = arith.constant 0 : i32
    %2 = arith.cmpi ne, %1, %c0_i32_0 : i32
    scf.if %2 {
      %cst_13 = arith.constant 0.000000e+00 : f32
      %17 = vector.broadcast %cst_13 : f32 to vector<16x32xf32>
      %c0_14 = arith.constant 0 : index
      %c0_15 = arith.constant 0 : index
      %18 = vector.load %arg9[%c0_14, %c0_15] : memref<16x32xf32, #tpu.memory_space<vmem>>, vector<16x32xf32>
      tpu.vector_store %arg9[%c0_14, %c0_15], %17 {strides = array<i32>} : memref<16x32xf32, #tpu.memory_space<vmem>>, vector<16x32xf32>,
    } else {
    }
    %c0_i32_1 = arith.constant 0 : i32
    %3 = arith.cmpi eq, %arg1, %c0_i32_1 : i32
    %c0_i32_2 = arith.constant 0 : i32
    %4 = arith.cmpi eq, %arg2, %c0_i32_2 : i32
    %5 = arith.andi %3, %4 : i1
    %6 = arith.extui %5 : i1 to i32
    %c0_i32_3 = arith.constant 0 : i32
    %7 = arith.cmpi ne, %6, %c0_i32_3 : i32
    scf.if %7 {
      %c0_13 = arith.constant 0 : index
      %c0_14 = arith.constant 0 : index
      %17 = vector.load %arg3[%c0_13, %c0_14] : memref<16x32xbf16, #tpu.memory_space<vmem>>, vector<16x32xbf16>
      %18 = arith.extf %17 : vector<16x32xbf16> to vector<16x32xf32>
      %cst_15 = arith.constant dense<0.000000e+00> : vector<16xf32>
      %19 = vector.multi_reduction <add>, %18, %cst_15 [1] : vector<16x32xf32> to vector<16xf32>
      %20 = vector.shape_cast %19 : vector<16xf32> to vector<16x1xf32>
      %cst_16 = arith.constant 3.200000e+01 : f32
      %21 = vector.broadcast %cst_16 : f32 to vector<16x1xf32>
      %22 = arith.divf %20, %21 : vector<16x1xf32>
      %23 = vector.broadcast %22 : vector<16x1xf32> to vector<16x32xf32>
      %24 = arith.subf %18, %23 : vector<16x32xf32>
      %25 = arith.mulf %24, %24 : vector<16x32xf32>
      %cst_17 = arith.constant dense<0.000000e+00> : vector<16xf32>
      %26 = vector.multi_reduction <add>, %25, %cst_17 [1] : vector<16x32xf32> to vector<16xf32>
      %27 = vector.shape_cast %26 : vector<16xf32> to vector<16x1xf32>
      %cst_18 = arith.constant 3.200000e+01 : f32
      %28 = vector.broadcast %cst_18 : f32 to vector<16x1xf32>
      %29 = arith.divf %27, %28 : vector<16x1xf32>
      %30 = vector.broadcast %22 : vector<16x1xf32> to vector<16x32xf32>
      %31 = arith.subf %18, %30 : vector<16x32xf32>
      %cst_19 = arith.constant 9.99999974E-6 : f32
      %32 = vector.broadcast %cst_19 : f32 to vector<16x1xf32>
      %33 = arith.addf %29, %32 : vector<16x1xf32>
      %34 = math.rsqrt %33 : vector<16x1xf32>
      %35 = vector.broadcast %34 : vector<16x1xf32> to vector<16x32xf32>
      %36 = arith.mulf %31, %35 : vector<16x32xf32>
      %c0_20 = arith.constant 0 : index
      %c0_21 = arith.constant 0 : index
      %37 = vector.load %arg5[%c0_20, %c0_21] : memref<1x32xf32, #tpu.memory_space<vmem>>, vector<1x32xf32>
      %38 = vector.broadcast %37 : vector<1x32xf32> to vector<16x32xf32>
      %39 = arith.mulf %36, %38 : vector<16x32xf32>
      %c0_22 = arith.constant 0 : index
      %c0_23 = arith.constant 0 : index
      %40 = vector.load %arg6[%c0_22, %c0_23] : memref<1x32xf32, #tpu.memory_space<vmem>>, vector<1x32xf32>
      %41 = vector.broadcast %40 : vector<1x32xf32> to vector<16x32xf32>
      %42 = arith.addf %39, %41 : vector<16x32xf32>
      %43 = arith.truncf %42 : vector<16x32xf32> to vector<16x32xbf16>
      %c0_24 = arith.constant 0 : index
      %c0_25 = arith.constant 0 : index
      %44 = vector.load %arg10[%c0_24, %c0_25] : memref<16x32xbf16, #tpu.memory_space<vmem>>, vector<16x32xbf16>
      tpu.vector_store %arg10[%c0_24, %c0_25], %43 {strides = array<i32>} : memref<16x32xbf16, #tpu.memory_space<vmem>>, vector<16x32xbf16>,
    } else {
    }
    %c0 = arith.constant 0 : index
    %c0_4 = arith.constant 0 : index
    %8 = vector.load %arg10[%c0, %c0_4] : memref<16x32xbf16, #tpu.memory_space<vmem>>, vector<16x32xbf16>
    %c0_5 = arith.constant 0 : index
    %c0_6 = arith.constant 0 : index
    %9 = vector.load %arg9[%c0_5, %c0_6] : memref<16x32xf32, #tpu.memory_space<vmem>>, vector<16x32xf32>
    %c0_7 = arith.constant 0 : index
    %c0_8 = arith.constant 0 : index
    %10 = vector.load %arg4[%c0_7, %c0_8] : memref<32x32xbf16, #tpu.memory_space<vmem>>, vector<32x32xbf16>
    %cst = arith.constant dense<0.000000e+00> : vector<16x32xf32>
    %11 = tpu.matmul %8, %10, %cst {dimension_numbers = #tpu.dot_dimension_numbers<[1], [0], [0], [1], [0, 0, 1, 1], [], []>} : vector<16x32xbf16>, vector<32x32xbf16>, vector<16x32xf32> -> vector<16x32xf32>
    %12 = arith.addf %9, %11 : vector<16x32xf32>
    %c0_9 = arith.constant 0 : index
    %c0_10 = arith.constant 0 : index
    %13 = vector.load %arg9[%c0_9, %c0_10] : memref<16x32xf32, #tpu.memory_space<vmem>>, vector<16x32xf32>
    tpu.vector_store %arg9[%c0_9, %c0_10], %12 {strides = array<i32>} : memref<16x32xf32, #tpu.memory_space<vmem>>, vector<16x32xf32>,
    %c0_i32_11 = arith.constant 0 : i32
    %14 = arith.cmpi eq, %arg2, %c0_i32_11 : i32
    %15 = arith.extui %14 : i1 to i32
    %c0_i32_12 = arith.constant 0 : i32
    %16 = arith.cmpi ne, %15, %c0_i32_12 : i32
    scf.if %16 {
      %c0_13 = arith.constant 0 : index
      %c0_14 = arith.constant 0 : index
      %17 = vector.load %arg9[%c0_13, %c0_14] : memref<16x32xf32, #tpu.memory_space<vmem>>, vector<16x32xf32>
      %c0_15 = arith.constant 0 : index
      %c0_16 = arith.constant 0 : index
      %18 = vector.load %arg7[%c0_15, %c0_16] : memref<1x32xf32, #tpu.memory_space<vmem>>, vector<1x32xf32>
      %19 = vector.broadcast %18 : vector<1x32xf32> to vector<16x32xf32>
      %20 = arith.addf %17, %19 : vector<16x32xf32>
      %21 = arith.truncf %20 : vector<16x32xf32> to vector<16x32xbf16>
      %c0_17 = arith.constant 0 : index
      %c0_18 = arith.constant 0 : index
      %22 = vector.load %arg8[%c0_17, %c0_18] : memref<16x32xbf16, #tpu.memory_space<vmem>>, vector<16x32xbf16>
      tpu.vector_store %arg8[%c0_17, %c0_18], %21 {strides = array<i32>} : memref<16x32xbf16, #tpu.memory_space<vmem>>, vector<16x32xbf16>,
    } else {
    }
    return
  }
  func.func @transform_0(%arg0: i32, %arg1: i32, %arg2: i32) -> (i32, i32) {
    %c0_i32 = arith.constant 0 : i32
    return %arg0, %arg2 : i32, i32
  }
  func.func @transform_1(%arg0: i32, %arg1: i32, %arg2: i32) -> (i32, i32) {
    %c0_i32 = arith.constant 0 : i32
    return %arg2, %arg1 : i32, i32
  }
  func.func @transform_2(%arg0: i32, %arg1: i32, %arg2: i32) -> (i32, i32) {
    %c0_i32 = arith.constant 0 : i32
    %c0_i32_0 = arith.constant 0 : i32
    return %c0_i32, %arg2 : i32, i32
  }
  func.func @transform_3(%arg0: i32, %arg1: i32, %arg2: i32) -> (i32, i32) {
    %c0_i32 = arith.constant 0 : i32
    %c0_i32_0 = arith.constant 0 : i32
    return %c0_i32, %arg2 : i32, i32
  }
  func.func @transform_4(%arg0: i32, %arg1: i32, %arg2: i32) -> (i32, i32) {
    %c0_i32 = arith.constant 0 : i32
    %c0_i32_0 = arith.constant 0 : i32
    return %c0_i32, %arg1 : i32, i32
  }
  func.func @transform_5(%arg0: i32, %arg1: i32, %arg2: i32) -> (i32, i32) {
    %c0_i32 = arith.constant 0 : i32
    return %arg0, %arg1 : i32, i32
  }
}

module attributes {stable_mosaic.version = 11 : i64} {
  func.func @_matmul_kernel(%arg0: i32, %arg1: i32, %arg2: i32, %arg3: memref<16x32xbf16, #tpu.memory_space<vmem>>, %arg4: memref<32x64xbf16, #tpu.memory_space<vmem>>, %arg5: memref<1x64xf32, #tpu.memory_space<vmem>>, %arg6: memref<16x64xbf16, #tpu.memory_space<vmem>>, %arg7: memref<16x64xf32, #tpu.memory_space<vmem>>) attributes {dimension_semantics = [#tpu.dimension_semantics<parallel>, #tpu.dimension_semantics<parallel>, #tpu.dimension_semantics<arbitrary>], iteration_bounds = array<i64: 1, 1, 1>, scalar_prefetch = 0 : i64, scratch_operands = 1 : i64, tpu.core_type = #tpu.core_type<tc>, window_params = [{transform_indices = @transform_0, window_bounds = array<i64: 16, 32>}, {transform_indices = @transform_1, window_bounds = array<i64: 32, 64>}, {transform_indices = @transform_2, window_bounds = array<i64: 1, 64>}, {transform_indices = @transform_3, window_bounds = array<i64: 16, 64>}]} {
    %c0_i32 = arith.constant 0 : i32
    %0 = arith.cmpi eq, %arg2, %c0_i32 : i32
    %1 = arith.extui %0 : i1 to i32
    %c0_i32_0 = arith.constant 0 : i32
    %2 = arith.cmpi ne, %1, %c0_i32_0 : i32
    scf.if %2 {
      %cst_10 = arith.constant 0.000000e+00 : f32
      %12 = vector.broadcast %cst_10 : f32 to vector<16x64xf32>
      %c0_11 = arith.constant 0 : index
      %c0_12 = arith.constant 0 : index
      %13 = vector.load %arg7[%c0_11, %c0_12] : memref<16x64xf32, #tpu.memory_space<vmem>>, vector<16x64xf32>
      tpu.vector_store %arg7[%c0_11, %c0_12], %12 {strides = array<i32>} : memref<16x64xf32, #tpu.memory_space<vmem>>, vector<16x64xf32>,
    } else {
    }
    %c0 = arith.constant 0 : index
    %c0_1 = arith.constant 0 : index
    %3 = vector.load %arg3[%c0, %c0_1] : memref<16x32xbf16, #tpu.memory_space<vmem>>, vector<16x32xbf16>
    %c0_2 = arith.constant 0 : index
    %c0_3 = arith.constant 0 : index
    %4 = vector.load %arg7[%c0_2, %c0_3] : memref<16x64xf32, #tpu.memory_space<vmem>>, vector<16x64xf32>
    %c0_4 = arith.constant 0 : index
    %c0_5 = arith.constant 0 : index
    %5 = vector.load %arg4[%c0_4, %c0_5] : memref<32x64xbf16, #tpu.memory_space<vmem>>, vector<32x64xbf16>
    %cst = arith.constant dense<0.000000e+00> : vector<16x64xf32>
    %6 = tpu.matmul %3, %5, %cst {dimension_numbers = #tpu.dot_dimension_numbers<[1], [0], [0], [1], [0, 0, 1, 1], [], []>} : vector<16x32xbf16>, vector<32x64xbf16>, vector<16x64xf32> -> vector<16x64xf32>
    %7 = arith.addf %4, %6 : vector<16x64xf32>
    %c0_6 = arith.constant 0 : index
    %c0_7 = arith.constant 0 : index
    %8 = vector.load %arg7[%c0_6, %c0_7] : memref<16x64xf32, #tpu.memory_space<vmem>>, vector<16x64xf32>
    tpu.vector_store %arg7[%c0_6, %c0_7], %7 {strides = array<i32>} : memref<16x64xf32, #tpu.memory_space<vmem>>, vector<16x64xf32>,
    %c0_i32_8 = arith.constant 0 : i32
    %9 = arith.cmpi eq, %arg2, %c0_i32_8 : i32
    %10 = arith.extui %9 : i1 to i32
    %c0_i32_9 = arith.constant 0 : i32
    %11 = arith.cmpi ne, %10, %c0_i32_9 : i32
    scf.if %11 {
      %c0_10 = arith.constant 0 : index
      %c0_11 = arith.constant 0 : index
      %12 = vector.load %arg7[%c0_10, %c0_11] : memref<16x64xf32, #tpu.memory_space<vmem>>, vector<16x64xf32>
      %c0_12 = arith.constant 0 : index
      %c0_13 = arith.constant 0 : index
      %13 = vector.load %arg5[%c0_12, %c0_13] : memref<1x64xf32, #tpu.memory_space<vmem>>, vector<1x64xf32>
      %14 = vector.broadcast %13 : vector<1x64xf32> to vector<16x64xf32>
      %15 = arith.addf %12, %14 : vector<16x64xf32>
      %16 = arith.truncf %15 : vector<16x64xf32> to vector<16x64xbf16>
      %c0_14 = arith.constant 0 : index
      %c0_15 = arith.constant 0 : index
      %17 = vector.load %arg6[%c0_14, %c0_15] : memref<16x64xbf16, #tpu.memory_space<vmem>>, vector<16x64xbf16>
      tpu.vector_store %arg6[%c0_14, %c0_15], %16 {strides = array<i32>} : memref<16x64xbf16, #tpu.memory_space<vmem>>, vector<16x64xbf16>,
    } else {
    }
    return
  }
  func.func @transform_0(%arg0: i32, %arg1: i32, %arg2: i32) -> (i32, i32) {
    %c0_i32 = arith.constant 0 : i32
    return %arg0, %arg2 : i32, i32
  }
  func.func @transform_1(%arg0: i32, %arg1: i32, %arg2: i32) -> (i32, i32) {
    %c0_i32 = arith.constant 0 : i32
    return %arg2, %arg1 : i32, i32
  }
  func.func @transform_2(%arg0: i32, %arg1: i32, %arg2: i32) -> (i32, i32) {
    %c0_i32 = arith.constant 0 : i32
    %c0_i32_0 = arith.constant 0 : i32
    return %c0_i32, %arg1 : i32, i32
  }
  func.func @transform_3(%arg0: i32, %arg1: i32, %arg2: i32) -> (i32, i32) {
    %c0_i32 = arith.constant 0 : i32
    return %arg0, %arg1 : i32, i32
  }
}

module attributes {stable_mosaic.version = 11 : i64} {
  func.func @_attn_kernel(%arg0: i32, %arg1: i32, %arg2: memref<4x8x8xbf16, #tpu.memory_space<vmem>>, %arg3: memref<4x8x8xbf16, #tpu.memory_space<vmem>>, %arg4: memref<4x8x8xbf16, #tpu.memory_space<vmem>>, %arg5: memref<8x8xf32, #tpu.memory_space<vmem>>, %arg6: memref<4x8x8xbf16, #tpu.memory_space<vmem>>, %arg7: memref<4x8x1xf32, #tpu.memory_space<vmem>>, %arg8: memref<4x8x1xf32, #tpu.memory_space<vmem>>, %arg9: memref<4x8x8xf32, #tpu.memory_space<vmem>>) attributes {dimension_semantics = [#tpu.dimension_semantics<parallel>, #tpu.dimension_semantics<arbitrary>], iteration_bounds = array<i64: 2, 1>, scalar_prefetch = 0 : i64, scratch_operands = 3 : i64, tpu.core_type = #tpu.core_type<tc>, window_params = [{transform_indices = @transform_0, window_bounds = array<i64: 4, 8, 8>}, {transform_indices = @transform_1, window_bounds = array<i64: 4, 8, 8>}, {transform_indices = @transform_2, window_bounds = array<i64: 4, 8, 8>}, {transform_indices = @transform_3, window_bounds = array<i64: 8, 8>}, {transform_indices = @transform_4, window_bounds = array<i64: 4, 8, 8>}]} {
    %c0_i32 = arith.constant 0 : i32
    %0 = arith.cmpi eq, %arg1, %c0_i32 : i32
    %1 = arith.extui %0 : i1 to i32
    %c0_i32_0 = arith.constant 0 : i32
    %2 = arith.cmpi ne, %1, %c0_i32_0 : i32
    scf.if %2 {
      %cst_35 = arith.constant -1.000000e+30 : f32
      %39 = vector.broadcast %cst_35 : f32 to vector<4x8x1xf32>
      %c0_36 = arith.constant 0 : index
      %c0_37 = arith.constant 0 : index
      %c0_38 = arith.constant 0 : index
      %40 = vector.load %arg7[%c0_36, %c0_37, %c0_38] : memref<4x8x1xf32, #tpu.memory_space<vmem>>, vector<4x8x1xf32>
      tpu.vector_store %arg7[%c0_36, %c0_37, %c0_38], %39 {strides = array<i32>} : memref<4x8x1xf32, #tpu.memory_space<vmem>>, vector<4x8x1xf32>,
      %cst_39 = arith.constant 0.000000e+00 : f32
      %41 = vector.broadcast %cst_39 : f32 to vector<4x8x1xf32>
      %c0_40 = arith.constant 0 : index
      %c0_41 = arith.constant 0 : index
      %c0_42 = arith.constant 0 : index
      %42 = vector.load %arg8[%c0_40, %c0_41, %c0_42] : memref<4x8x1xf32, #tpu.memory_space<vmem>>, vector<4x8x1xf32>
      tpu.vector_store %arg8[%c0_40, %c0_41, %c0_42], %41 {strides = array<i32>} : memref<4x8x1xf32, #tpu.memory_space<vmem>>, vector<4x8x1xf32>,
      %cst_43 = arith.constant 0.000000e+00 : f32
      %43 = vector.broadcast %cst_43 : f32 to vector<4x8x8xf32>
      %c0_44 = arith.constant 0 : index
      %c0_45 = arith.constant 0 : index
      %c0_46 = arith.constant 0 : index
      %44 = vector.load %arg9[%c0_44, %c0_45, %c0_46] : memref<4x8x8xf32, #tpu.memory_space<vmem>>, vector<4x8x8xf32>
      tpu.vector_store %arg9[%c0_44, %c0_45, %c0_46], %43 {strides = array<i32>} : memref<4x8x8xf32, #tpu.memory_space<vmem>>, vector<4x8x8xf32>,
    } else {
    }
    %c0 = arith.constant 0 : index
    %c0_1 = arith.constant 0 : index
    %c0_2 = arith.constant 0 : index
    %3 = vector.load %arg2[%c0, %c0_1, %c0_2] : memref<4x8x8xbf16, #tpu.memory_space<vmem>>, vector<4x8x8xbf16>
    %c0_3 = arith.constant 0 : index
    %c0_4 = arith.constant 0 : index
    %c0_5 = arith.constant 0 : index
    %4 = vector.load %arg3[%c0_3, %c0_4, %c0_5] : memref<4x8x8xbf16, #tpu.memory_space<vmem>>, vector<4x8x8xbf16>
    "tpu.trace_start"() <{level = 10 : i32, message = "bqd,bkd->bqk"}> : () -> ()
    %cst = arith.constant dense<0.000000e+00> : vector<4x8x8xf32>
    %5 = tpu.matmul %3, %4, %cst {dimension_numbers = #tpu.dot_dimension_numbers<[2], [2], [1], [1], [0, 0, 0, 1, 1, 1], [0], [0]>} : vector<4x8x8xbf16>, vector<4x8x8xbf16>, vector<4x8x8xf32> -> vector<4x8x8xf32>
    "tpu.trace_stop"() : () -> ()
    %cst_6 = arith.constant 0.353553385 : f32
    %6 = vector.broadcast %cst_6 : f32 to vector<4x8x8xf32>
    %7 = arith.mulf %5, %6 : vector<4x8x8xf32>
    %c0_7 = arith.constant 0 : index
    %c0_8 = arith.constant 0 : index
    %8 = vector.load %arg5[%c0_7, %c0_8] : memref<8x8xf32, #tpu.memory_space<vmem>>, vector<8x8xf32>
    %9 = vector.shape_cast %8 : vector<8x8xf32> to vector<1x8x8xf32>
    %10 = vector.broadcast %9 : vector<1x8x8xf32> to vector<4x8x8xf32>
    %11 = arith.addf %7, %10 : vector<4x8x8xf32>
    %c0_9 = arith.constant 0 : index
    %c0_10 = arith.constant 0 : index
    %c0_11 = arith.constant 0 : index
    %12 = vector.load %arg7[%c0_9, %c0_10, %c0_11] : memref<4x8x1xf32, #tpu.memory_space<vmem>>, vector<4x8x1xf32>
    %cst_12 = arith.constant dense<0xFF800000> : vector<4x8xf32>
    %13 = vector.multi_reduction <maximumf>, %11, %cst_12 [2] : vector<4x8x8xf32> to vector<4x8xf32>
    %14 = vector.shape_cast %13 : vector<4x8xf32> to vector<4x8x1xf32>
    %15 = arith.maximumf %12, %14 : vector<4x8x1xf32>
    %16 = arith.subf %12, %15 : vector<4x8x1xf32>
    %17 = math.exp %16 : vector<4x8x1xf32>
    %18 = vector.broadcast %15 : vector<4x8x1xf32> to vector<4x8x8xf32>
    %19 = arith.subf %11, %18 : vector<4x8x8xf32>
    %20 = math.exp %19 : vector<4x8x8xf32>
    %c0_13 = arith.constant 0 : index
    %c0_14 = arith.constant 0 : index
    %c0_15 = arith.constant 0 : index
    %21 = vector.load %arg8[%c0_13, %c0_14, %c0_15] : memref<4x8x1xf32, #tpu.memory_space<vmem>>, vector<4x8x1xf32>
    %22 = arith.mulf %17, %21 : vector<4x8x1xf32>
    %cst_16 = arith.constant dense<0.000000e+00> : vector<4x8xf32>
    %23 = vector.multi_reduction <add>, %20, %cst_16 [2] : vector<4x8x8xf32> to vector<4x8xf32>
    %24 = vector.shape_cast %23 : vector<4x8xf32> to vector<4x8x1xf32>
    %25 = arith.addf %22, %24 : vector<4x8x1xf32>
    %c0_17 = arith.constant 0 : index
    %c0_18 = arith.constant 0 : index
    %c0_19 = arith.constant 0 : index
    %26 = vector.load %arg8[%c0_17, %c0_18, %c0_19] : memref<4x8x1xf32, #tpu.memory_space<vmem>>, vector<4x8x1xf32>
    tpu.vector_store %arg8[%c0_17, %c0_18, %c0_19], %25 {strides = array<i32>} : memref<4x8x1xf32, #tpu.memory_space<vmem>>, vector<4x8x1xf32>,
    %c0_20 = arith.constant 0 : index
    %c0_21 = arith.constant 0 : index
    %c0_22 = arith.constant 0 : index
    %27 = vector.load %arg9[%c0_20, %c0_21, %c0_22] : memref<4x8x8xf32, #tpu.memory_space<vmem>>, vector<4x8x8xf32>
    %28 = vector.broadcast %17 : vector<4x8x1xf32> to vector<4x8x8xf32>
    %29 = arith.mulf %28, %27 : vector<4x8x8xf32>
    %30 = arith.truncf %20 : vector<4x8x8xf32> to vector<4x8x8xbf16>
    %c0_23 = arith.constant 0 : index
    %c0_24 = arith.constant 0 : index
    %c0_25 = arith.constant 0 : index
    %31 = vector.load %arg4[%c0_23, %c0_24, %c0_25] : memref<4x8x8xbf16, #tpu.memory_space<vmem>>, vector<4x8x8xbf16>
    "tpu.trace_start"() <{level = 10 : i32, message = "bqk,bkd->bqd"}> : () -> ()
    %cst_26 = arith.constant dense<0.000000e+00> : vector<4x8x8xf32>
    %32 = tpu.matmul %30, %31, %cst_26 {dimension_numbers = #tpu.dot_dimension_numbers<[2], [1], [1], [2], [0, 0, 0, 1, 1, 2], [0], [0]>} : vector<4x8x8xbf16>, vector<4x8x8xbf16>, vector<4x8x8xf32> -> vector<4x8x8xf32>
    "tpu.trace_stop"() : () -> ()
    %33 = arith.addf %29, %32 : vector<4x8x8xf32>
    %c0_27 = arith.constant 0 : index
    %c0_28 = arith.constant 0 : index
    %c0_29 = arith.constant 0 : index
    %34 = vector.load %arg9[%c0_27, %c0_28, %c0_29] : memref<4x8x8xf32, #tpu.memory_space<vmem>>, vector<4x8x8xf32>
    tpu.vector_store %arg9[%c0_27, %c0_28, %c0_29], %33 {strides = array<i32>} : memref<4x8x8xf32, #tpu.memory_space<vmem>>, vector<4x8x8xf32>,
    %c0_30 = arith.constant 0 : index
    %c0_31 = arith.constant 0 : index
    %c0_32 = arith.constant 0 : index
    %35 = vector.load %arg7[%c0_30, %c0_31, %c0_32] : memref<4x8x1xf32, #tpu.memory_space<vmem>>, vector<4x8x1xf32>
    tpu.vector_store %arg7[%c0_30, %c0_31, %c0_32], %15 {strides = array<i32>} : memref<4x8x1xf32, #tpu.memory_space<vmem>>, vector<4x8x1xf32>,
    %c0_i32_33 = arith.constant 0 : i32
    %36 = arith.cmpi eq, %arg1, %c0_i32_33 : i32
    %37 = arith.extui %36 : i1 to i32
    %c0_i32_34 = arith.constant 0 : i32
    %38 = arith.cmpi ne, %37, %c0_i32_34 : i32
    scf.if %38 {
      %c0_35 = arith.constant 0 : index
      %c0_36 = arith.constant 0 : index
      %c0_37 = arith.constant 0 : index
      %39 = vector.load %arg9[%c0_35, %c0_36, %c0_37] : memref<4x8x8xf32, #tpu.memory_space<vmem>>, vector<4x8x8xf32>
      %c0_38 = arith.constant 0 : index
      %c0_39 = arith.constant 0 : index
      %c0_40 = arith.constant 0 : index
      %40 = vector.load %arg8[%c0_38, %c0_39, %c0_40] : memref<4x8x1xf32, #tpu.memory_space<vmem>>, vector<4x8x1xf32>
      %41 = tpu.reciprocal %40 {approx = true} : vector<4x8x1xf32> -> vector<4x8x1xf32>
      %42 = vector.broadcast %41 : vector<4x8x1xf32> to vector<4x8x8xf32>
      %43 = arith.mulf %39, %42 : vector<4x8x8xf32>
      %44 = arith.truncf %43 : vector<4x8x8xf32> to vector<4x8x8xbf16>
      %c0_41 = arith.constant 0 : index
      %c0_42 = arith.constant 0 : index
      %c0_43 = arith.constant 0 : index
      %45 = vector.load %arg6[%c0_41, %c0_42, %c0_43] : memref<4x8x8xbf16, #tpu.memory_space<vmem>>, vector<4x8x8xbf16>
      tpu.vector_store %arg6[%c0_41, %c0_42, %c0_43], %44 {strides = array<i32>} : memref<4x8x8xbf16, #tpu.memory_space<vmem>>, vector<4x8x8xbf16>,
    } else {
    }
    return
  }
  func.func @transform_0(%arg0: i32, %arg1: i32) -> (i32, i32, i32) {
    %c0_i32 = arith.constant 0 : i32
    %c0_i32_0 = arith.constant 0 : i32
    %c0_i32_1 = arith.constant 0 : i32
    return %arg0, %c0_i32, %c0_i32_0 : i32, i32, i32
  }
  func.func @transform_1(%arg0: i32, %arg1: i32) -> (i32, i32, i32) {
    %c0_i32 = arith.constant 0 : i32
    %c0_i32_0 = arith.constant 0 : i32
    return %arg0, %arg1, %c0_i32 : i32, i32, i32
  }
  func.func @transform_2(%arg0: i32, %arg1: i32) -> (i32, i32, i32) {
    %c0_i32 = arith.constant 0 : i32
    %c0_i32_0 = arith.constant 0 : i32
    return %arg0, %arg1, %c0_i32 : i32, i32, i32
  }
  func.func @transform_3(%arg0: i32, %arg1: i32) -> (i32, i32) {
    %c0_i32 = arith.constant 0 : i32
    %c0_i32_0 = arith.constant 0 : i32
    return %c0_i32, %arg1 : i32, i32
  }
  func.func @transform_4(%arg0: i32, %arg1: i32) -> (i32, i32, i32) {
    %c0_i32 = arith.constant 0 : i32
    %c0_i32_0 = arith.constant 0 : i32
    %c0_i32_1 = arith.constant 0 : i32
    return %arg0, %c0_i32, %c0_i32_0 : i32, i32, i32
  }
}

module attributes {stable_mosaic.version = 11 : i64} {
  func.func @_ffn_kernel(%arg0: i32, %arg1: i32, %arg2: memref<16x32xbf16, #tpu.memory_space<vmem>>, %arg3: memref<32x64xbf16, #tpu.memory_space<vmem>>, %arg4: memref<1x64xf32, #tpu.memory_space<vmem>>, %arg5: memref<64x32xbf16, #tpu.memory_space<vmem>>, %arg6: memref<1x32xf32, #tpu.memory_space<vmem>>, %arg7: memref<1x32xf32, #tpu.memory_space<vmem>>, %arg8: memref<1x32xf32, #tpu.memory_space<vmem>>, %arg9: memref<16x32xbf16, #tpu.memory_space<vmem>>, %arg10: memref<16x32xf32, #tpu.memory_space<vmem>>, %arg11: memref<16x32xbf16, #tpu.memory_space<vmem>>) attributes {dimension_semantics = [#tpu.dimension_semantics<parallel>, #tpu.dimension_semantics<arbitrary>], iteration_bounds = array<i64: 1, 1>, scalar_prefetch = 0 : i64, scratch_operands = 2 : i64, tpu.core_type = #tpu.core_type<tc>, window_params = [{transform_indices = @transform_0, window_bounds = array<i64: 16, 32>}, {transform_indices = @transform_1, window_bounds = array<i64: 32, 64>}, {transform_indices = @transform_2, window_bounds = array<i64: 1, 64>}, {transform_indices = @transform_3, window_bounds = array<i64: 64, 32>}, {pipeline_mode = #tpu.pipeline_mode<synchronous>, transform_indices = @transform_4, window_bounds = array<i64: 1, 32>}, {pipeline_mode = #tpu.pipeline_mode<synchronous>, transform_indices = @transform_5, window_bounds = array<i64: 1, 32>}, {pipeline_mode = #tpu.pipeline_mode<synchronous>, transform_indices = @transform_6, window_bounds = array<i64: 1, 32>}, {transform_indices = @transform_7, window_bounds = array<i64: 16, 32>}]} {
    %c0_i32 = arith.constant 0 : i32
    %0 = arith.cmpi eq, %arg1, %c0_i32 : i32
    %1 = arith.extui %0 : i1 to i32
    %c0_i32_0 = arith.constant 0 : i32
    %2 = arith.cmpi ne, %1, %c0_i32_0 : i32
    scf.if %2 {
      %cst_16 = arith.constant 0.000000e+00 : f32
      %20 = vector.broadcast %cst_16 : f32 to vector<16x32xf32>
      %c0_17 = arith.constant 0 : index
      %c0_18 = arith.constant 0 : index
      %21 = vector.load %arg10[%c0_17, %c0_18] : memref<16x32xf32, #tpu.memory_space<vmem>>, vector<16x32xf32>
      tpu.vector_store %arg10[%c0_17, %c0_18], %20 {strides = array<i32>} : memref<16x32xf32, #tpu.memory_space<vmem>>, vector<16x32xf32>,
      %c0_19 = arith.constant 0 : index
      %c0_20 = arith.constant 0 : index
      %22 = vector.load %arg2[%c0_19, %c0_20] : memref<16x32xbf16, #tpu.memory_space<vmem>>, vector<16x32xbf16>
      %23 = arith.extf %22 : vector<16x32xbf16> to vector<16x32xf32>
      %cst_21 = arith.constant dense<0.000000e+00> : vector<16xf32>
      %24 = vector.multi_reduction <add>, %23, %cst_21 [1] : vector<16x32xf32> to vector<16xf32>
      %25 = vector.shape_cast %24 : vector<16xf32> to vector<16x1xf32>
      %cst_22 = arith.constant 3.200000e+01 : f32
      %26 = vector.broadcast %cst_22 : f32 to vector<16x1xf32>
      %27 = arith.divf %25, %26 : vector<16x1xf32>
      %28 = vector.broadcast %27 : vector<16x1xf32> to vector<16x32xf32>
      %29 = arith.subf %23, %28 : vector<16x32xf32>
      %30 = arith.mulf %29, %29 : vector<16x32xf32>
      %cst_23 = arith.constant dense<0.000000e+00> : vector<16xf32>
      %31 = vector.multi_reduction <add>, %30, %cst_23 [1] : vector<16x32xf32> to vector<16xf32>
      %32 = vector.shape_cast %31 : vector<16xf32> to vector<16x1xf32>
      %cst_24 = arith.constant 3.200000e+01 : f32
      %33 = vector.broadcast %cst_24 : f32 to vector<16x1xf32>
      %34 = arith.divf %32, %33 : vector<16x1xf32>
      %35 = vector.broadcast %27 : vector<16x1xf32> to vector<16x32xf32>
      %36 = arith.subf %23, %35 : vector<16x32xf32>
      %cst_25 = arith.constant 9.99999974E-6 : f32
      %37 = vector.broadcast %cst_25 : f32 to vector<16x1xf32>
      %38 = arith.addf %34, %37 : vector<16x1xf32>
      %39 = math.rsqrt %38 : vector<16x1xf32>
      %40 = vector.broadcast %39 : vector<16x1xf32> to vector<16x32xf32>
      %41 = arith.mulf %36, %40 : vector<16x32xf32>
      %c0_26 = arith.constant 0 : index
      %c0_27 = arith.constant 0 : index
      %42 = vector.load %arg7[%c0_26, %c0_27] : memref<1x32xf32, #tpu.memory_space<vmem>>, vector<1x32xf32>
      %43 = vector.broadcast %42 : vector<1x32xf32> to vector<16x32xf32>
      %44 = arith.mulf %41, %43 : vector<16x32xf32>
      %c0_28 = arith.constant 0 : index
      %c0_29 = arith.constant 0 : index
      %45 = vector.load %arg8[%c0_28, %c0_29] : memref<1x32xf32, #tpu.memory_space<vmem>>, vector<1x32xf32>
      %46 = vector.broadcast %45 : vector<1x32xf32> to vector<16x32xf32>
      %47 = arith.addf %44, %46 : vector<16x32xf32>
      %48 = arith.truncf %47 : vector<16x32xf32> to vector<16x32xbf16>
      %c0_30 = arith.constant 0 : index
      %c0_31 = arith.constant 0 : index
      %49 = vector.load %arg11[%c0_30, %c0_31] : memref<16x32xbf16, #tpu.memory_space<vmem>>, vector<16x32xbf16>
      tpu.vector_store %arg11[%c0_30, %c0_31], %48 {strides = array<i32>} : memref<16x32xbf16, #tpu.memory_space<vmem>>, vector<16x32xbf16>,
    } else {
    }
    %c0 = arith.constant 0 : index
    %c0_1 = arith.constant 0 : index
    %3 = vector.load %arg11[%c0, %c0_1] : memref<16x32xbf16, #tpu.memory_space<vmem>>, vector<16x32xbf16>
    %c0_2 = arith.constant 0 : index
    %c0_3 = arith.constant 0 : index
    %4 = vector.load %arg3[%c0_2, %c0_3] : memref<32x64xbf16, #tpu.memory_space<vmem>>, vector<32x64xbf16>
    %cst = arith.constant dense<0.000000e+00> : vector<16x64xf32>
    %5 = tpu.matmul %3, %4, %cst {dimension_numbers = #tpu.dot_dimension_numbers<[1], [0], [0], [1], [0, 0, 1, 1], [], []>} : vector<16x32xbf16>, vector<32x64xbf16>, vector<16x64xf32> -> vector<16x64xf32>
    %c0_4 = arith.constant 0 : index
    %c0_5 = arith.constant 0 : index
    %6 = vector.load %arg4[%c0_4, %c0_5] : memref<1x64xf32, #tpu.memory_space<vmem>>, vector<1x64xf32>
    %7 = vector.broadcast %6 : vector<1x64xf32> to vector<16x64xf32>
    %8 = arith.addf %5, %7 : vector<16x64xf32>
    %cst_6 = arith.constant 0.000000e+00 : f32
    %9 = vector.broadcast %cst_6 : f32 to vector<16x64xf32>
    %10 = arith.maximumf %8, %9 : vector<16x64xf32>
    %c0_7 = arith.constant 0 : index
    %c0_8 = arith.constant 0 : index
    %11 = vector.load %arg10[%c0_7, %c0_8] : memref<16x32xf32, #tpu.memory_space<vmem>>, vector<16x32xf32>
    %12 = arith.truncf %10 : vector<16x64xf32> to vector<16x64xbf16>
    %c0_9 = arith.constant 0 : index
    %c0_10 = arith.constant 0 : index
    %13 = vector.load %arg5[%c0_9, %c0_10] : memref<64x32xbf16, #tpu.memory_space<vmem>>, vector<64x32xbf16>
    %cst_11 = arith.constant dense<0.000000e+00> : vector<16x32xf32>
    %14 = tpu.matmul %12, %13, %cst_11 {dimension_numbers = #tpu.dot_dimension_numbers<[1], [0], [0], [1], [0, 0, 1, 1], [], []>} : vector<16x64xbf16>, vector<64x32xbf16>, vector<16x32xf32> -> vector<16x32xf32>
    %15 = arith.addf %11, %14 : vector<16x32xf32>
    %c0_12 = arith.constant 0 : index
    %c0_13 = arith.constant 0 : index
    %16 = vector.load %arg10[%c0_12, %c0_13] : memref<16x32xf32, #tpu.memory_space<vmem>>, vector<16x32xf32>
    tpu.vector_store %arg10[%c0_12, %c0_13], %15 {strides = array<i32>} : memref<16x32xf32, #tpu.memory_space<vmem>>, vector<16x32xf32>,
    %c0_i32_14 = arith.constant 0 : i32
    %17 = arith.cmpi eq, %arg1, %c0_i32_14 : i32
    %18 = arith.extui %17 : i1 to i32
    %c0_i32_15 = arith.constant 0 : i32
    %19 = arith.cmpi ne, %18, %c0_i32_15 : i32
    scf.if %19 {
      %c0_16 = arith.constant 0 : index
      %c0_17 = arith.constant 0 : index
      %20 = vector.load %arg10[%c0_16, %c0_17] : memref<16x32xf32, #tpu.memory_space<vmem>>, vector<16x32xf32>
      %c0_18 = arith.constant 0 : index
      %c0_19 = arith.constant 0 : index
      %21 = vector.load %arg6[%c0_18, %c0_19] : memref<1x32xf32, #tpu.memory_space<vmem>>, vector<1x32xf32>
      %22 = vector.broadcast %21 : vector<1x32xf32> to vector<16x32xf32>
      %23 = arith.addf %20, %22 : vector<16x32xf32>
      %c0_20 = arith.constant 0 : index
      %c0_21 = arith.constant 0 : index
      %24 = vector.load %arg2[%c0_20, %c0_21] : memref<16x32xbf16, #tpu.memory_space<vmem>>, vector<16x32xbf16>
      %25 = arith.extf %24 : vector<16x32xbf16> to vector<16x32xf32>
      %26 = arith.addf %23, %25 : vector<16x32xf32>
      %27 = arith.truncf %26 : vector<16x32xf32> to vector<16x32xbf16>
      %c0_22 = arith.constant 0 : index
      %c0_23 = arith.constant 0 : index
      %28 = vector.load %arg9[%c0_22, %c0_23] : memref<16x32xbf16, #tpu.memory_space<vmem>>, vector<16x32xbf16>
      tpu.vector_store %arg9[%c0_22, %c0_23], %27 {strides = array<i32>} : memref<16x32xbf16, #tpu.memory_space<vmem>>, vector<16x32xbf16>,
    } else {
    }
    return
  }
  func.func @transform_0(%arg0: i32, %arg1: i32) -> (i32, i32) {
    %c0_i32 = arith.constant 0 : i32
    %c0_i32_0 = arith.constant 0 : i32
    return %arg0, %c0_i32 : i32, i32
  }
  func.func @transform_1(%arg0: i32, %arg1: i32) -> (i32, i32) {
    %c0_i32 = arith.constant 0 : i32
    %c0_i32_0 = arith.constant 0 : i32
    return %c0_i32, %arg1 : i32, i32
  }
  func.func @transform_2(%arg0: i32, %arg1: i32) -> (i32, i32) {
    %c0_i32 = arith.constant 0 : i32
    %c0_i32_0 = arith.constant 0 : i32
    return %c0_i32, %arg1 : i32, i32
  }
  func.func @transform_3(%arg0: i32, %arg1: i32) -> (i32, i32) {
    %c0_i32 = arith.constant 0 : i32
    %c0_i32_0 = arith.constant 0 : i32
    return %arg1, %c0_i32 : i32, i32
  }
  func.func @transform_4(%arg0: i32, %arg1: i32) -> (i32, i32) {
    %c0_i32 = arith.constant 0 : i32
    %c0_i32_0 = arith.constant 0 : i32
    %c0_i32_1 = arith.constant 0 : i32
    return %c0_i32, %c0_i32_0 : i32, i32
  }
  func.func @transform_5(%arg0: i32, %arg1: i32) -> (i32, i32) {
    %c0_i32 = arith.constant 0 : i32
    %c0_i32_0 = arith.constant 0 : i32
    %c0_i32_1 = arith.constant 0 : i32
    return %c0_i32, %c0_i32_0 : i32, i32
  }
  func.func @transform_6(%arg0: i32, %arg1: i32) -> (i32, i32) {
    %c0_i32 = arith.constant 0 : i32
    %c0_i32_0 = arith.constant 0 : i32
    %c0_i32_1 = arith.constant 0 : i32
    return %c0_i32, %c0_i32_0 : i32, i32
  }
  func.func @transform_7(%arg0: i32, %arg1: i32) -> (i32, i32) {
    %c0_i32 = arith.constant 0 : i32
    %c0_i32_0 = arith.constant 0 : i32
    return %arg0, %c0_i32 : i32, i32
  }
}

module attributes {stable_mosaic.version = 11 : i64} {
  func.func @_ffn_kernel(%arg0: i32, %arg1: i32, %arg2: memref<16x32xbf16, #tpu.memory_space<vmem>>, %arg3: memref<32x64xbf16, #tpu.memory_space<vmem>>, %arg4: memref<1x64xf32, #tpu.memory_space<vmem>>, %arg5: memref<64x32xbf16, #tpu.memory_space<vmem>>, %arg6: memref<1x32xf32, #tpu.memory_space<vmem>>, %arg7: memref<1x32xf32, #tpu.memory_space<vmem>>, %arg8: memref<1x32xf32, #tpu.memory_space<vmem>>, %arg9: memref<1x32xf32, #tpu.memory_space<vmem>>, %arg10: memref<1x32xf32, #tpu.memory_space<vmem>>, %arg11: memref<16x32xf32, #tpu.memory_space<vmem>>, %arg12: memref<16x32xf32, #tpu.memory_space<vmem>>, %arg13: memref<16x32xbf16, #tpu.memory_space<vmem>>) attributes {dimension_semantics = [#tpu.dimension_semantics<parallel>, #tpu.dimension_semantics<arbitrary>], iteration_bounds = array<i64: 1, 1>, scalar_prefetch = 0 : i64, scratch_operands = 2 : i64, tpu.core_type = #tpu.core_type<tc>, window_params = [{transform_indices = @transform_0, window_bounds = array<i64: 16, 32>}, {transform_indices = @transform_1, window_bounds = array<i64: 32, 64>}, {transform_indices = @transform_2, window_bounds = array<i64: 1, 64>}, {transform_indices = @transform_3, window_bounds = array<i64: 64, 32>}, {pipeline_mode = #tpu.pipeline_mode<synchronous>, transform_indices = @transform_4, window_bounds = array<i64: 1, 32>}, {pipeline_mode = #tpu.pipeline_mode<synchronous>, transform_indices = @transform_5, window_bounds = array<i64: 1, 32>}, {pipeline_mode = #tpu.pipeline_mode<synchronous>, transform_indices = @transform_6, window_bounds = array<i64: 1, 32>}, {pipeline_mode = #tpu.pipeline_mode<synchronous>, transform_indices = @transform_7, window_bounds = array<i64: 1, 32>}, {pipeline_mode = #tpu.pipeline_mode<synchronous>, transform_indices = @transform_8, window_bounds = array<i64: 1, 32>}, {transform_indices = @transform_9, window_bounds = array<i64: 16, 32>}]} {
    %c0_i32 = arith.constant 0 : i32
    %0 = arith.cmpi eq, %arg1, %c0_i32 : i32
    %1 = arith.extui %0 : i1 to i32
    %c0_i32_0 = arith.constant 0 : i32
    %2 = arith.cmpi ne, %1, %c0_i32_0 : i32
    scf.if %2 {
      %cst_16 = arith.constant 0.000000e+00 : f32
      %20 = vector.broadcast %cst_16 : f32 to vector<16x32xf32>
      %c0_17 = arith.constant 0 : index
      %c0_18 = arith.constant 0 : index
      %21 = vector.load %arg12[%c0_17, %c0_18] : memref<16x32xf32, #tpu.memory_space<vmem>>, vector<16x32xf32>
      tpu.vector_store %arg12[%c0_17, %c0_18], %20 {strides = array<i32>} : memref<16x32xf32, #tpu.memory_space<vmem>>, vector<16x32xf32>,
      %c0_19 = arith.constant 0 : index
      %c0_20 = arith.constant 0 : index
      %22 = vector.load %arg2[%c0_19, %c0_20] : memref<16x32xbf16, #tpu.memory_space<vmem>>, vector<16x32xbf16>
      %23 = arith.extf %22 : vector<16x32xbf16> to vector<16x32xf32>
      %cst_21 = arith.constant dense<0.000000e+00> : vector<16xf32>
      %24 = vector.multi_reduction <add>, %23, %cst_21 [1] : vector<16x32xf32> to vector<16xf32>
      %25 = vector.shape_cast %24 : vector<16xf32> to vector<16x1xf32>
      %cst_22 = arith.constant 3.200000e+01 : f32
      %26 = vector.broadcast %cst_22 : f32 to vector<16x1xf32>
      %27 = arith.divf %25, %26 : vector<16x1xf32>
      %28 = vector.broadcast %27 : vector<16x1xf32> to vector<16x32xf32>
      %29 = arith.subf %23, %28 : vector<16x32xf32>
      %30 = arith.mulf %29, %29 : vector<16x32xf32>
      %cst_23 = arith.constant dense<0.000000e+00> : vector<16xf32>
      %31 = vector.multi_reduction <add>, %30, %cst_23 [1] : vector<16x32xf32> to vector<16xf32>
      %32 = vector.shape_cast %31 : vector<16xf32> to vector<16x1xf32>
      %cst_24 = arith.constant 3.200000e+01 : f32
      %33 = vector.broadcast %cst_24 : f32 to vector<16x1xf32>
      %34 = arith.divf %32, %33 : vector<16x1xf32>
      %35 = vector.broadcast %27 : vector<16x1xf32> to vector<16x32xf32>
      %36 = arith.subf %23, %35 : vector<16x32xf32>
      %cst_25 = arith.constant 9.99999974E-6 : f32
      %37 = vector.broadcast %cst_25 : f32 to vector<16x1xf32>
      %38 = arith.addf %34, %37 : vector<16x1xf32>
      %39 = math.rsqrt %38 : vector<16x1xf32>
      %40 = vector.broadcast %39 : vector<16x1xf32> to vector<16x32xf32>
      %41 = arith.mulf %36, %40 : vector<16x32xf32>
      %c0_26 = arith.constant 0 : index
      %c0_27 = arith.constant 0 : index
      %42 = vector.load %arg7[%c0_26, %c0_27] : memref<1x32xf32, #tpu.memory_space<vmem>>, vector<1x32xf32>
      %43 = vector.broadcast %42 : vector<1x32xf32> to vector<16x32xf32>
      %44 = arith.mulf %41, %43 : vector<16x32xf32>
      %c0_28 = arith.constant 0 : index
      %c0_29 = arith.constant 0 : index
      %45 = vector.load %arg8[%c0_28, %c0_29] : memref<1x32xf32, #tpu.memory_space<vmem>>, vector<1x32xf32>
      %46 = vector.broadcast %45 : vector<1x32xf32> to vector<16x32xf32>
      %47 = arith.addf %44, %46 : vector<16x32xf32>
      %48 = arith.truncf %47 : vector<16x32xf32> to vector<16x32xbf16>
      %c0_30 = arith.constant 0 : index
      %c0_31 = arith.constant 0 : index
      %49 = vector.load %arg13[%c0_30, %c0_31] : memref<16x32xbf16, #tpu.memory_space<vmem>>, vector<16x32xbf16>
      tpu.vector_store %arg13[%c0_30, %c0_31], %48 {strides = array<i32>} : memref<16x32xbf16, #tpu.memory_space<vmem>>, vector<16x32xbf16>,
    } else {
    }
    %c0 = arith.constant 0 : index
    %c0_1 = arith.constant 0 : index
    %3 = vector.load %arg13[%c0, %c0_1] : memref<16x32xbf16, #tpu.memory_space<vmem>>, vector<16x32xbf16>
    %c0_2 = arith.constant 0 : index
    %c0_3 = arith.constant 0 : index
    %4 = vector.load %arg3[%c0_2, %c0_3] : memref<32x64xbf16, #tpu.memory_space<vmem>>, vector<32x64xbf16>
    %cst = arith.constant dense<0.000000e+00> : vector<16x64xf32>
    %5 = tpu.matmul %3, %4, %cst {dimension_numbers = #tpu.dot_dimension_numbers<[1], [0], [0], [1], [0, 0, 1, 1], [], []>} : vector<16x32xbf16>, vector<32x64xbf16>, vector<16x64xf32> -> vector<16x64xf32>
    %c0_4 = arith.constant 0 : index
    %c0_5 = arith.constant 0 : index
    %6 = vector.load %arg4[%c0_4, %c0_5] : memref<1x64xf32, #tpu.memory_space<vmem>>, vector<1x64xf32>
    %7 = vector.broadcast %6 : vector<1x64xf32> to vector<16x64xf32>
    %8 = arith.addf %5, %7 : vector<16x64xf32>
    %cst_6 = arith.constant 0.000000e+00 : f32
    %9 = vector.broadcast %cst_6 : f32 to vector<16x64xf32>
    %10 = arith.maximumf %8, %9 : vector<16x64xf32>
    %c0_7 = arith.constant 0 : index
    %c0_8 = arith.constant 0 : index
    %11 = vector.load %arg12[%c0_7, %c0_8] : memref<16x32xf32, #tpu.memory_space<vmem>>, vector<16x32xf32>
    %12 = arith.truncf %10 : vector<16x64xf32> to vector<16x64xbf16>
    %c0_9 = arith.constant 0 : index
    %c0_10 = arith.constant 0 : index
    %13 = vector.load %arg5[%c0_9, %c0_10] : memref<64x32xbf16, #tpu.memory_space<vmem>>, vector<64x32xbf16>
    %cst_11 = arith.constant dense<0.000000e+00> : vector<16x32xf32>
    %14 = tpu.matmul %12, %13, %cst_11 {dimension_numbers = #tpu.dot_dimension_numbers<[1], [0], [0], [1], [0, 0, 1, 1], [], []>} : vector<16x64xbf16>, vector<64x32xbf16>, vector<16x32xf32> -> vector<16x32xf32>
    %15 = arith.addf %11, %14 : vector<16x32xf32>
    %c0_12 = arith.constant 0 : index
    %c0_13 = arith.constant 0 : index
    %16 = vector.load %arg12[%c0_12, %c0_13] : memref<16x32xf32, #tpu.memory_space<vmem>>, vector<16x32xf32>
    tpu.vector_store %arg12[%c0_12, %c0_13], %15 {strides = array<i32>} : memref<16x32xf32, #tpu.memory_space<vmem>>, vector<16x32xf32>,
    %c0_i32_14 = arith.constant 0 : i32
    %17 = arith.cmpi eq, %arg1, %c0_i32_14 : i32
    %18 = arith.extui %17 : i1 to i32
    %c0_i32_15 = arith.constant 0 : i32
    %19 = arith.cmpi ne, %18, %c0_i32_15 : i32
    scf.if %19 {
      %c0_16 = arith.constant 0 : index
      %c0_17 = arith.constant 0 : index
      %20 = vector.load %arg12[%c0_16, %c0_17] : memref<16x32xf32, #tpu.memory_space<vmem>>, vector<16x32xf32>
      %c0_18 = arith.constant 0 : index
      %c0_19 = arith.constant 0 : index
      %21 = vector.load %arg6[%c0_18, %c0_19] : memref<1x32xf32, #tpu.memory_space<vmem>>, vector<1x32xf32>
      %22 = vector.broadcast %21 : vector<1x32xf32> to vector<16x32xf32>
      %23 = arith.addf %20, %22 : vector<16x32xf32>
      %c0_20 = arith.constant 0 : index
      %c0_21 = arith.constant 0 : index
      %24 = vector.load %arg2[%c0_20, %c0_21] : memref<16x32xbf16, #tpu.memory_space<vmem>>, vector<16x32xbf16>
      %25 = arith.extf %24 : vector<16x32xbf16> to vector<16x32xf32>
      %26 = arith.addf %23, %25 : vector<16x32xf32>
      %cst_22 = arith.constant dense<0.000000e+00> : vector<16xf32>
      %27 = vector.multi_reduction <add>, %26, %cst_22 [1] : vector<16x32xf32> to vector<16xf32>
      %28 = vector.shape_cast %27 : vector<16xf32> to vector<16x1xf32>
      %cst_23 = arith.constant 3.200000e+01 : f32
      %29 = vector.broadcast %cst_23 : f32 to vector<16x1xf32>
      %30 = arith.divf %28, %29 : vector<16x1xf32>
      %31 = vector.broadcast %30 : vector<16x1xf32> to vector<16x32xf32>
      %32 = arith.subf %26, %31 : vector<16x32xf32>
      %33 = arith.mulf %32, %32 : vector<16x32xf32>
      %cst_24 = arith.constant dense<0.000000e+00> : vector<16xf32>
      %34 = vector.multi_reduction <add>, %33, %cst_24 [1] : vector<16x32xf32> to vector<16xf32>
      %35 = vector.shape_cast %34 : vector<16xf32> to vector<16x1xf32>
      %cst_25 = arith.constant 3.200000e+01 : f32
      %36 = vector.broadcast %cst_25 : f32 to vector<16x1xf32>
      %37 = arith.divf %35, %36 : vector<16x1xf32>
      %38 = vector.broadcast %30 : vector<16x1xf32> to vector<16x32xf32>
      %39 = arith.subf %26, %38 : vector<16x32xf32>
      %cst_26 = arith.constant 9.99999974E-6 : f32
      %40 = vector.broadcast %cst_26 : f32 to vector<16x1xf32>
      %41 = arith.addf %37, %40 : vector<16x1xf32>
      %42 = math.rsqrt %41 : vector<16x1xf32>
      %43 = vector.broadcast %42 : vector<16x1xf32> to vector<16x32xf32>
      %44 = arith.mulf %39, %43 : vector<16x32xf32>
      %c0_27 = arith.constant 0 : index
      %c0_28 = arith.constant 0 : index
      %45 = vector.load %arg9[%c0_27, %c0_28] : memref<1x32xf32, #tpu.memory_space<vmem>>, vector<1x32xf32>
      %46 = vector.broadcast %45 : vector<1x32xf32> to vector<16x32xf32>
      %47 = arith.mulf %44, %46 : vector<16x32xf32>
      %c0_29 = arith.constant 0 : index
      %c0_30 = arith.constant 0 : index
      %48 = vector.load %arg10[%c0_29, %c0_30] : memref<1x32xf32, #tpu.memory_space<vmem>>, vector<1x32xf32>
      %49 = vector.broadcast %48 : vector<1x32xf32> to vector<16x32xf32>
      %50 = arith.addf %47, %49 : vector<16x32xf32>
      %c0_31 = arith.constant 0 : index
      %c0_32 = arith.constant 0 : index
      %51 = vector.load %arg11[%c0_31, %c0_32] : memref<16x32xf32, #tpu.memory_space<vmem>>, vector<16x32xf32>
      tpu.vector_store %arg11[%c0_31, %c0_32], %50 {strides = array<i32>} : memref<16x32xf32, #tpu.memory_space<vmem>>, vector<16x32xf32>,
    } else {
    }
    return
  }
  func.func @transform_0(%arg0: i32, %arg1: i32) -> (i32, i32) {
    %c0_i32 = arith.constant 0 : i32
    %c0_i32_0 = arith.constant 0 : i32
    return %arg0, %c0_i32 : i32, i32
  }
  func.func @transform_1(%arg0: i32, %arg1: i32) -> (i32, i32) {
    %c0_i32 = arith.constant 0 : i32
    %c0_i32_0 = arith.constant 0 : i32
    return %c0_i32, %arg1 : i32, i32
  }
  func.func @transform_2(%arg0: i32, %arg1: i32) -> (i32, i32) {
    %c0_i32 = arith.constant 0 : i32
    %c0_i32_0 = arith.constant 0 : i32
    return %c0_i32, %arg1 : i32, i32
  }
  func.func @transform_3(%arg0: i32, %arg1: i32) -> (i32, i32) {
    %c0_i32 = arith.constant 0 : i32
    %c0_i32_0 = arith.constant 0 : i32
    return %arg1, %c0_i32 : i32, i32
  }
  func.func @transform_4(%arg0: i32, %arg1: i32) -> (i32, i32) {
    %c0_i32 = arith.constant 0 : i32
    %c0_i32_0 = arith.constant 0 : i32
    %c0_i32_1 = arith.constant 0 : i32
    return %c0_i32, %c0_i32_0 : i32, i32
  }
  func.func @transform_5(%arg0: i32, %arg1: i32) -> (i32, i32) {
    %c0_i32 = arith.constant 0 : i32
    %c0_i32_0 = arith.constant 0 : i32
    %c0_i32_1 = arith.constant 0 : i32
    return %c0_i32, %c0_i32_0 : i32, i32
  }
  func.func @transform_6(%arg0: i32, %arg1: i32) -> (i32, i32) {
    %c0_i32 = arith.constant 0 : i32
    %c0_i32_0 = arith.constant 0 : i32
    %c0_i32_1 = arith.constant 0 : i32
    return %c0_i32, %c0_i32_0 : i32, i32
  }
  func.func @transform_7(%arg0: i32, %arg1: i32) -> (i32, i32) {
    %c0_i32 = arith.constant 0 : i32
    %c0_i32_0 = arith.constant 0 : i32
    %c0_i32_1 = arith.constant 0 : i32
    return %c0_i32, %c0_i32_0 : i32, i32
  }
  func.func @transform_8(%arg0: i32, %arg1: i32) -> (i32, i32) {
    %c0_i32 = arith.constant 0 : i32
    %c0_i32_0 = arith.constant 0 : i32
    %c0_i32_1 = arith.constant 0 : i32
    return %c0_i32, %c0_i32_0 : i32, i32
  }
  func.func @transform_9(%arg0: i32, %arg1: i32) -> (i32, i32) {
    %c0_i32 = arith.constant 0 : i32
    %c0_i32_0 = arith.constant 0 : i32
    return %arg0, %c0_i32 : i32, i32
  }
}

</mosaic_0001>

<bundles_post_ra>
// kernel: transformer_forward.16
= control target key start
LH: loop header
LB: loop body
LE: loop exit
PB: predicated region body
PF: predicated region fallthrough
CT: control target
= control target key end

     0   :  { %vm37_vm0 = vcmask 261120   ;;  %v216_v16 = vmov 0.0   ;;  %vm217_vm1 = vmmov 0   ;;  %vm25_vm2 = vcmask 785408   ;;  %s282_s0 = inlined_call_operand.vmem [shape: bf16[16,32], index: 0, kind: input, shape index: {}]   ;;  %s283_s1 = inlined_call_operand.vmem [shape: bf16[32,96], index: 1, kind: input, shape index: {}]   ;;  %s284_s2 = inlined_call_operand.vmem [shape: f32[1,32], index: 2, kind: input, shape index: {}]   ;;  %s285_s3 = inlined_call_operand.vmem [shape: f32[1,32], index: 3, kind: input, shape index: {}]   ;;  %s286_s4 = inlined_call_operand.vmem [shape: f32[1,96], index: 4, kind: input, shape index: {}]   ;;  %s287_s5 = inlined_call_operand.vmem [shape: bf16[16,96], index: 5, kind: output, shape index: {}]  }
   0x1   :  { %v194_v0 = vld [vmem:[%s282_s0] sm:$0xff]   ;;  %200 = vmatprep.subr.bf16.mxu0 %v216_v16  ;;  %v211_v17 = vld [vmem:[%s283_s1 + $0x8] sm:$0xff]   ;;  %204 = vmatprep.mubr.msk.bf16.mxu0 %vm217_vm1, %v216_v16  ;;  %26 = vst.msk [vmem:[#allocation2] sm:$0xff] %vm25_vm2, %v216_v16  ;;  %27 = vst.msk [vmem:[#allocation2 + $0x8] sm:$0xff] %vm25_vm2, %v216_v16  ;;  %vm176_vm3 = vcmask 781312  }
   0x2   :  { %v195_v1 = vunpack.c.l.bf16 %v194_v0  ;;  %v196_v2 = vunpack.c.h.bf16 %v194_v0  ;;  %v210_v15 = vld [vmem:[%s283_s1] sm:$0xff]  }
   0x3   :  { %201 = vmatpush3.bf16.msra.mxu0 %v210_v15  ;;  %v183_v26 = vld [vmem:[%s284_s2] ss:$0 sm:$0xff] }
   0x4   :  { %v38_v3 = vsel %vm37_vm0, %v195_v1, 0.0  ;;  %v41_v4 = vsel %vm37_vm0, %v196_v2, 0.0  ;;  %202 = vmatprep.subr.bf16.mxu0 %v216_v16  ;;  %v184_v30 = vld [vmem:[%s285_s3] ss:$0 sm:$0xff] }
   0x5   :  { %39 = vadd.xlane.f32.xlu0 %v38_v3  ;;  %v188_v44 = vld [vmem:[%s286_s4] ss:$0 sm:$0xff] }
   0x7   :  { %203 = vmatpush3.bf16.msra.mxu0 %v211_v17 }
   0x8   :  { %v86_v36 = vld [vmem:[#allocation2] sm:$0xff]  ;;  %v87_v38 = vld [vmem:[#allocation2 + $0x8] sm:$0xff] }
   0x9   :  { %42 = vadd.xlane.f32.xlu0 %v41_v4 }
  0x92   :  { %v40_v5 = vpop.xlane.xlu0 %39 }
  0x93   :  { %v45_v6 = vmul.f32 0.03125, %v40_v5 }
  0x95   :  { %v47_v7 = vsub.f32 %v195_v1, %v45_v6 }
  0x96   :  { %v43_v8 = vpop.xlane.xlu0 %42 }
  0x97   :  { %v46_v9 = vmul.f32 0.03125, %v43_v8  ;;  %v49_v10 = vmul.f32 %v47_v7, %v47_v7 }
  0x99   :  { %v48_v11 = vsub.f32 %v196_v2, %v46_v9  ;;  %v51_v12 = vsel %vm37_vm0, %v49_v10, 0.0 }
  0x9a   :  { %52 = vadd.xlane.f32.xlu1 %v51_v12 }
  0x9b   :  { %v50_v13 = vmul.f32 %v48_v11, %v48_v11 }
  0x9d   :  { %v54_v14 = vsel %vm37_vm0, %v50_v13, 0.0 }
  0x9e   :  { %55 = vadd.xlane.f32.xlu1 %v54_v14 }
 0x127   :  { %v53_v18 = vpop.xlane.xlu1 %52 }
 0x128   :  { %v57_v19 = vmul.f32 0.03125, %v53_v18 }
 0x12a   :  { %v59_v20 = vadd.f32 1e-05, %v57_v19 }
 0x12b   :  { %v56_v21 = vpop.xlane.xlu1 %55 }
 0x12c   :  { %212 = vrsqrt.f32 %v59_v20  ;;  %v58_v22 = vmul.f32 0.03125, %v56_v21 }
 0x12e   :  { %v60_v23 = vadd.f32 1e-05, %v58_v22 }
 0x130   :  { %214 = vrsqrt.f32 %v60_v23 }
 0x136   :  { %v213_v24 = vpop.eup %212 }
 0x137   :  { %v63_v25 = vmul.f32 %v213_v24, %v47_v7 }
 0x139   :  { %v72_v28 = vmul.f32 %v183_v26, %v63_v25 }
 0x13a   :  { %v215_v27 = vpop.eup %214 }
 0x13b   :  { %v64_v29 = vmul.f32 %v215_v27, %v48_v11  ;;  %v81_v32 = vadd.f32 %v184_v30, %v72_v28 }
 0x13d   :  { %v73_v31 = vmul.f32 %v183_v26, %v64_v29 }
 0x13f   :  { %v82_v33 = vadd.f32 %v184_v30, %v73_v31 }
 0x141   :  { %v83_v34 = vpack.c.bf16 %v82_v33, %v81_v32 }
 0x143   :  { %84 = vst.msk [vmem:[#allocation3] sm:$0xff] %vm37_vm0, %v83_v34 }
 0x14a   :  { %v85_v35 = vld [vmem:[#allocation3] sm:$0xff] }
 0x14b   :  { %205 = vmatmul.mubr.msk.bf16.vlgmr.msra.gmra.mrb[0].mxu0 %vm37_vm0, %v85_v35 }
 0x21e   :  { %v142_v37 = vpop.f32.mrb[0].mxu0 }
 0x21f   :  { %v149_v39 = vadd.f32 %v142_v37, %v86_v36  ;;  %v206_v40 = vpop.f32.mrb[1].mxu0 }
 0x220   :  { %v145_v41 = vpop.f32.mrb[2].mxu0 }
 0x221   :  { %152 = vst.msk [vmem:[#allocation2] sm:$0xff] %vm25_vm2, %v149_v39  ;;  %v150_v42 = vadd.f32 %v145_v41, %v87_v38  ;;  %v207_v43 = vpop.f32.mrb[3].mxu0 }
 0x223   :  { %153 = vst.msk [vmem:[#allocation2 + $0x8] sm:$0xff] %vm25_vm2, %v150_v42 }
 0x228   :  { %v157_v45 = vld [vmem:[#allocation2] sm:$0xff] }
 0x229   :  { %v166_v46 = vadd.f32 %v188_v44, %v157_v45 }
 0x22a   :  { %v158_v47 = vld [vmem:[#allocation2 + $0x8] sm:$0xff] }
 0x22b   :  { %v191_v48 = vpack.c.bf16 %v166_v46, %v166_v46  ;;  %v167_v49 = vadd.f32 %v188_v44, %v158_v47 }
 0x22d   :  { %177 = vst.msk [vmem:[%s287_s5] sm:$0xf] %vm176_vm3, %v191_v48  ;;  %v192_v50 = vpack.c.bf16 %v167_v49, %v167_v49 }
 0x22f   :  { %178 = vst.msk [vmem:[%s287_s5 + $0x4] sm:$0xf] %vm176_vm3, %v192_v50 }

// kernel: transformer_forward.18
= control target key start
LH: loop header
LB: loop body
LE: loop exit
PB: predicated region body
PF: predicated region fallthrough
CT: control target
= control target key end

     0   :  { %vm22_vm0 = vcmask 261120   ;;  %v163_v0 = vmov 0.0   ;;  %vm164_vm1 = vmmov 0   ;;  %vm127_vm2 = vcmask 257024   ;;  %s216_s1 = inlined_call_operand.vmem [shape: bf16[32,32], index: 1, kind: input, shape index: {}]   ;;  %s217_s0 = inlined_call_operand.vmem [shape: bf16[16,32], index: 0, kind: input, shape index: {}]   ;;  %s218_s3 = inlined_call_operand.vmem [shape: bf16[16,32], index: 3, kind: input, shape index: {}]   ;;  %s219_s2 = inlined_call_operand.vmem [shape: f32[1,32], index: 2, kind: input, shape index: {}]   ;;  %s220_s4 = inlined_call_operand.vmem [shape: bf16[16,32], index: 4, kind: output, shape index: {}]  }
   0x1   :  { %150 = vmatprep.subr.bf16.mxu0 %v163_v0  ;;  %v160_v1 = vld [vmem:[%s216_s1] sm:$0xff]   ;;  %154 = vmatprep.mubr.msk.bf16.mxu0 %vm164_vm1, %v163_v0  ;;  %23 = vst.msk [vmem:[#allocation2] sm:$0xff] %vm22_vm0, %v163_v0  ;;  %24 = vst.msk [vmem:[#allocation2 + $0x8] sm:$0xff] %vm22_vm0, %v163_v0  ;;  %v161_v2 = vld [vmem:[%s216_s1 + $0x8] sm:$0xff]  }
   0x2   :  { %151 = vmatpush3.bf16.msra.mxu0 %v160_v1  ;;  %v162_v3 = vld [vmem:[%s217_s0] sm:$0xff]  }
   0x3   :  { %152 = vmatprep.subr.bf16.mxu0 %v163_v0  ;;  %v144_v12 = vld [vmem:[%s218_s3] sm:$0xff]  }
   0x4   :  { %v138_v13 = vld [vmem:[%s219_s2] ss:$0 sm:$0xff]  ;;  %v145_v14 = vunpack.c.l.bf16 %v144_v12  ;;  %v146_v17 = vunpack.c.h.bf16 %v144_v12 }
   0x6   :  { %153 = vmatpush3.bf16.msra.mxu0 %v161_v2 }
   0x8   :  { %v27_v4 = vld [vmem:[#allocation2] sm:$0xff]  ;;  %v28_v6 = vld [vmem:[#allocation2 + $0x8] sm:$0xff] }
   0x9   :  { %155 = vmatmul.mubr.msk.bf16.vlgmr.msra.gmra.mrb[0].mxu0 %vm22_vm0, %v162_v3 }
  0xdc   :  { %v88_v5 = vpop.f32.mrb[0].mxu0 }
  0xdd   :  { %v95_v7 = vadd.f32 %v88_v5, %v27_v4  ;;  %v156_v8 = vpop.f32.mrb[1].mxu0 }
  0xde   :  { %v91_v9 = vpop.f32.mrb[2].mxu0 }
  0xdf   :  { %97 = vst.msk [vmem:[#allocation2] sm:$0xff] %vm22_vm0, %v95_v7  ;;  %v96_v10 = vadd.f32 %v91_v9, %v28_v6  ;;  %v157_v11 = vpop.f32.mrb[3].mxu0 }
  0xe1   :  { %98 = vst.msk [vmem:[#allocation2 + $0x8] sm:$0xff] %vm22_vm0, %v96_v10 }
  0xe6   :  { %v102_v15 = vld [vmem:[#allocation2] sm:$0xff] }
  0xe7   :  { %v111_v16 = vadd.f32 %v138_v13, %v102_v15 }
  0xe8   :  { %v103_v18 = vld [vmem:[#allocation2 + $0x8] sm:$0xff] }
  0xe9   :  { %v117_v19 = vadd.f32 %v145_v14, %v111_v16  ;;  %v112_v20 = vadd.f32 %v138_v13, %v103_v18 }
  0xeb   :  { %v141_v21 = vpack.c.bf16 %v117_v19, %v117_v19  ;;  %v118_v22 = vadd.f32 %v146_v17, %v112_v20 }
  0xed   :  { %128 = vst.msk [vmem:[%s220_s4] sm:$0xf] %vm127_vm2, %v141_v21  ;;  %v142_v23 = vpack.c.bf16 %v118_v22, %v118_v22 }
  0xef   :  { %129 = vst.msk [vmem:[%s220_s4 + $0x4] sm:$0xf] %vm127_vm2, %v142_v23 }

// kernel: transformer_forward.19
= control target key start
LH: loop header
LB: loop body
LE: loop exit
PB: predicated region body
PF: predicated region fallthrough
CT: control target
= control target key end

     0   :  { %vm25_vm0 = vcmask 261120   ;;  %v215_v16 = vmov 0.0   ;;  %vm216_vm1 = vmmov 0   ;;  %vm175_vm2 = vcmask 257024   ;;  %s281_s0 = inlined_call_operand.vmem [shape: bf16[16,32], index: 0, kind: input, shape index: {}]   ;;  %s282_s1 = inlined_call_operand.vmem [shape: bf16[32,32], index: 1, kind: input, shape index: {}]   ;;  %s283_s2 = inlined_call_operand.vmem [shape: f32[1,32], index: 2, kind: input, shape index: {}]   ;;  %s284_s3 = inlined_call_operand.vmem [shape: f32[1,32], index: 3, kind: input, shape index: {}]   ;;  %s285_s4 = inlined_call_operand.vmem [shape: f32[1,32], index: 4, kind: input, shape index: {}]   ;;  %s286_s5 = inlined_call_operand.vmem [shape: bf16[16,32], index: 5, kind: output, shape index: {}]  }
   0x1   :  { %v193_v0 = vld [vmem:[%s281_s0] sm:$0xff]   ;;  %199 = vmatprep.subr.bf16.mxu0 %v215_v16  ;;  %26 = vst.msk [vmem:[#allocation2] sm:$0xff] %vm25_vm0, %v215_v16  ;;  %27 = vst.msk [vmem:[#allocation2 + $0x8] sm:$0xff] %vm25_vm0, %v215_v16  ;;  %v210_v17 = vld [vmem:[%s282_s1 + $0x8] sm:$0xff]   ;;  %203 = vmatprep.mubr.msk.bf16.mxu0 %vm216_vm1, %v215_v16 }
   0x2   :  { %v194_v1 = vunpack.c.l.bf16 %v193_v0  ;;  %v195_v2 = vunpack.c.h.bf16 %v193_v0  ;;  %v209_v15 = vld [vmem:[%s282_s1] sm:$0xff]  }
   0x3   :  { %200 = vmatpush3.bf16.msra.mxu0 %v209_v15  ;;  %v182_v26 = vld [vmem:[%s283_s2] ss:$0 sm:$0xff] }
   0x4   :  { %v38_v3 = vsel %vm25_vm0, %v194_v1, 0.0  ;;  %v41_v4 = vsel %vm25_vm0, %v195_v2, 0.0  ;;  %201 = vmatprep.subr.bf16.mxu0 %v215_v16  ;;  %v183_v30 = vld [vmem:[%s284_s3] ss:$0 sm:$0xff] }
   0x5   :  { %39 = vadd.xlane.f32.xlu0 %v38_v3  ;;  %v187_v44 = vld [vmem:[%s285_s4] ss:$0 sm:$0xff] }
   0x7   :  { %202 = vmatpush3.bf16.msra.mxu0 %v210_v17 }
   0x8   :  { %v86_v36 = vld [vmem:[#allocation2] sm:$0xff]  ;;  %v87_v38 = vld [vmem:[#allocation2 + $0x8] sm:$0xff] }
   0x9   :  { %42 = vadd.xlane.f32.xlu0 %v41_v4 }
  0x92   :  { %v40_v5 = vpop.xlane.xlu0 %39 }
  0x93   :  { %v45_v6 = vmul.f32 0.03125, %v40_v5 }
  0x95   :  { %v47_v7 = vsub.f32 %v194_v1, %v45_v6 }
  0x96   :  { %v43_v8 = vpop.xlane.xlu0 %42 }
  0x97   :  { %v46_v9 = vmul.f32 0.03125, %v43_v8  ;;  %v49_v10 = vmul.f32 %v47_v7, %v47_v7 }
  0x99   :  { %v48_v11 = vsub.f32 %v195_v2, %v46_v9  ;;  %v51_v12 = vsel %vm25_vm0, %v49_v10, 0.0 }
  0x9a   :  { %52 = vadd.xlane.f32.xlu1 %v51_v12 }
  0x9b   :  { %v50_v13 = vmul.f32 %v48_v11, %v48_v11 }
  0x9d   :  { %v54_v14 = vsel %vm25_vm0, %v50_v13, 0.0 }
  0x9e   :  { %55 = vadd.xlane.f32.xlu1 %v54_v14 }
 0x127   :  { %v53_v18 = vpop.xlane.xlu1 %52 }
 0x128   :  { %v57_v19 = vmul.f32 0.03125, %v53_v18 }
 0x12a   :  { %v59_v20 = vadd.f32 1e-05, %v57_v19 }
 0x12b   :  { %v56_v21 = vpop.xlane.xlu1 %55 }
 0x12c   :  { %211 = vrsqrt.f32 %v59_v20  ;;  %v58_v22 = vmul.f32 0.03125, %v56_v21 }
 0x12e   :  { %v60_v23 = vadd.f32 1e-05, %v58_v22 }
 0x130   :  { %213 = vrsqrt.f32 %v60_v23 }
 0x136   :  { %v212_v24 = vpop.eup %211 }
 0x137   :  { %v63_v25 = vmul.f32 %v212_v24, %v47_v7 }
 0x139   :  { %v72_v28 = vmul.f32 %v182_v26, %v63_v25 }
 0x13a   :  { %v214_v27 = vpop.eup %213 }
 0x13b   :  { %v64_v29 = vmul.f32 %v214_v27, %v48_v11  ;;  %v81_v32 = vadd.f32 %v183_v30, %v72_v28 }
 0x13d   :  { %v73_v31 = vmul.f32 %v182_v26, %v64_v29 }
 0x13f   :  { %v82_v33 = vadd.f32 %v183_v30, %v73_v31 }
 0x141   :  { %v83_v34 = vpack.c.bf16 %v82_v33, %v81_v32 }
 0x143   :  { %84 = vst.msk [vmem:[#allocation3] sm:$0xff] %vm25_vm0, %v83_v34 }
 0x14a   :  { %v85_v35 = vld [vmem:[#allocation3] sm:$0xff] }
 0x14b   :  { %204 = vmatmul.mubr.msk.bf16.vlgmr.msra.gmra.mrb[0].mxu0 %vm25_vm0, %v85_v35 }
 0x21e   :  { %v142_v37 = vpop.f32.mrb[0].mxu0 }
 0x21f   :  { %v149_v39 = vadd.f32 %v142_v37, %v86_v36  ;;  %v205_v40 = vpop.f32.mrb[1].mxu0 }
 0x220   :  { %v145_v41 = vpop.f32.mrb[2].mxu0 }
 0x221   :  { %151 = vst.msk [vmem:[#allocation2] sm:$0xff] %vm25_vm0, %v149_v39  ;;  %v150_v42 = vadd.f32 %v145_v41, %v87_v38  ;;  %v206_v43 = vpop.f32.mrb[3].mxu0 }
 0x223   :  { %152 = vst.msk [vmem:[#allocation2 + $0x8] sm:$0xff] %vm25_vm0, %v150_v42 }
 0x228   :  { %v156_v45 = vld [vmem:[#allocation2] sm:$0xff] }
 0x229   :  { %v165_v46 = vadd.f32 %v187_v44, %v156_v45 }
 0x22a   :  { %v157_v47 = vld [vmem:[#allocation2 + $0x8] sm:$0xff] }
 0x22b   :  { %v190_v48 = vpack.c.bf16 %v165_v46, %v165_v46  ;;  %v166_v49 = vadd.f32 %v187_v44, %v157_v47 }
 0x22d   :  { %176 = vst.msk [vmem:[%s286_s5] sm:$0xf] %vm175_vm2, %v190_v48  ;;  %v191_v50 = vpack.c.bf16 %v166_v49, %v166_v49 }
 0x22f   :  { %177 = vst.msk [vmem:[%s286_s5 + $0x4] sm:$0xf] %vm175_vm2, %v191_v50 }

// kernel: transformer_forward.17
= control target key start
LH: loop header
LB: loop body
LE: loop exit
PB: predicated region body
PF: predicated region fallthrough
CT: control target
= control target key end

     0   :  { %s1141_s12 = smov 0   ;;  %s1143_s13 = smov 0   ;;  %s1319_s0 = inlined_call_operand.vmem [shape: bf16[8,8,8], index: 0, kind: input, shape index: {}]   ;;  %s1320_s1 = inlined_call_operand.vmem [shape: bf16[8,8,8], index: 1, kind: input, shape index: {}]   ;;  %s1321_s2 = inlined_call_operand.vmem [shape: bf16[8,8,8], index: 2, kind: input, shape index: {}]   ;;  %s1322_s3 = inlined_call_operand.vmem [shape: bf16[8,8,8], index: 3, kind: output, shape index: {}]  }
   0x1   :  { %s1145_s14 = smov 0  }
   0x2 LB: > { %s25_s15 = sadd.s32 1, %s1110_s13  ;;  %p954_p0 = scmp.ge.s32.totalorder %s1114_s14, 1  ;;  %s1114_s14 = sphi %s1145_s14, %s13_s14   ;;  %s1110_s13 = sphi %s1143_s13, %s1324_s13   ;;  %s1106_s12 = sphi %s1141_s12, %s1323_s12  }
   0x3   : > { %p27_p1 = scmp.ge.s32.totalorder %s25_s15, 2  ;;  %p182_p2 = scmp.lt.s32.totalorder %s1114_s14, 3 }
   0x5   : > { %s1326_s15 = smov (%p27_p1, %s25_s15), 0  ;;  %p183_p3 = pnand %p954_p0, %p182_p2 }
   0x6   : > { %s955_s16 = sshll.u32 (!%p183_p3), %s1106_s12, 2  ;;  %vm266_vm0 = vcmask (!%p183_p3), 64512   ;;  %v1116_v0 = vmov (!%p183_p3), 0.0   ;;  %vm1117_vm1 = vmmov (!%p183_p3), 0   ;;  %vm257_vm2 = vcmask (!%p183_p3), 7168  }
   0x7   : > { %186 = sbr.rel (%p183_p3) target bundleno = 839 (0x347), region = 32  ;;  %989 = vmatprep.subr.bf16.mxu0 (!%p183_p3), %v1116_v0  ;;  %p223_p4 = scmp.lt.s32.totalorder (!%p183_p3), %s955_s16, 7  ;;  %267 = vst.msk [vmem:[#allocation4] sm:$0xff] (!%p183_p3), %vm266_vm0, %v1116_v0  ;;  %268 = vst.msk [vmem:[#allocation4 + $0x8] sm:$0xff] (!%p183_p3), %vm266_vm0, %v1116_v0  ;;  %995 = vmatprep.subr.bf16.mxu1 (!%p183_p3), %v1116_v0  ;;  %v1118_v13 = vmov (!%p183_p3), -1e+30   ;;  %v468_v14 = vlaneseq (!%p183_p3) }
   0x8   : > { %269 = vst.msk [vmem:[#allocation4 + $0x10] sm:$0xff] (!%p183_p3), %vm266_vm0, %v1116_v0  ;;  %270 = vst.msk [vmem:[#allocation4 + $0x18] sm:$0xff] (!%p183_p3), %vm266_vm0, %v1116_v0  ;;  %991 = vmatprep.mubr.msk.bf16.mxu0 (!%p183_p3), %vm1117_vm1, %v1116_v0  ;;  %997 = vmatprep.mubr.msk.bf16.mxu1 (!%p183_p3), %vm1117_vm1, %v1116_v0  ;;  %v1119_v19 = vmov (!%p183_p3), -1e+09   ;;  %v1120_v47 = vmov (!%p183_p3), 0   ;;  %vm613_vm4 = vcmask (!%p183_p3), 1043456  }
   0x9   : > { %258 = vst.msk [vmem:[#allocation2] sm:$0xff] (!%p183_p3), %vm257_vm2, %v1118_v13  ;;  %259 = vst.msk [vmem:[#allocation2 + $0x8] sm:$0xff] (!%p183_p3), %vm257_vm2, %v1118_v13  ;;  %v469_v15 = vshrl.u32 (!%p183_p3), %v468_v14, 7  ;;  %v471_v16 = vand.u32 (!%p183_p3), 127, %v468_v14  ;;  %1066 = vset.pattern.permute.xlu0 (!%p183_p3), %v1120_v47  ;;  %1067 = vset.pattern.permute.xlu1 (!%p183_p3), %v1120_v47  ;;  %vm850_vm5 = vcmask (!%p183_p3), 60416  }
   0xa   : > { %260 = vst.msk [vmem:[#allocation2 + $0x10] sm:$0xff] (!%p183_p3), %vm257_vm2, %v1118_v13  ;;  %261 = vst.msk [vmem:[#allocation2 + $0x18] sm:$0xff] (!%p183_p3), %vm257_vm2, %v1118_v13 }
   0xb   : > { %262 = vst.msk [vmem:[#allocation3] sm:$0xff] (!%p183_p3), %vm257_vm2, %v1116_v0  ;;  %263 = vst.msk [vmem:[#allocation3 + $0x8] sm:$0xff] (!%p183_p3), %vm257_vm2, %v1116_v0  ;;  %vm475_vm3 = vcmp.le.s32.totalorder (!%p183_p3), %v471_v16, %v469_v15 }
   0xc   : > { %264 = vst.msk [vmem:[#allocation3 + $0x10] sm:$0xff] (!%p183_p3), %vm257_vm2, %v1116_v0  ;;  %265 = vst.msk [vmem:[#allocation3 + $0x18] sm:$0xff] (!%p183_p3), %vm257_vm2, %v1116_v0  ;;  %v476_v20 = vsel (!%p183_p3), %vm475_vm3, 0.0, %v1119_v19 }
   0xe   : > { %s1328_s16 = smov (!%p223_p4, %s955_s16), 7 }
   0xf   : > { %s1173_s17 = sshll.u32 %s1328_s16, 2 }
  0x10   : > { %s235_s20 = scalar_lea.vmem %s1320_s1, %s1173_s17  ;;  %s226_s23 = scalar_lea.vmem %s1319_s0, %s1173_s17  ;;  %v1225_v48 = vld [vmem:[#allocation2] sm:$0xff]  ;;  %v1230_v51 = vld [vmem:[#allocation2 + $0x8] sm:$0xff] }
  0x11   : > { %v275_v1 = vld [vmem:[%s235_s20] sm:$0xf]  ;;  %v276_v2 = vld [vmem:[%s235_s20 + $0x4] sm:$0xf]  ;;  %v277_v5 = vld [vmem:[%s235_s20 + $0x8] sm:$0xf]  ;;  %s244_s26 = scalar_lea.vmem %s1321_s2, %s1173_s17  ;;  %s250_s29 = scalar_lea.vmem %s1322_s3, %s1173_s17 }
  0x12   : > { %v284_v3 = vsel %vm266_vm0, %v275_v1, 0  ;;  %v330_v4 = vsel %vm266_vm0, %v276_v2, 0  ;;  %v278_v6 = vld [vmem:[%s235_s20 + $0xc] sm:$0xf]  ;;  %v271_v7 = vld [vmem:[%s226_s23] sm:$0xf] }
  0x13   : > { %990 = vmatpush3.bf16.xpose.msra.mxu0 %v284_v3  ;;  %996 = vmatpush3.bf16.xpose.msra.mxu1 %v330_v4  ;;  %v272_v8 = vld [vmem:[%s226_s23 + $0x4] sm:$0xf]  ;;  %v376_v9 = vsel %vm266_vm0, %v277_v5, 0  ;;  %v422_v10 = vsel %vm266_vm0, %v278_v6, 0  ;;  %v273_v11 = vld [vmem:[%s226_s23 + $0x8] sm:$0xf] }
  0x14   : > { %1001 = vmatprep.subr.bf16.mxu0 %v1116_v0  ;;  %1007 = vmatprep.subr.bf16.mxu1 %v1116_v0  ;;  %v274_v12 = vld [vmem:[%s226_s23 + $0xc] sm:$0xf]  ;;  %v1240_v55 = vld [vmem:[#allocation2 + $0x10] sm:$0xff]  ;;  %v1250_v59 = vld [vmem:[#allocation2 + $0x18] sm:$0xff] }
  0x15   : > { %v606_v1 = vld [vmem:[%s244_s26] sm:$0xf]  ;;  %v607_v3 = vld [vmem:[%s244_s26 + $0x4] sm:$0xf]  ;;  %v608_v5 = vld [vmem:[%s244_s26 + $0x8] sm:$0xf] }
  0x16   : > { %v615_v2 = vsel %vm613_vm4, %v606_v1, 0  ;;  %v661_v4 = vsel %vm613_vm4, %v607_v3, 0  ;;  %v707_v6 = vsel %vm613_vm4, %v608_v5, 0  ;;  %v547_v47 = vld [vmem:[#allocation3 + $0x10] sm:$0xff]  ;;  %v574_v1 = vld [vmem:[#allocation4] sm:$0xff] }
  0x1a   : > { %992 = vmatmul.mubr.msk.bf16.vlgmr.msra.gmra.mrb[0].mxu0 %vm266_vm0, %v271_v7  ;;  %998 = vmatmul.mubr.msk.bf16.vlgmr.msra.gmra.mrb[0].mxu1 %vm266_vm0, %v272_v8  ;;  %v609_v7 = vld [vmem:[%s244_s26 + $0xc] sm:$0xf] }
  0x1b   : > { %1002 = vmatpush3.bf16.xpose.msra.mxu0 %v376_v9  ;;  %1008 = vmatpush3.bf16.xpose.msra.mxu1 %v422_v10  ;;  %v753_v8 = vsel %vm613_vm4, %v609_v7, 0 }
  0x1c   : > { %1003 = vmatprep.mubr.msk.bf16.mxu0 %vm1117_vm1, %v1116_v0  ;;  %1009 = vmatprep.mubr.msk.bf16.mxu1 %vm1117_vm1, %v1116_v0 }
  0x1d   : > { %1013 = vmatprep.subr.bf16.mxu0 %v1116_v0  ;;  %1019 = vmatprep.subr.bf16.mxu1 %v1116_v0 }
  0x22   : > { %1004 = vmatmul.mubr.msk.bf16.vlgmr.msra.gmra.mrb[4].mxu0 %vm266_vm0, %v273_v11  ;;  %1010 = vmatmul.mubr.msk.bf16.vlgmr.msra.gmra.mrb[4].mxu1 %vm266_vm0, %v274_v12 }
  0x23   : > { %1015 = vmatprep.mubr.msk.bf16.mxu0 %vm1117_vm1, %v1116_v0  ;;  %1021 = vmatprep.mubr.msk.bf16.mxu1 %vm1117_vm1, %v1116_v0 }
  0x24   : > { %1014 = vmatpush3.bf16.msra.mxu0 %v615_v2  ;;  %1020 = vmatpush3.bf16.msra.mxu1 %v661_v4  ;;  %v575_v4 = vld [vmem:[#allocation4 + $0x8] sm:$0xff] }
  0x25   : > { %1025 = vmatprep.subr.bf16.mxu0 %v1116_v0  ;;  %1031 = vmatprep.subr.bf16.mxu1 %v1116_v0 }
  0xed   : > { %v320_v17 = vpop.f32.mrb[0].mxu0  ;;  %v366_v18 = vpop.f32.mrb[0].mxu1 }
  0xee   : > { %v464_v21 = vmul.f32 0.35355338, %v320_v17  ;;  %v993_v22 = vpop.f32.mrb[1].mxu0  ;;  %v465_v23 = vmul.f32 0.35355338, %v366_v18  ;;  %v999_v24 = vpop.f32.mrb[1].mxu1 }
  0xef   : > { %v323_v25 = vpop.f32.mrb[2].mxu0  ;;  %v369_v26 = vpop.f32.mrb[2].mxu1 }
  0xf0   : > { %v994_v27 = vpop.f32.mrb[3].mxu0  ;;  %v1000_v28 = vpop.f32.mrb[3].mxu1  ;;  %v1215_v29 = vadd.f32 %v476_v20, %v464_v21  ;;  %v1217_v30 = vadd.f32 %v476_v20, %v465_v23 }
  0xf2   : > { %v485_v31 = vsel %vm266_vm0, %v1215_v29, -inf  ;;  %v488_v32 = vsel %vm266_vm0, %v1217_v30, -inf }
  0xf3   : > { %486 = vmax.xlane.f32.xlu0 %v485_v31 }
  0xf5   : > { %v412_v33 = vpop.f32.mrb[4].mxu0  ;;  %v458_v34 = vpop.f32.mrb[4].mxu1 }
  0xf6   : > { %v466_v35 = vmul.f32 0.35355338, %v412_v33  ;;  %v1005_v36 = vpop.f32.mrb[5].mxu0  ;;  %v467_v37 = vmul.f32 0.35355338, %v458_v34  ;;  %v1011_v38 = vpop.f32.mrb[5].mxu1 }
  0xf7   : > { %489 = vmax.xlane.f32.xlu0 %v488_v32  ;;  %v415_v39 = vpop.f32.mrb[6].mxu0  ;;  %v461_v40 = vpop.f32.mrb[6].mxu1 }
  0xf8   : > { %v1006_v41 = vpop.f32.mrb[7].mxu0  ;;  %v1012_v42 = vpop.f32.mrb[7].mxu1  ;;  %v479_v43 = vadd.f32 %v476_v20, %v466_v35  ;;  %v480_v44 = vadd.f32 %v476_v20, %v467_v37  ;;  %v545_v40 = vld [vmem:[#allocation3] sm:$0xff] }
  0xfa   : > { %v491_v45 = vsel %vm266_vm0, %v479_v43, -inf  ;;  %v494_v46 = vsel %vm266_vm0, %v480_v44, -inf }
  0xfb   : > { %492 = vmax.xlane.f32.xlu1 %v491_v45 }
  0xff   : > { %495 = vmax.xlane.f32.xlu1 %v494_v46 }
 0x180   : > { %v487_v49 = vpop.xlane.xlu0 %486 }
 0x181   : > { %v1228_v50 = vmax.f32 %v1225_v48, %v487_v49 }
 0x183   : > { %v501_v52 = vsub.f32 %v1225_v48, %v1228_v50  ;;  %803 = vst.msk [vmem:[#allocation2] sm:$0xff] %vm257_vm2, %v1228_v50  ;;  %515 = vperm.xlu0 %1066, %v1228_v50  }
 0x184   : > { %v490_v53 = vpop.xlane.xlu0 %489 }
 0x185   : > { %v1238_v54 = vmax.f32 %v1230_v51, %v490_v53 }
 0x187   : > { %v502_v56 = vsub.f32 %v1230_v51, %v1238_v54  ;;  %804 = vst.msk [vmem:[#allocation2 + $0x8] sm:$0xff] %vm257_vm2, %v1238_v54  ;;  %520 = vperm.xlu1 %1067, %v1238_v54   ;;  %v548_v51 = vld [vmem:[#allocation3 + $0x18] sm:$0xff] }
 0x188   : > { %v493_v57 = vpop.xlane.xlu1 %492 }
 0x189   : > { %v1248_v58 = vmax.f32 %v1240_v55, %v493_v57  ;;  %v507_v31 = vmul.f32 1.442695, %v502_v56 }
 0x18b   : > { %v503_v60 = vsub.f32 %v1240_v55, %v1248_v58  ;;  %805 = vst.msk [vmem:[#allocation2 + $0x10] sm:$0xff] %vm257_vm2, %v1248_v58  ;;  %525 = vperm.xlu1 %1067, %v1248_v58  }
 0x18c   : > { %v496_v61 = vpop.xlane.xlu1 %495 }
 0x18d   : > { %v1258_v62 = vmax.f32 %v1250_v59, %v496_v61  ;;  %v509_v34 = vmul.f32 1.442695, %v503_v60 }
 0x18f   : > { %v504_v63 = vsub.f32 %v1250_v59, %v1258_v62  ;;  %806 = vst.msk [vmem:[#allocation2 + $0x18] sm:$0xff] %vm257_vm2, %v1258_v62  ;;  %530 = vperm.xlu1 %1067, %v1258_v62  }
 0x191   : > { %v511_v35 = vmul.f32 1.442695, %v504_v63 }
 0x202   : > { %v516_v9 = vpop.permute.xlu0 %515 }
 0x203   : > { %v533_v10 = vsub.f32 %v1215_v29, %v516_v9 }
 0x205   : > { %v537_v11 = vmul.f32 1.442695, %v533_v10 }
 0x206   : > { %v521_v12 = vpop.permute.xlu1 %520 }
 0x207   : > { %1068 = vpow2.f32 %v537_v11  ;;  %v534_v13 = vsub.f32 %v1217_v30, %v521_v12 }
 0x209   : > { %v539_v14 = vmul.f32 1.442695, %v534_v13  ;;  %v576_v13 = vld [vmem:[#allocation4 + $0x10] sm:$0xff] }
 0x20a   : > { %v526_v15 = vpop.permute.xlu1 %525 }
 0x20b   : > { %1070 = vpow2.f32 %v539_v14  ;;  %v535_v16 = vsub.f32 %v479_v43, %v526_v15  ;;  %v546_v43 = vld [vmem:[#allocation3 + $0x8] sm:$0xff] }
 0x20d   : > { %v541_v17 = vmul.f32 1.442695, %v535_v16 }
 0x20e   : > { %v531_v18 = vpop.permute.xlu1 %530 }
 0x20f   : > { %1072 = vpow2.f32 %v541_v17  ;;  %v536_v19 = vsub.f32 %v480_v44, %v531_v18 }
 0x211   : > { %v1069_v20 = vpop.eup %1068  ;;  %v543_v21 = vmul.f32 1.442695, %v536_v19 }
 0x212   : > { %v553_v22 = vsel %vm266_vm0, %v1069_v20, 0.0  ;;  %v602_v23 = vpack.c.bf16 %v1069_v20, %v1069_v20  ;;  %v577_v20 = vld [vmem:[#allocation4 + $0x18] sm:$0xff] }
 0x213   : > { %1074 = vpow2.f32 %v543_v21  ;;  %554 = vadd.xlane.f32.xlu1 %v553_v22 }
 0x214   : > { %1016 = vmatmul.mubr.msk.bf16.vlgmr.msra.gmra.mrb[8].mxu0 %vm266_vm0, %v602_v23  ;;  %1076 = vpow2.f32 %v507_v31 }
 0x215   : > { %v1071_v24 = vpop.eup %1070  ;;  %1026 = vmatpush3.bf16.msra.mxu0 %v707_v6  ;;  %1027 = vmatprep.mubr.msk.bf16.mxu0 %vm1117_vm1, %v1116_v0 }
 0x216   : > { %v556_v25 = vsel %vm266_vm0, %v1071_v24, 0.0  ;;  %v603_v26 = vpack.c.bf16 %v1071_v24, %v1071_v24 }
 0x217   : > { %557 = vadd.xlane.f32.xlu0 %v556_v25 }
 0x218   : > { %1022 = vmatmul.mubr.msk.bf16.vlgmr.msra.gmra.mrb[8].mxu1 %vm266_vm0, %v603_v26 }
 0x219   : > { %v1073_v27 = vpop.eup %1072  ;;  %1032 = vmatpush3.bf16.msra.mxu1 %v753_v8  ;;  %1033 = vmatprep.mubr.msk.bf16.mxu1 %vm1117_vm1, %v1116_v0  ;;  %v505_v0 = vmul.f32 1.442695, %v501_v52 }
 0x21a   : > { %v559_v28 = vsel %vm266_vm0, %v1073_v27, 0.0  ;;  %v604_v29 = vpack.c.bf16 %v1073_v27, %v1073_v27 }
 0x21b   : > { %560 = vadd.xlane.f32.xlu1 %v559_v28  ;;  %1078 = vpow2.f32 %v505_v0 }
 0x21c   : > { %1028 = vmatmul.mubr.msk.bf16.vlgmr.msra.gmra.mrb[12].mxu0 %vm266_vm0, %v604_v29  ;;  %1080 = vpow2.f32 %v509_v34 }
 0x21d   : > { %v1075_v30 = vpop.eup %1074  ;;  %1082 = vpow2.f32 %v511_v35 }
 0x21e   : > { %v562_v32 = vsel %vm266_vm0, %v1075_v30, 0.0  ;;  %v605_v33 = vpack.c.bf16 %v1075_v30, %v1075_v30  ;;  %v1077_v36 = vpop.eup %1076 }
 0x21f   : > { %563 = vadd.xlane.f32.xlu1 %v562_v32  ;;  %v550_v45 = vmul.f32 %v1077_v36, %v546_v43 }
 0x220   : > { %1034 = vmatmul.mubr.msk.bf16.vlgmr.msra.gmra.mrb[12].mxu1 %vm266_vm0, %v605_v33 }
 0x225   : > { %v1079_v37 = vpop.eup %1078 }
 0x226   : > { %v1081_v38 = vpop.eup %1080  ;;  %v549_v41 = vmul.f32 %v1079_v37, %v545_v40 }
 0x227   : > { %v1083_v39 = vpop.eup %1082  ;;  %v551_v49 = vmul.f32 %v1081_v38, %v547_v47 }
 0x228   : > { %v552_v54 = vmul.f32 %v1083_v39, %v548_v51 }
 0x22d   : > { %585 = vperm.xlu0 %1066, %v1077_v36  }
 0x230   : > { %580 = vperm.xlu1 %1067, %v1079_v37  }
 0x234   : > { %590 = vperm.xlu1 %1067, %v1081_v38  }
 0x238   : > { %595 = vperm.xlu1 %1067, %v1083_v39  }
 0x2a0   : > { %v555_v42 = vpop.xlane.xlu1 %554 }
 0x2a1   : > { %v565_v44 = vadd.f32 %v555_v42, %v549_v41 }
 0x2a3   : > { %570 = vst.msk [vmem:[#allocation3] sm:$0xff] %vm257_vm2, %v565_v44 }
 0x2a4   : > { %v558_v46 = vpop.xlane.xlu0 %557 }
 0x2a5   : > { %v566_v48 = vadd.f32 %v558_v46, %v550_v45 }
 0x2a7   : > { %571 = vst.msk [vmem:[#allocation3 + $0x8] sm:$0xff] %vm257_vm2, %v566_v48 }
 0x2a8   : > { %v561_v50 = vpop.xlane.xlu1 %560 }
 0x2a9   : > { %v567_v52 = vadd.f32 %v561_v50, %v551_v49 }
 0x2aa   : > { %v814_v53 = vld [vmem:[#allocation3] sm:$0xff] }
 0x2ab   : > { %572 = vst.msk [vmem:[#allocation3 + $0x10] sm:$0xff] %vm257_vm2, %v567_v52  ;;  %1084 = vrcp.f32 %v814_v53 }
 0x2ac   : > { %v564_v55 = vpop.xlane.xlu1 %563  ;;  %v586_v5 = vpop.permute.xlu0 %585 }
 0x2ad   : > { %v568_v56 = vadd.f32 %v564_v55, %v552_v54  ;;  %v599_v11 = vmul.f32 %v586_v5, %v575_v4 }
 0x2ae   : > { %v815_v57 = vld [vmem:[#allocation3 + $0x8] sm:$0xff] }
 0x2af   : > { %573 = vst.msk [vmem:[#allocation3 + $0x18] sm:$0xff] %vm257_vm2, %v568_v56  ;;  %1086 = vrcp.f32 %v815_v57 }
 0x2b0   : > { %v581_v2 = vpop.permute.xlu1 %580 }
 0x2b1   : > { %v598_v3 = vmul.f32 %v581_v2, %v574_v1 }
 0x2b2   : > { %v816_v58 = vld [vmem:[#allocation3 + $0x10] sm:$0xff] }
 0x2b3   : > { %1088 = vrcp.f32 %v816_v58 }
 0x2b4   : > { %v591_v9 = vpop.permute.xlu1 %590 }
 0x2b5   : > { %v1085_v59 = vpop.eup %1084  ;;  %v600_v18 = vmul.f32 %v591_v9, %v576_v13 }
 0x2b6   : > { %824 = vperm.xlu1 %1067, %v1085_v59   ;;  %v817_v60 = vld [vmem:[#allocation3 + $0x18] sm:$0xff] }
 0x2b7   : > { %1090 = vrcp.f32 %v817_v60 }
 0x2b8   : > { %v596_v21 = vpop.permute.xlu1 %595 }
 0x2b9   : > { %v1087_v61 = vpop.eup %1086  ;;  %v601_v26 = vmul.f32 %v596_v21, %v577_v20 }
 0x2ba   : > { %829 = vperm.xlu0 %1066, %v1087_v61  }
 0x2bd   : > { %v1089_v62 = vpop.eup %1088 }
 0x2be   : > { %834 = vperm.xlu1 %1067, %v1089_v62  }
 0x2c1   : > { %v1091_v63 = vpop.eup %1090 }
 0x2c2   : > { %839 = vperm.xlu0 %1066, %v1091_v63  }
 0x2e7   : > { %v651_v6 = vpop.f32.mrb[8].mxu0 }
 0x2e8   : > { %v795_v7 = vadd.f32 %v651_v6, %v598_v3  ;;  %v1017_v8 = vpop.f32.mrb[9].mxu0 }
 0x2e9   : > { %v654_v10 = vpop.f32.mrb[10].mxu0 }
 0x2ea   : > { %799 = vst.msk [vmem:[#allocation4] sm:$0xff] %vm266_vm0, %v795_v7  ;;  %v1018_v12 = vpop.f32.mrb[11].mxu0 }
 0x2eb   : > { %v697_v14 = vpop.f32.mrb[8].mxu1 }
 0x2ec   : > { %v796_v15 = vadd.f32 %v697_v14, %v599_v11  ;;  %v1023_v16 = vpop.f32.mrb[9].mxu1 }
 0x2ed   : > { %v700_v17 = vpop.f32.mrb[10].mxu1 }
 0x2ee   : > { %800 = vst.msk [vmem:[#allocation4 + $0x8] sm:$0xff] %vm266_vm0, %v796_v15  ;;  %v1024_v19 = vpop.f32.mrb[11].mxu1 }
 0x2ef   : > { %v743_v22 = vpop.f32.mrb[12].mxu0 }
 0x2f0   : > { %v797_v23 = vadd.f32 %v743_v22, %v600_v18  ;;  %v1029_v24 = vpop.f32.mrb[13].mxu0 }
 0x2f1   : > { %v746_v25 = vpop.f32.mrb[14].mxu0  ;;  %v810_v0 = vld [vmem:[#allocation4] sm:$0xff] }
 0x2f2   : > { %801 = vst.msk [vmem:[#allocation4 + $0x10] sm:$0xff] %vm266_vm0, %v797_v23  ;;  %v1030_v27 = vpop.f32.mrb[15].mxu0 }
 0x2f3   : > { %v789_v28 = vpop.f32.mrb[12].mxu1 }
 0x2f4   : > { %v798_v29 = vadd.f32 %v789_v28, %v601_v26  ;;  %v1035_v30 = vpop.f32.mrb[13].mxu1 }
 0x2f5   : > { %v792_v31 = vpop.f32.mrb[14].mxu1  ;;  %v811_v36 = vld [vmem:[#allocation4 + $0x8] sm:$0xff] }
 0x2f6   : > { %802 = vst.msk [vmem:[#allocation4 + $0x18] sm:$0xff] %vm266_vm0, %v798_v29  ;;  %v1036_v32 = vpop.f32.mrb[15].mxu1 }
 0x2f9   : > { %v812_v41 = vld [vmem:[#allocation4 + $0x10] sm:$0xff] }
 0x2fd   : > { %v813_v45 = vld [vmem:[#allocation4 + $0x18] sm:$0xff] }
 0x335   : > { %v825_v33 = vpop.permute.xlu1 %824 }
 0x336   : > { %v842_v34 = vmul.f32 %v825_v33, %v810_v0 }
 0x338   : > { %v846_v35 = vpack.c.bf16 %v842_v34, %v842_v34 }
 0x339   : > { %v830_v37 = vpop.permute.xlu0 %829 }
 0x33a   : > { %851 = vst.msk [vmem:[%s250_s29] sm:$0xf] %vm850_vm5, %v846_v35  ;;  %v843_v38 = vmul.f32 %v830_v37, %v811_v36 }
 0x33c   : > { %v847_v39 = vpack.c.bf16 %v843_v38, %v843_v38 }
 0x33d   : > { %v835_v40 = vpop.permute.xlu1 %834 }
 0x33e   : > { %852 = vst.msk [vmem:[%s250_s29 + $0x4] sm:$0xf] %vm850_vm5, %v847_v39  ;;  %v844_v42 = vmul.f32 %v835_v40, %v812_v41 }
 0x340   : > { %v848_v43 = vpack.c.bf16 %v844_v42, %v844_v42 }
 0x341   : > { %v840_v44 = vpop.permute.xlu0 %839 }
 0x342   : > { %853 = vst.msk [vmem:[%s250_s29 + $0x8] sm:$0xf] %vm850_vm5, %v848_v43  ;;  %v845_v46 = vmul.f32 %v840_v44, %v813_v45 }
 0x344   : > { %v849_v47 = vpack.c.bf16 %v845_v46, %v845_v46 }
 0x346   : > { %854 = vst.msk [vmem:[%s250_s29 + $0xc] sm:$0xf] %vm850_vm5, %v849_v47 }
 0x347 PF: > { %s13_s14 = sadd.s32 1, %s1114_s14   ;;  %s1323_s12 = smov %s1110_s13 }
 0x348   : > { %p10_p5 = scmp.ge.s32.totalorder %s13_s14, 4   ;;  %s1324_s13 = smov %s1326_s15 }
 0x34a   :  { %12 = sbr.rel (!%p10_p5) target bundleno = 2 (0x2), region = 76 }

// kernel: transformer_forward.20
= control target key start
LH: loop header
LB: loop body
LE: loop exit
PB: predicated region body
PF: predicated region fallthrough
CT: control target
= control target key end

     0   :  { %vm19_vm0 = vcmask 523264   ;;  %v151_v0 = vmov 0.0   ;;  %vm152_vm1 = vmmov 0   ;;  %vm47_vm2 = vcmask 261120   ;;  %s195_s1 = inlined_call_operand.vmem [shape: bf16[32,64], index: 1, kind: input, shape index: {}]   ;;  %s196_s0 = inlined_call_operand.vmem [shape: bf16[16,32], index: 0, kind: input, shape index: {}]   ;;  %s197_s2 = inlined_call_operand.vmem [shape: f32[1,64], index: 2, kind: input, shape index: {}]   ;;  %s198_s3 = inlined_call_operand.vmem [shape: bf16[16,64], index: 3, kind: output, shape index: {}]  }
   0x1   :  { %138 = vmatprep.subr.bf16.mxu0 %v151_v0  ;;  %v148_v1 = vld [vmem:[%s195_s1] sm:$0xff]   ;;  %142 = vmatprep.mubr.msk.bf16.mxu0 %vm152_vm1, %v151_v0  ;;  %20 = vst.msk [vmem:[#allocation2] sm:$0xff] %vm19_vm0, %v151_v0  ;;  %21 = vst.msk [vmem:[#allocation2 + $0x8] sm:$0xff] %vm19_vm0, %v151_v0  ;;  %v149_v2 = vld [vmem:[%s195_s1 + $0x8] sm:$0xff]   ;;  %vm119_vm3 = vcmask 519168  }
   0x2   :  { %139 = vmatpush3.bf16.msra.mxu0 %v148_v1  ;;  %v150_v3 = vld [vmem:[%s196_s0] sm:$0xff]  }
   0x3   :  { %140 = vmatprep.subr.bf16.mxu0 %v151_v0  ;;  %v130_v12 = vld [vmem:[%s197_s2] ss:$0 sm:$0xff] }
   0x6   :  { %141 = vmatpush3.bf16.msra.mxu0 %v149_v2 }
   0x8   :  { %v24_v4 = vld [vmem:[#allocation2] sm:$0xff]  ;;  %v25_v6 = vld [vmem:[#allocation2 + $0x8] sm:$0xff] }
   0x9   :  { %143 = vmatmul.mubr.msk.bf16.vlgmr.msra.gmra.mrb[0].mxu0 %vm47_vm2, %v150_v3 }
  0xdc   :  { %v85_v5 = vpop.f32.mrb[0].mxu0 }
  0xdd   :  { %v92_v7 = vadd.f32 %v85_v5, %v24_v4  ;;  %v144_v8 = vpop.f32.mrb[1].mxu0 }
  0xde   :  { %v88_v9 = vpop.f32.mrb[2].mxu0 }
  0xdf   :  { %95 = vst.msk [vmem:[#allocation2] sm:$0xff] %vm19_vm0, %v92_v7  ;;  %v93_v10 = vadd.f32 %v88_v9, %v25_v6  ;;  %v145_v11 = vpop.f32.mrb[3].mxu0 }
  0xe1   :  { %96 = vst.msk [vmem:[#allocation2 + $0x8] sm:$0xff] %vm19_vm0, %v93_v10 }
  0xe6   :  { %v100_v13 = vld [vmem:[#allocation2] sm:$0xff] }
  0xe7   :  { %v109_v14 = vadd.f32 %v130_v12, %v100_v13 }
  0xe8   :  { %v101_v15 = vld [vmem:[#allocation2 + $0x8] sm:$0xff] }
  0xe9   :  { %v133_v16 = vpack.c.bf16 %v109_v14, %v109_v14  ;;  %v110_v17 = vadd.f32 %v130_v12, %v101_v15 }
  0xeb   :  { %120 = vst.msk [vmem:[%s198_s3] sm:$0xf] %vm119_vm3, %v133_v16  ;;  %v134_v18 = vpack.c.bf16 %v110_v17, %v110_v17 }
  0xed   :  { %121 = vst.msk [vmem:[%s198_s3 + $0x4] sm:$0xf] %vm119_vm3, %v134_v18 }

// kernel: transformer_forward.23
= control target key start
LH: loop header
LB: loop body
LE: loop exit
PB: predicated region body
PF: predicated region fallthrough
CT: control target
= control target key end

     0   :  { %vm31_vm0 = vcmask 261120   ;;  %v339_v16 = vmov 0.0   ;;  %vm340_vm1 = vmmov 0   ;;  %vm191_vm2 = vcmask 523264   ;;  %s440_s0 = inlined_call_operand.vmem [shape: bf16[16,32], index: 0, kind: input, shape index: {}]   ;;  %s441_s1 = inlined_call_operand.vmem [shape: bf16[32,64], index: 1, kind: input, shape index: {}]   ;;  %s442_s3 = inlined_call_operand.vmem [shape: bf16[64,32], index: 3, kind: input, shape index: {}]   ;;  %s443_s5 = inlined_call_operand.vmem [shape: f32[1,32], index: 5, kind: input, shape index: {}]   ;;  %s444_s6 = inlined_call_operand.vmem [shape: f32[1,32], index: 6, kind: input, shape index: {}]   ;;  %s445_s2 = inlined_call_operand.vmem [shape: f32[1,64], index: 2, kind: input, shape index: {}]   ;;  %s446_s4 = inlined_call_operand.vmem [shape: f32[1,32], index: 4, kind: input, shape index: {}]   ;;  %s447_s7 = inlined_call_operand.vmem [shape: bf16[16,32], index: 7, kind: output, shape index: {}]  }
   0x1   :  { %v292_v0 = vld [vmem:[%s440_s0] sm:$0xff]   ;;  %307 = vmatprep.subr.bf16.mxu0 %v339_v16  ;;  %32 = vst.msk [vmem:[#allocation2] sm:$0xff] %vm31_vm0, %v339_v16  ;;  %33 = vst.msk [vmem:[#allocation2 + $0x8] sm:$0xff] %vm31_vm0, %v339_v16  ;;  %315 = vmatprep.subr.bf16.mxu1 %v339_v16  ;;  %v330_v17 = vld [vmem:[%s441_s1 + $0x8] sm:$0xff]   ;;  %vm268_vm3 = vcmask 257024  }
   0x2   :  { %v384_v1 = vunpack.c.l.bf16 %v292_v0  ;;  %v386_v2 = vunpack.c.h.bf16 %v292_v0  ;;  %v329_v15 = vld [vmem:[%s441_s1] sm:$0xff]   ;;  %311 = vmatprep.mubr.msk.bf16.mxu0 %vm340_vm1, %v339_v16  ;;  %323 = vmatprep.mubr.msk.bf16.mxu1 %vm340_vm1, %v339_v16  ;;  %v332_v19 = vld [vmem:[%s442_s3 + $0x8] sm:$0xff]   ;;  %v333_v38 = vld [vmem:[%s442_s3 + $0x10] sm:$0xff]  }
   0x3   :  { %308 = vmatpush3.bf16.msra.mxu0 %v329_v15  ;;  %v331_v18 = vld [vmem:[%s442_s3] sm:$0xff]   ;;  %v334_v39 = vld [vmem:[%s442_s3 + $0x18] sm:$0xff]  }
   0x4   :  { %v38_v3 = vsel %vm31_vm0, %v384_v1, 0.0  ;;  %v41_v4 = vsel %vm31_vm0, %v386_v2, 0.0  ;;  %309 = vmatprep.subr.bf16.mxu0 %v339_v16  ;;  %316 = vmatpush3.bf16.msra.mxu1 %v331_v18  ;;  %v275_v28 = vld [vmem:[%s443_s5] ss:$0 sm:$0xff] }
   0x5   :  { %39 = vadd.xlane.f32.xlu0 %v38_v3  ;;  %317 = vmatprep.subr.bf16.mxu1 %v339_v16  ;;  %v276_v32 = vld [vmem:[%s444_s6] ss:$0 sm:$0xff] }
   0x6   :  { %v277_v40 = vld [vmem:[%s445_s2] ss:$0 sm:$0xff] }
   0x7   :  { %310 = vmatpush3.bf16.msra.mxu0 %v330_v17  ;;  %v286_v58 = vld [vmem:[%s446_s4] ss:$0 sm:$0xff] }
   0x8   :  { %318 = vmatpush3.bf16.msra.mxu1 %v332_v19  ;;  %v156_v50 = vld [vmem:[#allocation2] sm:$0xff]  ;;  %v157_v52 = vld [vmem:[#allocation2 + $0x8] sm:$0xff] }
   0x9   :  { %42 = vadd.xlane.f32.xlu0 %v41_v4  ;;  %319 = vmatprep.subr.bf16.mxu1 %v339_v16 }
   0xc   :  { %320 = vmatpush3.bf16.msra.mxu1 %v333_v38 }
   0xd   :  { %321 = vmatprep.subr.bf16.mxu1 %v339_v16 }
  0x10   :  { %322 = vmatpush3.bf16.msra.mxu1 %v334_v39 }
  0x92   :  { %v40_v5 = vpop.xlane.xlu0 %39 }
  0x93   :  { %v45_v6 = vmul.f32 0.03125, %v40_v5 }
  0x95   :  { %v47_v7 = vsub.f32 %v384_v1, %v45_v6 }
  0x96   :  { %v43_v8 = vpop.xlane.xlu0 %42 }
  0x97   :  { %v46_v9 = vmul.f32 0.03125, %v43_v8  ;;  %v49_v10 = vmul.f32 %v47_v7, %v47_v7 }
  0x99   :  { %v48_v11 = vsub.f32 %v386_v2, %v46_v9  ;;  %v51_v12 = vsel %vm31_vm0, %v49_v10, 0.0 }
  0x9a   :  { %52 = vadd.xlane.f32.xlu1 %v51_v12 }
  0x9b   :  { %v50_v13 = vmul.f32 %v48_v11, %v48_v11 }
  0x9d   :  { %v54_v14 = vsel %vm31_vm0, %v50_v13, 0.0 }
  0x9e   :  { %55 = vadd.xlane.f32.xlu1 %v54_v14 }
 0x127   :  { %v53_v20 = vpop.xlane.xlu1 %52 }
 0x128   :  { %v57_v21 = vmul.f32 0.03125, %v53_v20 }
 0x12a   :  { %v59_v22 = vadd.f32 1e-05, %v57_v21 }
 0x12b   :  { %v56_v23 = vpop.xlane.xlu1 %55 }
 0x12c   :  { %335 = vrsqrt.f32 %v59_v22  ;;  %v58_v24 = vmul.f32 0.03125, %v56_v23 }
 0x12e   :  { %v60_v25 = vadd.f32 1e-05, %v58_v24 }
 0x130   :  { %337 = vrsqrt.f32 %v60_v25 }
 0x136   :  { %v336_v26 = vpop.eup %335 }
 0x137   :  { %v63_v27 = vmul.f32 %v336_v26, %v47_v7 }
 0x139   :  { %v72_v30 = vmul.f32 %v275_v28, %v63_v27 }
 0x13a   :  { %v338_v29 = vpop.eup %337 }
 0x13b   :  { %v64_v31 = vmul.f32 %v338_v29, %v48_v11  ;;  %v81_v34 = vadd.f32 %v276_v32, %v72_v30 }
 0x13d   :  { %v73_v33 = vmul.f32 %v275_v28, %v64_v31 }
 0x13f   :  { %v82_v35 = vadd.f32 %v276_v32, %v73_v33 }
 0x141   :  { %v83_v36 = vpack.c.bf16 %v82_v35, %v81_v34 }
 0x143   :  { %84 = vst.msk [vmem:[#allocation3] sm:$0xff] %vm31_vm0, %v83_v36 }
 0x14a   :  { %v85_v37 = vld [vmem:[#allocation3] sm:$0xff] }
 0x14b   :  { %312 = vmatmul.mubr.msk.bf16.vlgmr.msra.gmra.mrb[0].mxu0 %vm31_vm0, %v85_v37 }
 0x21e   :  { %v147_v41 = vpop.f32.mrb[0].mxu0 }
 0x21f   :  { %v148_v42 = vadd.f32 %v277_v40, %v147_v41  ;;  %v313_v43 = vpop.f32.mrb[1].mxu0 }
 0x220   :  { %v150_v44 = vpop.f32.mrb[2].mxu0 }
 0x221   :  { %v151_v45 = vadd.f32 %v277_v40, %v150_v44  ;;  %v314_v46 = vpop.f32.mrb[3].mxu0  ;;  %v154_v47 = vmax.f32 %v148_v42, 0.0 }
 0x223   :  { %v155_v48 = vmax.f32 %v151_v45, 0.0 }
 0x225   :  { %v158_v49 = vpack.c.bf16 %v155_v48, %v154_v47 }
 0x227   :  { %324 = vmatmul.mubr.msk.bf16.vlgmr.msra.gmra.mrb[0].mxu1 %vm191_vm2, %v158_v49 }
 0x2fa   :  { %v229_v51 = vpop.f32.mrb[0].mxu1 }
 0x2fb   :  { %v236_v53 = vadd.f32 %v229_v51, %v156_v50  ;;  %v325_v54 = vpop.f32.mrb[1].mxu1 }
 0x2fc   :  { %v232_v55 = vpop.f32.mrb[2].mxu1 }
 0x2fd   :  { %238 = vst.msk [vmem:[#allocation2] sm:$0xff] %vm31_vm0, %v236_v53  ;;  %v237_v56 = vadd.f32 %v232_v55, %v157_v52  ;;  %v326_v57 = vpop.f32.mrb[3].mxu1 }
 0x2ff   :  { %239 = vst.msk [vmem:[#allocation2 + $0x8] sm:$0xff] %vm31_vm0, %v237_v56 }
 0x304   :  { %v243_v59 = vld [vmem:[#allocation2] sm:$0xff] }
 0x305   :  { %v252_v60 = vadd.f32 %v286_v58, %v243_v59 }
 0x306   :  { %v244_v61 = vld [vmem:[#allocation2 + $0x8] sm:$0xff] }
 0x307   :  { %v258_v62 = vadd.f32 %v384_v1, %v252_v60  ;;  %v253_v63 = vadd.f32 %v286_v58, %v244_v61 }
 0x309   :  { %v289_v0 = vpack.c.bf16 %v258_v62, %v258_v62  ;;  %v259_v3 = vadd.f32 %v386_v2, %v253_v63 }
 0x30b   :  { %269 = vst.msk [vmem:[%s447_s7] sm:$0xf] %vm268_vm3, %v289_v0  ;;  %v290_v4 = vpack.c.bf16 %v259_v3, %v259_v3 }
 0x30d   :  { %270 = vst.msk [vmem:[%s447_s7 + $0x4] sm:$0xf] %vm268_vm3, %v290_v4 }

// kernel: transformer_forward.21
= control target key start
LH: loop header
LB: loop body
LE: loop exit
PB: predicated region body
PF: predicated region fallthrough
CT: control target
= control target key end

     0   :  { %s1196_s15 = smov 0   ;;  %s1198_s16 = smov 0   ;;  %s1377_s0 = inlined_call_operand.vmem [shape: bf16[8,8,8], index: 0, kind: input, shape index: {}]   ;;  %s1378_s1 = inlined_call_operand.vmem [shape: bf16[8,8,8], index: 1, kind: input, shape index: {}]   ;;  %s1379_s2 = inlined_call_operand.vmem [shape: bf16[8,8,8], index: 2, kind: input, shape index: {}]   ;;  %s1380_s3 = inlined_call_operand.vmem [shape: f32[8,8], index: 3, kind: input, shape index: {}]   ;;  %s1381_s4 = inlined_call_operand.vmem [shape: bf16[8,8,8], index: 4, kind: output, shape index: {}]  }
   0x1   :  { %s1200_s17 = smov 0  }
   0x2 LB: > { %s26_s18 = sadd.s32 1, %s1161_s16  ;;  %p1006_p0 = scmp.ge.s32.totalorder %s1165_s17, 1  ;;  %s1165_s17 = sphi %s1200_s17, %s14_s17   ;;  %s1161_s16 = sphi %s1198_s16, %s1383_s16   ;;  %s1157_s15 = sphi %s1196_s15, %s1382_s15  }
   0x3   : > { %p28_p1 = scmp.ge.s32.totalorder %s26_s18, 2  ;;  %p216_p2 = scmp.lt.s32.totalorder %s1165_s17, 3 }
   0x5   : > { %s1385_s18 = smov (%p28_p1, %s26_s18), 0  ;;  %p217_p3 = pnand %p1006_p0, %p216_p2 }
   0x6   : > { %s1007_s19 = sshll.u32 (!%p217_p3), %s1157_s15, 2  ;;  %vm310_vm0 = vcmask (!%p217_p3), 64512   ;;  %v1167_v0 = vmov (!%p217_p3), 0.0   ;;  %vm1168_vm1 = vmmov (!%p217_p3), 0   ;;  %vm301_vm2 = vcmask (!%p217_p3), 7168   ;;  %v512_v16 = vld [vmem:[%s1380_s3] sm:$0xff] (!%p217_p3) }
   0x7   : > { %220 = sbr.rel (%p217_p3) target bundleno = 839 (0x347), region = 36  ;;  %1041 = vmatprep.subr.bf16.mxu0 (!%p217_p3), %v1167_v0  ;;  %p263_p4 = scmp.lt.s32.totalorder (!%p217_p3), %s1007_s19, 7  ;;  %311 = vst.msk [vmem:[#allocation4] sm:$0xff] (!%p217_p3), %vm310_vm0, %v1167_v0  ;;  %312 = vst.msk [vmem:[#allocation4 + $0x8] sm:$0xff] (!%p217_p3), %vm310_vm0, %v1167_v0  ;;  %1047 = vmatprep.subr.bf16.mxu1 (!%p217_p3), %v1167_v0  ;;  %v1169_v13 = vmov (!%p217_p3), -1e+30  }
   0x8   : > { %313 = vst.msk [vmem:[#allocation4 + $0x10] sm:$0xff] (!%p217_p3), %vm310_vm0, %v1167_v0  ;;  %314 = vst.msk [vmem:[#allocation4 + $0x18] sm:$0xff] (!%p217_p3), %vm310_vm0, %v1167_v0  ;;  %1043 = vmatprep.mubr.msk.bf16.mxu0 (!%p217_p3), %vm1168_vm1, %v1167_v0  ;;  %1049 = vmatprep.mubr.msk.bf16.mxu1 (!%p217_p3), %vm1168_vm1, %v1167_v0  ;;  %v1170_v43 = vmov (!%p217_p3), 0   ;;  %vm649_vm3 = vcmask (!%p217_p3), 1043456   ;;  %vm886_vm4 = vcmask (!%p217_p3), 60416  }
   0x9   : > { %302 = vst.msk [vmem:[#allocation2] sm:$0xff] (!%p217_p3), %vm301_vm2, %v1169_v13  ;;  %303 = vst.msk [vmem:[#allocation2 + $0x8] sm:$0xff] (!%p217_p3), %vm301_vm2, %v1169_v13  ;;  %1117 = vset.pattern.permute.xlu0 (!%p217_p3), %v1170_v43  ;;  %1118 = vset.pattern.permute.xlu1 (!%p217_p3), %v1170_v43 }
   0xa   : > { %304 = vst.msk [vmem:[#allocation2 + $0x10] sm:$0xff] (!%p217_p3), %vm301_vm2, %v1169_v13  ;;  %305 = vst.msk [vmem:[#allocation2 + $0x18] sm:$0xff] (!%p217_p3), %vm301_vm2, %v1169_v13 }
   0xb   : > { %306 = vst.msk [vmem:[#allocation3] sm:$0xff] (!%p217_p3), %vm301_vm2, %v1167_v0  ;;  %307 = vst.msk [vmem:[#allocation3 + $0x8] sm:$0xff] (!%p217_p3), %vm301_vm2, %v1167_v0 }
   0xc   : > { %308 = vst.msk [vmem:[#allocation3 + $0x10] sm:$0xff] (!%p217_p3), %vm301_vm2, %v1167_v0  ;;  %309 = vst.msk [vmem:[#allocation3 + $0x18] sm:$0xff] (!%p217_p3), %vm301_vm2, %v1167_v0 }
   0xe   : > { %s1387_s19 = smov (!%p263_p4, %s1007_s19), 7 }
   0xf   : > { %s1228_s20 = sshll.u32 %s1387_s19, 2 }
  0x10   : > { %s275_s23 = scalar_lea.vmem %s1378_s1, %s1228_s20  ;;  %s266_s26 = scalar_lea.vmem %s1377_s0, %s1228_s20  ;;  %v1283_v44 = vld [vmem:[#allocation2] sm:$0xff]  ;;  %v1288_v47 = vld [vmem:[#allocation2 + $0x8] sm:$0xff] }
  0x11   : > { %v319_v1 = vld [vmem:[%s275_s23] sm:$0xf]  ;;  %v320_v2 = vld [vmem:[%s275_s23 + $0x4] sm:$0xf]  ;;  %v321_v5 = vld [vmem:[%s275_s23 + $0x8] sm:$0xf]  ;;  %s284_s5 = scalar_lea.vmem %s1379_s2, %s1228_s20  ;;  %s294_s8 = scalar_lea.vmem %s1381_s4, %s1228_s20 }
  0x12   : > { %v328_v3 = vsel %vm310_vm0, %v319_v1, 0  ;;  %v374_v4 = vsel %vm310_vm0, %v320_v2, 0  ;;  %v322_v6 = vld [vmem:[%s275_s23 + $0xc] sm:$0xf]  ;;  %v315_v7 = vld [vmem:[%s266_s26] sm:$0xf] }
  0x13   : > { %1042 = vmatpush3.bf16.xpose.msra.mxu0 %v328_v3  ;;  %1048 = vmatpush3.bf16.xpose.msra.mxu1 %v374_v4  ;;  %v316_v8 = vld [vmem:[%s266_s26 + $0x4] sm:$0xf]  ;;  %v420_v9 = vsel %vm310_vm0, %v321_v5, 0  ;;  %v466_v10 = vsel %vm310_vm0, %v322_v6, 0  ;;  %v317_v11 = vld [vmem:[%s266_s26 + $0x8] sm:$0xf] }
  0x14   : > { %1053 = vmatprep.subr.bf16.mxu0 %v1167_v0  ;;  %1059 = vmatprep.subr.bf16.mxu1 %v1167_v0  ;;  %v318_v12 = vld [vmem:[%s266_s26 + $0xc] sm:$0xf]  ;;  %v1298_v51 = vld [vmem:[#allocation2 + $0x10] sm:$0xff]  ;;  %v1308_v55 = vld [vmem:[#allocation2 + $0x18] sm:$0xff] }
  0x15   : > { %v642_v60 = vld [vmem:[%s284_s5] sm:$0xf]  ;;  %v643_v62 = vld [vmem:[%s284_s5 + $0x4] sm:$0xf]  ;;  %v644_v1 = vld [vmem:[%s284_s5 + $0x8] sm:$0xf] }
  0x16   : > { %v651_v61 = vsel %vm649_vm3, %v642_v60, 0  ;;  %v697_v63 = vsel %vm649_vm3, %v643_v62, 0  ;;  %v743_v2 = vsel %vm649_vm3, %v644_v1, 0  ;;  %v645_v3 = vld [vmem:[%s284_s5 + $0xc] sm:$0xf]  ;;  %v583_v43 = vld [vmem:[#allocation3 + $0x10] sm:$0xff] }
  0x17   : > { %v789_v4 = vsel %vm649_vm3, %v645_v3, 0  ;;  %v610_v60 = vld [vmem:[#allocation4] sm:$0xff] }
  0x1a   : > { %1044 = vmatmul.mubr.msk.bf16.vlgmr.msra.gmra.mrb[0].mxu0 %vm310_vm0, %v315_v7  ;;  %1050 = vmatmul.mubr.msk.bf16.vlgmr.msra.gmra.mrb[0].mxu1 %vm310_vm0, %v316_v8 }
  0x1b   : > { %1054 = vmatpush3.bf16.xpose.msra.mxu0 %v420_v9  ;;  %1060 = vmatpush3.bf16.xpose.msra.mxu1 %v466_v10 }
  0x1c   : > { %1055 = vmatprep.mubr.msk.bf16.mxu0 %vm1168_vm1, %v1167_v0  ;;  %1061 = vmatprep.mubr.msk.bf16.mxu1 %vm1168_vm1, %v1167_v0 }
  0x1d   : > { %1065 = vmatprep.subr.bf16.mxu0 %v1167_v0  ;;  %1071 = vmatprep.subr.bf16.mxu1 %v1167_v0 }
  0x22   : > { %1056 = vmatmul.mubr.msk.bf16.vlgmr.msra.gmra.mrb[4].mxu0 %vm310_vm0, %v317_v11  ;;  %1062 = vmatmul.mubr.msk.bf16.vlgmr.msra.gmra.mrb[4].mxu1 %vm310_vm0, %v318_v12 }
  0x23   : > { %1067 = vmatprep.mubr.msk.bf16.mxu0 %vm1168_vm1, %v1167_v0  ;;  %1073 = vmatprep.mubr.msk.bf16.mxu1 %vm1168_vm1, %v1167_v0 }
  0x24   : > { %1066 = vmatpush3.bf16.msra.mxu0 %v651_v61  ;;  %1072 = vmatpush3.bf16.msra.mxu1 %v697_v63  ;;  %v611_v63 = vld [vmem:[#allocation4 + $0x8] sm:$0xff] }
  0x25   : > { %1077 = vmatprep.subr.bf16.mxu0 %v1167_v0  ;;  %1083 = vmatprep.subr.bf16.mxu1 %v1167_v0 }
  0xed   : > { %v364_v14 = vpop.f32.mrb[0].mxu0  ;;  %v410_v15 = vpop.f32.mrb[0].mxu1 }
  0xee   : > { %v508_v17 = vmul.f32 0.35355338, %v364_v14  ;;  %v1045_v18 = vpop.f32.mrb[1].mxu0  ;;  %v509_v19 = vmul.f32 0.35355338, %v410_v15  ;;  %v1051_v20 = vpop.f32.mrb[1].mxu1 }
  0xef   : > { %v367_v21 = vpop.f32.mrb[2].mxu0  ;;  %v413_v22 = vpop.f32.mrb[2].mxu1 }
  0xf0   : > { %v1046_v23 = vpop.f32.mrb[3].mxu0  ;;  %v1052_v24 = vpop.f32.mrb[3].mxu1  ;;  %v1273_v25 = vadd.f32 %v512_v16, %v508_v17  ;;  %v1275_v26 = vadd.f32 %v512_v16, %v509_v19 }
  0xf2   : > { %v521_v27 = vsel %vm310_vm0, %v1273_v25, -inf  ;;  %v524_v28 = vsel %vm310_vm0, %v1275_v26, -inf }
  0xf3   : > { %522 = vmax.xlane.f32.xlu0 %v521_v27 }
  0xf5   : > { %v456_v29 = vpop.f32.mrb[4].mxu0  ;;  %v502_v30 = vpop.f32.mrb[4].mxu1 }
  0xf6   : > { %v510_v31 = vmul.f32 0.35355338, %v456_v29  ;;  %v1057_v32 = vpop.f32.mrb[5].mxu0  ;;  %v511_v33 = vmul.f32 0.35355338, %v502_v30  ;;  %v1063_v34 = vpop.f32.mrb[5].mxu1 }
  0xf7   : > { %525 = vmax.xlane.f32.xlu0 %v524_v28  ;;  %v459_v35 = vpop.f32.mrb[6].mxu0  ;;  %v505_v36 = vpop.f32.mrb[6].mxu1 }
  0xf8   : > { %v1058_v37 = vpop.f32.mrb[7].mxu0  ;;  %v1064_v38 = vpop.f32.mrb[7].mxu1  ;;  %v515_v39 = vadd.f32 %v512_v16, %v510_v31  ;;  %v516_v40 = vadd.f32 %v512_v16, %v511_v33  ;;  %v581_v36 = vld [vmem:[#allocation3] sm:$0xff] }
  0xfa   : > { %v527_v41 = vsel %vm310_vm0, %v515_v39, -inf  ;;  %v530_v42 = vsel %vm310_vm0, %v516_v40, -inf }
  0xfb   : > { %528 = vmax.xlane.f32.xlu1 %v527_v41 }
  0xff   : > { %531 = vmax.xlane.f32.xlu1 %v530_v42 }
 0x180   : > { %v523_v45 = vpop.xlane.xlu0 %522 }
 0x181   : > { %v1286_v46 = vmax.f32 %v1283_v44, %v523_v45 }
 0x183   : > { %v537_v48 = vsub.f32 %v1283_v44, %v1286_v46  ;;  %839 = vst.msk [vmem:[#allocation2] sm:$0xff] %vm301_vm2, %v1286_v46  ;;  %551 = vperm.xlu0 %1117, %v1286_v46  }
 0x184   : > { %v526_v49 = vpop.xlane.xlu0 %525 }
 0x185   : > { %v1296_v50 = vmax.f32 %v1288_v47, %v526_v49 }
 0x187   : > { %v538_v52 = vsub.f32 %v1288_v47, %v1296_v50  ;;  %840 = vst.msk [vmem:[#allocation2 + $0x8] sm:$0xff] %vm301_vm2, %v1296_v50  ;;  %556 = vperm.xlu1 %1118, %v1296_v50   ;;  %v584_v47 = vld [vmem:[#allocation3 + $0x18] sm:$0xff] }
 0x188   : > { %v529_v53 = vpop.xlane.xlu1 %528 }
 0x189   : > { %v1306_v54 = vmax.f32 %v1298_v51, %v529_v53  ;;  %v543_v27 = vmul.f32 1.442695, %v538_v52 }
 0x18b   : > { %v539_v56 = vsub.f32 %v1298_v51, %v1306_v54  ;;  %841 = vst.msk [vmem:[#allocation2 + $0x10] sm:$0xff] %vm301_vm2, %v1306_v54  ;;  %561 = vperm.xlu1 %1118, %v1306_v54  }
 0x18c   : > { %v532_v57 = vpop.xlane.xlu1 %531 }
 0x18d   : > { %v1316_v58 = vmax.f32 %v1308_v55, %v532_v57  ;;  %v545_v30 = vmul.f32 1.442695, %v539_v56 }
 0x18f   : > { %v540_v59 = vsub.f32 %v1308_v55, %v1316_v58  ;;  %842 = vst.msk [vmem:[#allocation2 + $0x18] sm:$0xff] %vm301_vm2, %v1316_v58  ;;  %566 = vperm.xlu1 %1118, %v1316_v58  }
 0x191   : > { %v547_v31 = vmul.f32 1.442695, %v540_v59 }
 0x202   : > { %v552_v5 = vpop.permute.xlu0 %551 }
 0x203   : > { %v569_v6 = vsub.f32 %v1273_v25, %v552_v5 }
 0x205   : > { %v573_v7 = vmul.f32 1.442695, %v569_v6 }
 0x206   : > { %v557_v8 = vpop.permute.xlu1 %556 }
 0x207   : > { %1119 = vpow2.f32 %v573_v7  ;;  %v570_v9 = vsub.f32 %v1275_v26, %v557_v8 }
 0x209   : > { %v575_v10 = vmul.f32 1.442695, %v570_v9  ;;  %v612_v9 = vld [vmem:[#allocation4 + $0x10] sm:$0xff] }
 0x20a   : > { %v562_v11 = vpop.permute.xlu1 %561 }
 0x20b   : > { %1121 = vpow2.f32 %v575_v10  ;;  %v571_v12 = vsub.f32 %v515_v39, %v562_v11  ;;  %v582_v39 = vld [vmem:[#allocation3 + $0x8] sm:$0xff] }
 0x20d   : > { %v577_v13 = vmul.f32 1.442695, %v571_v12 }
 0x20e   : > { %v567_v14 = vpop.permute.xlu1 %566 }
 0x20f   : > { %1123 = vpow2.f32 %v577_v13  ;;  %v572_v15 = vsub.f32 %v516_v40, %v567_v14 }
 0x211   : > { %v1120_v16 = vpop.eup %1119  ;;  %v579_v17 = vmul.f32 1.442695, %v572_v15 }
 0x212   : > { %v589_v18 = vsel %vm310_vm0, %v1120_v16, 0.0  ;;  %v638_v19 = vpack.c.bf16 %v1120_v16, %v1120_v16  ;;  %v613_v16 = vld [vmem:[#allocation4 + $0x18] sm:$0xff] }
 0x213   : > { %1125 = vpow2.f32 %v579_v17  ;;  %590 = vadd.xlane.f32.xlu1 %v589_v18 }
 0x214   : > { %1068 = vmatmul.mubr.msk.bf16.vlgmr.msra.gmra.mrb[8].mxu0 %vm310_vm0, %v638_v19  ;;  %1127 = vpow2.f32 %v543_v27 }
 0x215   : > { %v1122_v20 = vpop.eup %1121  ;;  %1078 = vmatpush3.bf16.msra.mxu0 %v743_v2  ;;  %1079 = vmatprep.mubr.msk.bf16.mxu0 %vm1168_vm1, %v1167_v0 }
 0x216   : > { %v592_v21 = vsel %vm310_vm0, %v1122_v20, 0.0  ;;  %v639_v22 = vpack.c.bf16 %v1122_v20, %v1122_v20 }
 0x217   : > { %593 = vadd.xlane.f32.xlu0 %v592_v21 }
 0x218   : > { %1074 = vmatmul.mubr.msk.bf16.vlgmr.msra.gmra.mrb[8].mxu1 %vm310_vm0, %v639_v22 }
 0x219   : > { %v1124_v23 = vpop.eup %1123  ;;  %1084 = vmatpush3.bf16.msra.mxu1 %v789_v4  ;;  %1085 = vmatprep.mubr.msk.bf16.mxu1 %vm1168_vm1, %v1167_v0  ;;  %v541_v0 = vmul.f32 1.442695, %v537_v48 }
 0x21a   : > { %v595_v24 = vsel %vm310_vm0, %v1124_v23, 0.0  ;;  %v640_v25 = vpack.c.bf16 %v1124_v23, %v1124_v23 }
 0x21b   : > { %596 = vadd.xlane.f32.xlu1 %v595_v24  ;;  %1129 = vpow2.f32 %v541_v0 }
 0x21c   : > { %1080 = vmatmul.mubr.msk.bf16.vlgmr.msra.gmra.mrb[12].mxu0 %vm310_vm0, %v640_v25  ;;  %1131 = vpow2.f32 %v545_v30 }
 0x21d   : > { %v1126_v26 = vpop.eup %1125  ;;  %1133 = vpow2.f32 %v547_v31 }
 0x21e   : > { %v598_v28 = vsel %vm310_vm0, %v1126_v26, 0.0  ;;  %v641_v29 = vpack.c.bf16 %v1126_v26, %v1126_v26  ;;  %v1128_v32 = vpop.eup %1127 }
 0x21f   : > { %599 = vadd.xlane.f32.xlu1 %v598_v28  ;;  %v586_v41 = vmul.f32 %v1128_v32, %v582_v39 }
 0x220   : > { %1086 = vmatmul.mubr.msk.bf16.vlgmr.msra.gmra.mrb[12].mxu1 %vm310_vm0, %v641_v29 }
 0x225   : > { %v1130_v33 = vpop.eup %1129 }
 0x226   : > { %v1132_v34 = vpop.eup %1131  ;;  %v585_v37 = vmul.f32 %v1130_v33, %v581_v36 }
 0x227   : > { %v1134_v35 = vpop.eup %1133  ;;  %v587_v45 = vmul.f32 %v1132_v34, %v583_v43 }
 0x228   : > { %v588_v50 = vmul.f32 %v1134_v35, %v584_v47 }
 0x22d   : > { %621 = vperm.xlu0 %1117, %v1128_v32  }
 0x230   : > { %616 = vperm.xlu1 %1118, %v1130_v33  }
 0x234   : > { %626 = vperm.xlu1 %1118, %v1132_v34  }
 0x238   : > { %631 = vperm.xlu1 %1118, %v1134_v35  }
 0x2a0   : > { %v591_v38 = vpop.xlane.xlu1 %590 }
 0x2a1   : > { %v601_v40 = vadd.f32 %v591_v38, %v585_v37 }
 0x2a3   : > { %606 = vst.msk [vmem:[#allocation3] sm:$0xff] %vm301_vm2, %v601_v40 }
 0x2a4   : > { %v594_v42 = vpop.xlane.xlu0 %593 }
 0x2a5   : > { %v602_v44 = vadd.f32 %v594_v42, %v586_v41 }
 0x2a7   : > { %607 = vst.msk [vmem:[#allocation3 + $0x8] sm:$0xff] %vm301_vm2, %v602_v44 }
 0x2a8   : > { %v597_v46 = vpop.xlane.xlu1 %596 }
 0x2a9   : > { %v603_v48 = vadd.f32 %v597_v46, %v587_v45 }
 0x2aa   : > { %v850_v49 = vld [vmem:[#allocation3] sm:$0xff] }
 0x2ab   : > { %608 = vst.msk [vmem:[#allocation3 + $0x10] sm:$0xff] %vm301_vm2, %v603_v48  ;;  %1135 = vrcp.f32 %v850_v49 }
 0x2ac   : > { %v600_v51 = vpop.xlane.xlu1 %599  ;;  %v622_v1 = vpop.permute.xlu0 %621 }
 0x2ad   : > { %v604_v52 = vadd.f32 %v600_v51, %v588_v50  ;;  %v635_v7 = vmul.f32 %v622_v1, %v611_v63 }
 0x2ae   : > { %v851_v53 = vld [vmem:[#allocation3 + $0x8] sm:$0xff] }
 0x2af   : > { %609 = vst.msk [vmem:[#allocation3 + $0x18] sm:$0xff] %vm301_vm2, %v604_v52  ;;  %1137 = vrcp.f32 %v851_v53 }
 0x2b0   : > { %v617_v61 = vpop.permute.xlu1 %616 }
 0x2b1   : > { %v634_v62 = vmul.f32 %v617_v61, %v610_v60 }
 0x2b2   : > { %v852_v54 = vld [vmem:[#allocation3 + $0x10] sm:$0xff] }
 0x2b3   : > { %1139 = vrcp.f32 %v852_v54 }
 0x2b4   : > { %v627_v5 = vpop.permute.xlu1 %626 }
 0x2b5   : > { %v1136_v55 = vpop.eup %1135  ;;  %v636_v14 = vmul.f32 %v627_v5, %v612_v9 }
 0x2b6   : > { %860 = vperm.xlu1 %1118, %v1136_v55   ;;  %v853_v56 = vld [vmem:[#allocation3 + $0x18] sm:$0xff] }
 0x2b7   : > { %1141 = vrcp.f32 %v853_v56 }
 0x2b8   : > { %v632_v17 = vpop.permute.xlu1 %631 }
 0x2b9   : > { %v1138_v57 = vpop.eup %1137  ;;  %v637_v22 = vmul.f32 %v632_v17, %v613_v16 }
 0x2ba   : > { %865 = vperm.xlu0 %1117, %v1138_v57  }
 0x2bd   : > { %v1140_v58 = vpop.eup %1139 }
 0x2be   : > { %870 = vperm.xlu1 %1118, %v1140_v58  }
 0x2c1   : > { %v1142_v59 = vpop.eup %1141 }
 0x2c2   : > { %875 = vperm.xlu0 %1117, %v1142_v59  }
 0x2e7   : > { %v687_v2 = vpop.f32.mrb[8].mxu0 }
 0x2e8   : > { %v831_v3 = vadd.f32 %v687_v2, %v634_v62  ;;  %v1069_v4 = vpop.f32.mrb[9].mxu0 }
 0x2e9   : > { %v690_v6 = vpop.f32.mrb[10].mxu0 }
 0x2ea   : > { %835 = vst.msk [vmem:[#allocation4] sm:$0xff] %vm310_vm0, %v831_v3  ;;  %v1070_v8 = vpop.f32.mrb[11].mxu0 }
 0x2eb   : > { %v733_v10 = vpop.f32.mrb[8].mxu1 }
 0x2ec   : > { %v832_v11 = vadd.f32 %v733_v10, %v635_v7  ;;  %v1075_v12 = vpop.f32.mrb[9].mxu1 }
 0x2ed   : > { %v736_v13 = vpop.f32.mrb[10].mxu1 }
 0x2ee   : > { %836 = vst.msk [vmem:[#allocation4 + $0x8] sm:$0xff] %vm310_vm0, %v832_v11  ;;  %v1076_v15 = vpop.f32.mrb[11].mxu1 }
 0x2ef   : > { %v779_v18 = vpop.f32.mrb[12].mxu0 }
 0x2f0   : > { %v833_v19 = vadd.f32 %v779_v18, %v636_v14  ;;  %v1081_v20 = vpop.f32.mrb[13].mxu0 }
 0x2f1   : > { %v782_v21 = vpop.f32.mrb[14].mxu0  ;;  %v846_v0 = vld [vmem:[#allocation4] sm:$0xff] }
 0x2f2   : > { %837 = vst.msk [vmem:[#allocation4 + $0x10] sm:$0xff] %vm310_vm0, %v833_v19  ;;  %v1082_v23 = vpop.f32.mrb[15].mxu0 }
 0x2f3   : > { %v825_v24 = vpop.f32.mrb[12].mxu1 }
 0x2f4   : > { %v834_v25 = vadd.f32 %v825_v24, %v637_v22  ;;  %v1087_v26 = vpop.f32.mrb[13].mxu1 }
 0x2f5   : > { %v828_v27 = vpop.f32.mrb[14].mxu1  ;;  %v847_v32 = vld [vmem:[#allocation4 + $0x8] sm:$0xff] }
 0x2f6   : > { %838 = vst.msk [vmem:[#allocation4 + $0x18] sm:$0xff] %vm310_vm0, %v834_v25  ;;  %v1088_v28 = vpop.f32.mrb[15].mxu1 }
 0x2f9   : > { %v848_v37 = vld [vmem:[#allocation4 + $0x10] sm:$0xff] }
 0x2fd   : > { %v849_v41 = vld [vmem:[#allocation4 + $0x18] sm:$0xff] }
 0x335   : > { %v861_v29 = vpop.permute.xlu1 %860 }
 0x336   : > { %v878_v30 = vmul.f32 %v861_v29, %v846_v0 }
 0x338   : > { %v882_v31 = vpack.c.bf16 %v878_v30, %v878_v30 }
 0x339   : > { %v866_v33 = vpop.permute.xlu0 %865 }
 0x33a   : > { %887 = vst.msk [vmem:[%s294_s8] sm:$0xf] %vm886_vm4, %v882_v31  ;;  %v879_v34 = vmul.f32 %v866_v33, %v847_v32 }
 0x33c   : > { %v883_v35 = vpack.c.bf16 %v879_v34, %v879_v34 }
 0x33d   : > { %v871_v36 = vpop.permute.xlu1 %870 }
 0x33e   : > { %888 = vst.msk [vmem:[%s294_s8 + $0x4] sm:$0xf] %vm886_vm4, %v883_v35  ;;  %v880_v38 = vmul.f32 %v871_v36, %v848_v37 }
 0x340   : > { %v884_v39 = vpack.c.bf16 %v880_v38, %v880_v38 }
 0x341   : > { %v876_v40 = vpop.permute.xlu0 %875 }
 0x342   : > { %889 = vst.msk [vmem:[%s294_s8 + $0x8] sm:$0xf] %vm886_vm4, %v884_v39  ;;  %v881_v42 = vmul.f32 %v876_v40, %v849_v41 }
 0x344   : > { %v885_v43 = vpack.c.bf16 %v881_v42, %v881_v42 }
 0x346   : > { %890 = vst.msk [vmem:[%s294_s8 + $0xc] sm:$0xf] %vm886_vm4, %v885_v43 }
 0x347 PF: > { %s14_s17 = sadd.s32 1, %s1165_s17   ;;  %s1382_s15 = smov %s1161_s16 }
 0x348   : > { %p11_p5 = scmp.ge.s32.totalorder %s14_s17, 4   ;;  %s1383_s16 = smov %s1385_s18 }
 0x34a   :  { %13 = sbr.rel (!%p11_p5) target bundleno = 2 (0x2), region = 83 }

// kernel: transformer_forward.31
= control target key start
LH: loop header
LB: loop body
LE: loop exit
PB: predicated region body
PF: predicated region fallthrough
CT: control target
= control target key end

     0   :  { %vm37_vm0 = vcmask 261120   ;;  %v383_v16 = vmov 0.0   ;;  %vm384_vm1 = vmmov 0   ;;  %vm197_vm2 = vcmask 523264   ;;  %s506_s0 = inlined_call_operand.vmem [shape: bf16[16,32], index: 0, kind: input, shape index: {}]   ;;  %s507_s1 = inlined_call_operand.vmem [shape: bf16[32,64], index: 1, kind: input, shape index: {}]   ;;  %s508_s3 = inlined_call_operand.vmem [shape: bf16[64,32], index: 3, kind: input, shape index: {}]   ;;  %s509_s5 = inlined_call_operand.vmem [shape: f32[1,32], index: 5, kind: input, shape index: {}]   ;;  %s510_s6 = inlined_call_operand.vmem [shape: f32[1,32], index: 6, kind: input, shape index: {}]   ;;  %s511_s2 = inlined_call_operand.vmem [shape: f32[1,64], index: 2, kind: input, shape index: {}]   ;;  %s512_s4 = inlined_call_operand.vmem [shape: f32[1,32], index: 4, kind: input, shape index: {}]   ;;  %s513_s7 = inlined_call_operand.vmem [shape: f32[1,32], index: 7, kind: input, shape index: {}]   ;;  %s514_s8 = inlined_call_operand.vmem [shape: f32[1,32], index: 8, kind: input, shape index: {}]   ;;  %s515_s9 = inlined_call_operand.vmem [shape: f32[16,32], index: 9, kind: output, shape index: {}]  }
   0x1   :  { %v332_v0 = vld [vmem:[%s506_s0] sm:$0xff]   ;;  %347 = vmatprep.subr.bf16.mxu0 %v383_v16  ;;  %38 = vst.msk [vmem:[#allocation2] sm:$0xff] %vm37_vm0, %v383_v16  ;;  %39 = vst.msk [vmem:[#allocation2 + $0x8] sm:$0xff] %vm37_vm0, %v383_v16  ;;  %355 = vmatprep.subr.bf16.mxu1 %v383_v16  ;;  %v370_v17 = vld [vmem:[%s507_s1 + $0x8] sm:$0xff]  }
   0x2   :  { %v438_v1 = vunpack.c.l.bf16 %v332_v0  ;;  %v440_v2 = vunpack.c.h.bf16 %v332_v0  ;;  %v369_v15 = vld [vmem:[%s507_s1] sm:$0xff]   ;;  %351 = vmatprep.mubr.msk.bf16.mxu0 %vm384_vm1, %v383_v16  ;;  %363 = vmatprep.mubr.msk.bf16.mxu1 %vm384_vm1, %v383_v16  ;;  %v372_v19 = vld [vmem:[%s508_s3 + $0x8] sm:$0xff]   ;;  %v373_v38 = vld [vmem:[%s508_s3 + $0x10] sm:$0xff]  }
   0x3   :  { %348 = vmatpush3.bf16.msra.mxu0 %v369_v15  ;;  %v371_v18 = vld [vmem:[%s508_s3] sm:$0xff]   ;;  %v374_v39 = vld [vmem:[%s508_s3 + $0x18] sm:$0xff]  }
   0x4   :  { %v44_v3 = vsel %vm37_vm0, %v438_v1, 0.0  ;;  %v47_v4 = vsel %vm37_vm0, %v440_v2, 0.0  ;;  %349 = vmatprep.subr.bf16.mxu0 %v383_v16  ;;  %356 = vmatpush3.bf16.msra.mxu1 %v371_v18  ;;  %v317_v28 = vld [vmem:[%s509_s5] ss:$0 sm:$0xff] }
   0x5   :  { %45 = vadd.xlane.f32.xlu0 %v44_v3  ;;  %357 = vmatprep.subr.bf16.mxu1 %v383_v16  ;;  %v318_v32 = vld [vmem:[%s510_s6] ss:$0 sm:$0xff] }
   0x6   :  { %v319_v40 = vld [vmem:[%s511_s2] ss:$0 sm:$0xff] }
   0x7   :  { %350 = vmatpush3.bf16.msra.mxu0 %v370_v17  ;;  %v328_v58 = vld [vmem:[%s512_s4] ss:$0 sm:$0xff] }
   0x8   :  { %358 = vmatpush3.bf16.msra.mxu1 %v372_v19  ;;  %v162_v50 = vld [vmem:[#allocation2] sm:$0xff]  ;;  %v163_v52 = vld [vmem:[#allocation2 + $0x8] sm:$0xff] }
   0x9   :  { %48 = vadd.xlane.f32.xlu0 %v47_v4  ;;  %359 = vmatprep.subr.bf16.mxu1 %v383_v16 }
   0xc   :  { %360 = vmatpush3.bf16.msra.mxu1 %v373_v38 }
   0xd   :  { %361 = vmatprep.subr.bf16.mxu1 %v383_v16 }
  0x10   :  { %362 = vmatpush3.bf16.msra.mxu1 %v374_v39 }
  0x92   :  { %v46_v5 = vpop.xlane.xlu0 %45 }
  0x93   :  { %v51_v6 = vmul.f32 0.03125, %v46_v5 }
  0x95   :  { %v53_v7 = vsub.f32 %v438_v1, %v51_v6 }
  0x96   :  { %v49_v8 = vpop.xlane.xlu0 %48 }
  0x97   :  { %v52_v9 = vmul.f32 0.03125, %v49_v8  ;;  %v55_v10 = vmul.f32 %v53_v7, %v53_v7 }
  0x99   :  { %v54_v11 = vsub.f32 %v440_v2, %v52_v9  ;;  %v57_v12 = vsel %vm37_vm0, %v55_v10, 0.0 }
  0x9a   :  { %58 = vadd.xlane.f32.xlu1 %v57_v12 }
  0x9b   :  { %v56_v13 = vmul.f32 %v54_v11, %v54_v11 }
  0x9d   :  { %v60_v14 = vsel %vm37_vm0, %v56_v13, 0.0 }
  0x9e   :  { %61 = vadd.xlane.f32.xlu1 %v60_v14 }
 0x127   :  { %v59_v20 = vpop.xlane.xlu1 %58 }
 0x128   :  { %v63_v21 = vmul.f32 0.03125, %v59_v20  ;;  %v329_v20 = vld [vmem:[%s513_s7] ss:$0 sm:$0xff] }
 0x12a   :  { %v65_v22 = vadd.f32 1e-05, %v63_v21 }
 0x12b   :  { %v62_v23 = vpop.xlane.xlu1 %61 }
 0x12c   :  { %375 = vrsqrt.f32 %v65_v22  ;;  %v64_v24 = vmul.f32 0.03125, %v62_v23  ;;  %v330_v23 = vld [vmem:[%s514_s8] ss:$0 sm:$0xff] }
 0x12e   :  { %v66_v25 = vadd.f32 1e-05, %v64_v24 }
 0x130   :  { %377 = vrsqrt.f32 %v66_v25 }
 0x136   :  { %v376_v26 = vpop.eup %375 }
 0x137   :  { %v69_v27 = vmul.f32 %v376_v26, %v53_v7 }
 0x139   :  { %v78_v30 = vmul.f32 %v317_v28, %v69_v27 }
 0x13a   :  { %v378_v29 = vpop.eup %377 }
 0x13b   :  { %v70_v31 = vmul.f32 %v378_v29, %v54_v11  ;;  %v87_v34 = vadd.f32 %v318_v32, %v78_v30 }
 0x13d   :  { %v79_v33 = vmul.f32 %v317_v28, %v70_v31 }
 0x13f   :  { %v88_v35 = vadd.f32 %v318_v32, %v79_v33 }
 0x141   :  { %v89_v36 = vpack.c.bf16 %v88_v35, %v87_v34 }
 0x143   :  { %90 = vst.msk [vmem:[#allocation3] sm:$0xff] %vm37_vm0, %v89_v36 }
 0x14a   :  { %v91_v37 = vld [vmem:[#allocation3] sm:$0xff] }
 0x14b   :  { %352 = vmatmul.mubr.msk.bf16.vlgmr.msra.gmra.mrb[0].mxu0 %vm37_vm0, %v91_v37 }
 0x21e   :  { %v153_v41 = vpop.f32.mrb[0].mxu0 }
 0x21f   :  { %v154_v42 = vadd.f32 %v319_v40, %v153_v41  ;;  %v353_v43 = vpop.f32.mrb[1].mxu0 }
 0x220   :  { %v156_v44 = vpop.f32.mrb[2].mxu0 }
 0x221   :  { %v157_v45 = vadd.f32 %v319_v40, %v156_v44  ;;  %v354_v46 = vpop.f32.mrb[3].mxu0  ;;  %v160_v47 = vmax.f32 %v154_v42, 0.0 }
 0x223   :  { %v161_v48 = vmax.f32 %v157_v45, 0.0 }
 0x225   :  { %v164_v49 = vpack.c.bf16 %v161_v48, %v160_v47 }
 0x227   :  { %364 = vmatmul.mubr.msk.bf16.vlgmr.msra.gmra.mrb[0].mxu1 %vm197_vm2, %v164_v49 }
 0x2fa   :  { %v235_v51 = vpop.f32.mrb[0].mxu1 }
 0x2fb   :  { %v242_v53 = vadd.f32 %v235_v51, %v162_v50  ;;  %v365_v54 = vpop.f32.mrb[1].mxu1 }
 0x2fc   :  { %v238_v55 = vpop.f32.mrb[2].mxu1 }
 0x2fd   :  { %244 = vst.msk [vmem:[#allocation2] sm:$0xff] %vm37_vm0, %v242_v53  ;;  %v243_v56 = vadd.f32 %v238_v55, %v163_v52  ;;  %v366_v57 = vpop.f32.mrb[3].mxu1 }
 0x2ff   :  { %245 = vst.msk [vmem:[#allocation2 + $0x8] sm:$0xff] %vm37_vm0, %v243_v56 }
 0x304   :  { %v249_v59 = vld [vmem:[#allocation2] sm:$0xff] }
 0x305   :  { %v258_v60 = vadd.f32 %v328_v58, %v249_v59 }
 0x306   :  { %v250_v61 = vld [vmem:[#allocation2 + $0x8] sm:$0xff] }
 0x307   :  { %v264_v62 = vadd.f32 %v438_v1, %v258_v60  ;;  %v259_v63 = vadd.f32 %v328_v58, %v250_v61 }
 0x309   :  { %v266_v0 = vsel %vm37_vm0, %v264_v62, 0.0  ;;  %v265_v3 = vadd.f32 %v440_v2, %v259_v63 }
 0x30a   :  { %267 = vadd.xlane.f32.xlu0 %v266_v0 }
 0x30b   :  { %v269_v4 = vsel %vm37_vm0, %v265_v3, 0.0 }
 0x30c   :  { %270 = vadd.xlane.f32.xlu1 %v269_v4 }
 0x397   :  { %v268_v5 = vpop.xlane.xlu0 %267 }
 0x398   :  { %v273_v6 = vmul.f32 0.03125, %v268_v5 }
 0x399   :  { %v271_v7 = vpop.xlane.xlu1 %270 }
 0x39a   :  { %v275_v8 = vsub.f32 %v264_v62, %v273_v6  ;;  %v274_v9 = vmul.f32 0.03125, %v271_v7 }
 0x39c   :  { %v276_v10 = vsub.f32 %v265_v3, %v274_v9  ;;  %v277_v11 = vmul.f32 %v275_v8, %v275_v8 }
 0x39e   :  { %v279_v12 = vsel %vm37_vm0, %v277_v11, 0.0  ;;  %v278_v13 = vmul.f32 %v276_v10, %v276_v10 }
 0x39f   :  { %280 = vadd.xlane.f32.xlu0 %v279_v12 }
 0x3a0   :  { %v282_v1 = vsel %vm37_vm0, %v278_v13, 0.0 }
 0x3a1   :  { %283 = vadd.xlane.f32.xlu1 %v282_v1 }
 0x42c   :  { %v281_v14 = vpop.xlane.xlu0 %280 }
 0x42d   :  { %v285_v2 = vmul.f32 0.03125, %v281_v14 }
 0x42e   :  { %v284_v15 = vpop.xlane.xlu1 %283 }
 0x42f   :  { %v287_v16 = vadd.f32 1e-05, %v285_v2  ;;  %v286_v17 = vmul.f32 0.03125, %v284_v15 }
 0x431   :  { %379 = vrsqrt.f32 %v287_v16  ;;  %v288_v18 = vadd.f32 1e-05, %v286_v17 }
 0x433   :  { %381 = vrsqrt.f32 %v288_v18 }
 0x43b   :  { %v380_v19 = vpop.eup %379 }
 0x43c   :  { %v291_v21 = vmul.f32 %v380_v19, %v275_v8 }
 0x43d   :  { %v382_v22 = vpop.eup %381 }
 0x43e   :  { %v300_v24 = vmul.f32 %v329_v20, %v291_v21  ;;  %v292_v25 = vmul.f32 %v382_v22, %v276_v10 }
 0x440   :  { %v309_v26 = vadd.f32 %v330_v23, %v300_v24  ;;  %v301_v27 = vmul.f32 %v329_v20, %v292_v25 }
 0x442   :  { %311 = vst.msk [vmem:[%s515_s9] sm:$0xff] %vm37_vm0, %v309_v26  ;;  %v310_v28 = vadd.f32 %v330_v23, %v301_v27 }
 0x444   :  { %312 = vst.msk [vmem:[%s515_s9 + $0x8] sm:$0xff] %vm37_vm0, %v310_v28 }

</bundles_post_ra>
